<compile_context>
chip_gen: v5e
topology: v5e:2x2
jax: 0.10.0
libtpu: 0.0.40
codegen_flags: <defaults>
</compile_context>

<pallas_src>
import functools

import jax
import jax.numpy as jnp
from jax.experimental import pallas as pl
from jax.experimental.pallas import tpu as pltpu


# ---------------------------------------------------------------------------
# In-kernel helpers
# ---------------------------------------------------------------------------
def _rows(ref, start, size, stride=1):
    """Static row-slab load from a 2-D VMEM ref -> (size, cols)."""
    if stride == 1:
        return ref[pl.ds(start, size), :]
    return ref[pl.ds(start, size, stride), :]


def _conv_layer(src_ref, dst_ref, w, b, *, B, H, W, kh, kw, stride, relu, paired):
    """Valid conv + bias (+ReLU) on a row-major 2-D activation ref.

    src_ref rows are (b, h, w) flattened, columns are channels.  When `paired`
    the source packs two adjacent W positions into the lane dim (2*Cin cols),
    so stride-2 taps become contiguous sublane loads.  dst_ref rows are
    (b, ho, wo) flattened, columns are Cout channels.
    """
    Ho = (H - kh) // stride + 1
    Wo = (W - kw) // stride + 1
    if paired:
        assert stride == 2 and kw % 2 == 0 and W % 2 == 0
        Wrow = W // 2
    else:
        Wrow = W
    for bi in range(B):
        for ho in range(Ho):
            pieces = []
            for i in range(kh):
                base = (bi * H + stride * ho + i) * Wrow
                if paired:
                    for m in range(kw // 2):                 # taps j=2m, 2m+1
                        pieces.append(_rows(src_ref, base + m, Wo))
                else:
                    for j in range(kw):
                        pieces.append(_rows(src_ref, base + j, Wo, stride))
            patch = pieces[0] if len(pieces) == 1 else jnp.concatenate(pieces, axis=1)
            y = jnp.dot(patch, w, preferred_element_type=jnp.float32) + b
            if relu:
                y = jnp.maximum(y, 0.0)
            dst_ref[pl.ds((bi * Ho + ho) * Wo, Wo), :] = y


def _dqn_kernel(x_ref, w1_ref, b1_ref, w2_ref, b2_ref, w3_ref, b3_ref,
                w4_ref, b4_ref, w5_ref, b5_ref,
                out_ref, act1_ref, act2_ref, act3_ref, *,
                B, H, W, conv1_paired, H1, W1, H2, W2, H3, W3):
    # conv1: (B,H,W,Cin) -> (B,H1,W1,32), k=4, s=2, ReLU
    _conv_layer(x_ref, act1_ref, w1_ref[...], b1_ref[...],
                B=B, H=H, W=W, kh=4, kw=4, stride=2, relu=True,
                paired=conv1_paired)
    # conv2: -> (B,H2,W2,64), k=4, s=2, ReLU
    _conv_layer(act1_ref, act2_ref, w2_ref[...], b2_ref[...],
                B=B, H=H1, W=W1, kh=4, kw=4, stride=2, relu=True, paired=False)
    # conv3: -> (B,H3,W3,32), k=3, s=1, ReLU
    _conv_layer(act2_ref, act3_ref, w3_ref[...], b3_ref[...],
                B=B, H=H2, W=W2, kh=3, kw=3, stride=1, relu=True, paired=False)

    # Flatten (PyTorch (C,H,W) order is folded into w4's (p, cin, cout) layout)
    # + Linear(flat, 32) + Linear(32, action_dim)  -- no ReLU between them.
    hw3 = H3 * W3
    acc = jnp.zeros((B, w4_ref.shape[2]), jnp.float32)
    for p in range(hw3):
        rows = act3_ref[...] if hw3 == 1 else act3_ref[pl.ds(p, B, hw3), :]
        acc = acc + jnp.dot(rows, w4_ref[p], preferred_element_type=jnp.float32)
    y4 = acc + b4_ref[...]
    y5 = jnp.dot(y4, w5_ref[...], preferred_element_type=jnp.float32) + b5_ref[...]
    out_ref[...] = y5.astype(out_ref.dtype)


# ---------------------------------------------------------------------------
# Parameters (PyTorch layout) and one-time repacking into kernel layout.
# ---------------------------------------------------------------------------
def conv_out_sizes(height, width):
    h1 = (height - 4) // 2 + 1
    w1 = (width - 4) // 2 + 1
    h2 = (h1 - 4) // 2 + 1
    w2 = (w1 - 4) // 2 + 1
    h3 = h2 - 2
    w3 = w2 - 2
    if min(h1, w1, h2, w2, h3, w3) < 1:
        raise ValueError(f"Input {height}x{width} is too small for the conv stack")
    return h1, w1, h2, w2, h3, w3


def init_params(key, n_layers, height, width, action_dim):
    ks = jax.random.split(key, 10)

    def u(k, shape, fan_in):
        bound = 1.0 / jnp.sqrt(float(fan_in))
        return jax.random.uniform(k, shape, jnp.float32, -bound, bound)

    h1, w1, h2, w2, h3, w3 = conv_out_sizes(height, width)
    flat = 32 * h3 * w3
    # TODO(synk): original module's declared Linear in_features is inconsistent
    # with the conv stack; we use the true flattened size `flat`.
    return {
        "w1": u(ks[0], (32, n_layers, 4, 4), n_layers * 16),
        "b1": u(ks[1], (32,), n_layers * 16),
        "w2": u(ks[2], (64, 32, 4, 4), 32 * 16),
        "b2": u(ks[3], (64,), 32 * 16),
        "w3": u(ks[4], (32, 64, 3, 3), 64 * 9),
        "b3": u(ks[5], (32,), 64 * 9),
        "w4": u(ks[6], (32, flat), flat),          # PyTorch Linear: (out, in)
        "b4": u(ks[7], (32,), flat),
        "w5": u(ks[8], (action_dim, 32), 32),
        "b5": u(ks[9], (action_dim,), 32),
    }


def prepare_params(params, height, width):
    """One-time repack of PyTorch-layout params into MXU-friendly layouts."""
    h1, w1, h2, w2, h3, w3 = conv_out_sizes(height, width)

    def conv_mat(w):  # (Cout, Cin, kh, kw) -> (kh*kw*Cin, Cout), matches patch order
        co, ci, kh, kw = w.shape
        return jnp.transpose(w, (2, 3, 1, 0)).reshape(kh * kw * ci, co)

    # Fold nn.Flatten's (C, H, W) order into w4: (p=h*w3+w, cin, cout).
    w4 = params["w4"].reshape(32, 32, h3, w3)
    w4 = jnp.transpose(w4, (2, 3, 1, 0)).reshape(h3 * w3, 32, 32)

    return {
        "w1": conv_mat(params["w1"]), "b1": params["b1"].reshape(1, -1),
        "w2": conv_mat(params["w2"]), "b2": params["b2"].reshape(1, -1),
        "w3": conv_mat(params["w3"]), "b3": params["b3"].reshape(1, -1),
        "w4": w4,                     "b4": params["b4"].reshape(1, -1),
        "w5": params["w5"].T,         "b5": params["b5"].reshape(1, -1),
    }


# ---------------------------------------------------------------------------
# Fused forward: one pallas_call for the whole network.
# ---------------------------------------------------------------------------
@jax.jit
def convolutional_dqn_forward(prep, x_nchw):
    B, Cin, H, W = x_nchw.shape
    h1, w1, h2, w2, h3, w3 = conv_out_sizes(H, W)
    A = prep["w5"].shape[1]
    paired = (W % 2 == 0)

    # NCHW -> NHWC (layout plumbing only), then flatten rows to (b,h,w[pair]).
    x = jnp.transpose(x_nchw, (0, 2, 3, 1)).astype(jnp.float32)
    if paired:
        x2 = x.reshape(B * H * (W // 2), 2 * Cin)   # pairs of W packed into lanes
    else:
        x2 = x.reshape(B * H * W, Cin)

    kern = functools.partial(
        _dqn_kernel, B=B, H=H, W=W, conv1_paired=paired,
        H1=h1, W1=w1, H2=h2, W2=w2, H3=h3, W3=w3)

    flops = 2 * B * (h1 * w1 * (4 * 4 * Cin) * 32
                     + h2 * w2 * (4 * 4 * 32) * 64
                     + h3 * w3 * (3 * 3 * 64) * 32
                     + (32 * h3 * w3) * 32 + 32 * A)
    nbytes = 4 * (x2.size + sum(int(v.size) for v in prep.values()) + B * A)

    return pl.pallas_call(
        kern,
        out_shape=jax.ShapeDtypeStruct((B, A), jnp.float32),
        scratch_shapes=[
            pltpu.VMEM((B * h1 * w1, 32), jnp.float32),   # conv1 activations
            pltpu.VMEM((B * h2 * w2, 64), jnp.float32),   # conv2 activations
            pltpu.VMEM((B * h3 * w3, 32), jnp.float32),   # conv3 activations
        ],
        cost_estimate=pl.CostEstimate(flops=flops, transcendentals=0,
                                      bytes_accessed=nbytes),
    )(x2, prep["w1"], prep["b1"], prep["w2"], prep["b2"], prep["w3"],
      prep["b3"], prep["w4"], prep["b4"], prep["w5"], prep["b5"])


if __name__ == "__main__":
    # 20x20 spatial is (near) the smallest size for which the conv stack yields
    # a positive output size (16x16 would collapse to zero).
    batch, n_layers, height, width, action_dim = 2, 4, 20, 20, 4
    key = jax.random.PRNGKey(0)
    k_params, k_x = jax.random.split(key)

    params = init_params(k_params, n_layers, height, width, action_dim)
    prep = prepare_params(params, height, width)
    x = jax.random.normal(k_x, (batch, n_layers, height, width), jnp.float32)

    out = convolutional_dqn_forward(prep, x)
    out = jax.block_until_ready(out)
    assert out.shape == (batch, action_dim), out.shape
    print("KERNEL_OK")
</pallas_src>

<mosaic_0001>
module attributes {stable_mosaic.version = 11 : i64} {
  func.func @_dqn_kernel(%arg0: memref<400x8xf32, #tpu.memory_space<vmem>>, %arg1: memref<64x32xf32, #tpu.memory_space<vmem>>, %arg2: memref<1x32xf32, #tpu.memory_space<vmem>>, %arg3: memref<512x64xf32, #tpu.memory_space<vmem>>, %arg4: memref<1x64xf32, #tpu.memory_space<vmem>>, %arg5: memref<576x32xf32, #tpu.memory_space<vmem>>, %arg6: memref<1x32xf32, #tpu.memory_space<vmem>>, %arg7: memref<1x32x32xf32, #tpu.memory_space<vmem>>, %arg8: memref<1x32xf32, #tpu.memory_space<vmem>>, %arg9: memref<32x4xf32, #tpu.memory_space<vmem>>, %arg10: memref<1x4xf32, #tpu.memory_space<vmem>>, %arg11: memref<2x4xf32, #tpu.memory_space<vmem>>, %arg12: memref<162x32xf32, #tpu.memory_space<vmem>>, %arg13: memref<18x64xf32, #tpu.memory_space<vmem>>, %arg14: memref<2x32xf32, #tpu.memory_space<vmem>>) attributes {dimension_semantics = [], scalar_prefetch = 0 : i64, scratch_operands = 3 : i64, tpu.core_type = #tpu.core_type<tc>} {
    %c0 = arith.constant 0 : index
    %c0_0 = arith.constant 0 : index
    %0 = vector.load %arg1[%c0, %c0_0] : memref<64x32xf32, #tpu.memory_space<vmem>>, vector<64x32xf32>
    %c0_1 = arith.constant 0 : index
    %c0_2 = arith.constant 0 : index
    %1 = vector.load %arg2[%c0_1, %c0_2] : memref<1x32xf32, #tpu.memory_space<vmem>>, vector<1x32xf32>
    %c0_3 = arith.constant 0 : index
    %c0_4 = arith.constant 0 : index
    %2 = vector.load %arg0[%c0_3, %c0_4] : memref<400x8xf32, #tpu.memory_space<vmem>>, vector<9x8xf32>
    %c1 = arith.constant 1 : index
    %c0_5 = arith.constant 0 : index
    %3 = vector.load %arg0[%c1, %c0_5] : memref<400x8xf32, #tpu.memory_space<vmem>>, vector<9x8xf32>
    %c10 = arith.constant 10 : index
    %c0_6 = arith.constant 0 : index
    %4 = vector.load %arg0[%c10, %c0_6] : memref<400x8xf32, #tpu.memory_space<vmem>>, vector<9x8xf32>
    %c11 = arith.constant 11 : index
    %c0_7 = arith.constant 0 : index
    %5 = vector.load %arg0[%c11, %c0_7] : memref<400x8xf32, #tpu.memory_space<vmem>>, vector<9x8xf32>
    %c20 = arith.constant 20 : index
    %c0_8 = arith.constant 0 : index
    %6 = vector.load %arg0[%c20, %c0_8] : memref<400x8xf32, #tpu.memory_space<vmem>>, vector<9x8xf32>
    %c21 = arith.constant 21 : index
    %c0_9 = arith.constant 0 : index
    %7 = vector.load %arg0[%c21, %c0_9] : memref<400x8xf32, #tpu.memory_space<vmem>>, vector<9x8xf32>
    %c30 = arith.constant 30 : index
    %c0_10 = arith.constant 0 : index
    %8 = vector.load %arg0[%c30, %c0_10] : memref<400x8xf32, #tpu.memory_space<vmem>>, vector<9x8xf32>
    %c31 = arith.constant 31 : index
    %c0_11 = arith.constant 0 : index
    %9 = vector.load %arg0[%c31, %c0_11] : memref<400x8xf32, #tpu.memory_space<vmem>>, vector<9x8xf32>
    %10 = tpu.concatenate %2, %3, %4, %5, %6, %7, %8, %9 in 1 : vector<9x8xf32>, vector<9x8xf32>, vector<9x8xf32>, vector<9x8xf32>, vector<9x8xf32>, vector<9x8xf32>, vector<9x8xf32>, vector<9x8xf32> -> vector<9x64xf32>
    %cst = arith.constant dense<0.000000e+00> : vector<9x32xf32>
    %11 = tpu.matmul %10, %0, %cst {dimension_numbers = #tpu.dot_dimension_numbers<[1], [0], [0], [1], [0, 0, 1, 1], [], []>} : vector<9x64xf32>, vector<64x32xf32>, vector<9x32xf32> -> vector<9x32xf32>
    %12 = vector.broadcast %1 : vector<1x32xf32> to vector<9x32xf32>
    %13 = arith.addf %11, %12 : vector<9x32xf32>
    %cst_12 = arith.constant 0.000000e+00 : f32
    %14 = vector.broadcast %cst_12 : f32 to vector<9x32xf32>
    %15 = arith.maximumf %13, %14 : vector<9x32xf32>
    %c0_13 = arith.constant 0 : index
    %c0_14 = arith.constant 0 : index
    %16 = vector.load %arg12[%c0_13, %c0_14] : memref<162x32xf32, #tpu.memory_space<vmem>>, vector<9x32xf32>
    tpu.vector_store %arg12[%c0_13, %c0_14], %15 {strides = array<i32>} : memref<162x32xf32, #tpu.memory_space<vmem>>, vector<9x32xf32>,
    %c20_15 = arith.constant 20 : index
    %c0_16 = arith.constant 0 : index
    %17 = vector.load %arg0[%c20_15, %c0_16] : memref<400x8xf32, #tpu.memory_space<vmem>>, vector<9x8xf32>
    %c21_17 = arith.constant 21 : index
    %c0_18 = arith.constant 0 : index
    %18 = vector.load %arg0[%c21_17, %c0_18] : memref<400x8xf32, #tpu.memory_space<vmem>>, vector<9x8xf32>
    %c30_19 = arith.constant 30 : index
    %c0_20 = arith.constant 0 : index
    %19 = vector.load %arg0[%c30_19, %c0_20] : memref<400x8xf32, #tpu.memory_space<vmem>>, vector<9x8xf32>
    %c31_21 = arith.constant 31 : index
    %c0_22 = arith.constant 0 : index
    %20 = vector.load %arg0[%c31_21, %c0_22] : memref<400x8xf32, #tpu.memory_space<vmem>>, vector<9x8xf32>
    %c40 = arith.constant 40 : index
    %c0_23 = arith.constant 0 : index
    %21 = vector.load %arg0[%c40, %c0_23] : memref<400x8xf32, #tpu.memory_space<vmem>>, vector<9x8xf32>
    %c41 = arith.constant 41 : index
    %c0_24 = arith.constant 0 : index
    %22 = vector.load %arg0[%c41, %c0_24] : memref<400x8xf32, #tpu.memory_space<vmem>>, vector<9x8xf32>
    %c50 = arith.constant 50 : index
    %c0_25 = arith.constant 0 : index
    %23 = vector.load %arg0[%c50, %c0_25] : memref<400x8xf32, #tpu.memory_space<vmem>>, vector<9x8xf32>
    %c51 = arith.constant 51 : index
    %c0_26 = arith.constant 0 : index
    %24 = vector.load %arg0[%c51, %c0_26] : memref<400x8xf32, #tpu.memory_space<vmem>>, vector<9x8xf32>
    %25 = tpu.concatenate %17, %18, %19, %20, %21, %22, %23, %24 in 1 : vector<9x8xf32>, vector<9x8xf32>, vector<9x8xf32>, vector<9x8xf32>, vector<9x8xf32>, vector<9x8xf32>, vector<9x8xf32>, vector<9x8xf32> -> vector<9x64xf32>
    %cst_27 = arith.constant dense<0.000000e+00> : vector<9x32xf32>
    %26 = tpu.matmul %25, %0, %cst_27 {dimension_numbers = #tpu.dot_dimension_numbers<[1], [0], [0], [1], [0, 0, 1, 1], [], []>} : vector<9x64xf32>, vector<64x32xf32>, vector<9x32xf32> -> vector<9x32xf32>
    %27 = vector.broadcast %1 : vector<1x32xf32> to vector<9x32xf32>
    %28 = arith.addf %26, %27 : vector<9x32xf32>
    %cst_28 = arith.constant 0.000000e+00 : f32
    %29 = vector.broadcast %cst_28 : f32 to vector<9x32xf32>
    %30 = arith.maximumf %28, %29 : vector<9x32xf32>
    %c9 = arith.constant 9 : index
    %c0_29 = arith.constant 0 : index
    %31 = vector.load %arg12[%c9, %c0_29] : memref<162x32xf32, #tpu.memory_space<vmem>>, vector<9x32xf32>
    tpu.vector_store %arg12[%c9, %c0_29], %30 {strides = array<i32>} : memref<162x32xf32, #tpu.memory_space<vmem>>, vector<9x32xf32>,
    %c40_30 = arith.constant 40 : index
    %c0_31 = arith.constant 0 : index
    %32 = vector.load %arg0[%c40_30, %c0_31] : memref<400x8xf32, #tpu.memory_space<vmem>>, vector<9x8xf32>
    %c41_32 = arith.constant 41 : index
    %c0_33 = arith.constant 0 : index
    %33 = vector.load %arg0[%c41_32, %c0_33] : memref<400x8xf32, #tpu.memory_space<vmem>>, vector<9x8xf32>
    %c50_34 = arith.constant 50 : index
    %c0_35 = arith.constant 0 : index
    %34 = vector.load %arg0[%c50_34, %c0_35] : memref<400x8xf32, #tpu.memory_space<vmem>>, vector<9x8xf32>
    %c51_36 = arith.constant 51 : index
    %c0_37 = arith.constant 0 : index
    %35 = vector.load %arg0[%c51_36, %c0_37] : memref<400x8xf32, #tpu.memory_space<vmem>>, vector<9x8xf32>
    %c60 = arith.constant 60 : index
    %c0_38 = arith.constant 0 : index
    %36 = vector.load %arg0[%c60, %c0_38] : memref<400x8xf32, #tpu.memory_space<vmem>>, vector<9x8xf32>
    %c61 = arith.constant 61 : index
    %c0_39 = arith.constant 0 : index
    %37 = vector.load %arg0[%c61, %c0_39] : memref<400x8xf32, #tpu.memory_space<vmem>>, vector<9x8xf32>
    %c70 = arith.constant 70 : index
    %c0_40 = arith.constant 0 : index
    %38 = vector.load %arg0[%c70, %c0_40] : memref<400x8xf32, #tpu.memory_space<vmem>>, vector<9x8xf32>
    %c71 = arith.constant 71 : index
    %c0_41 = arith.constant 0 : index
    %39 = vector.load %arg0[%c71, %c0_41] : memref<400x8xf32, #tpu.memory_space<vmem>>, vector<9x8xf32>
    %40 = tpu.concatenate %32, %33, %34, %35, %36, %37, %38, %39 in 1 : vector<9x8xf32>, vector<9x8xf32>, vector<9x8xf32>, vector<9x8xf32>, vector<9x8xf32>, vector<9x8xf32>, vector<9x8xf32>, vector<9x8xf32> -> vector<9x64xf32>
    %cst_42 = arith.constant dense<0.000000e+00> : vector<9x32xf32>
    %41 = tpu.matmul %40, %0, %cst_42 {dimension_numbers = #tpu.dot_dimension_numbers<[1], [0], [0], [1], [0, 0, 1, 1], [], []>} : vector<9x64xf32>, vector<64x32xf32>, vector<9x32xf32> -> vector<9x32xf32>
    %42 = vector.broadcast %1 : vector<1x32xf32> to vector<9x32xf32>
    %43 = arith.addf %41, %42 : vector<9x32xf32>
    %cst_43 = arith.constant 0.000000e+00 : f32
    %44 = vector.broadcast %cst_43 : f32 to vector<9x32xf32>
    %45 = arith.maximumf %43, %44 : vector<9x32xf32>
    %c18 = arith.constant 18 : index
    %c0_44 = arith.constant 0 : index
    %46 = vector.load %arg12[%c18, %c0_44] : memref<162x32xf32, #tpu.memory_space<vmem>>, vector<9x32xf32>
    tpu.vector_store %arg12[%c18, %c0_44], %45 {strides = array<i32>} : memref<162x32xf32, #tpu.memory_space<vmem>>, vector<9x32xf32>,
    %c60_45 = arith.constant 60 : index
    %c0_46 = arith.constant 0 : index
    %47 = vector.load %arg0[%c60_45, %c0_46] : memref<400x8xf32, #tpu.memory_space<vmem>>, vector<9x8xf32>
    %c61_47 = arith.constant 61 : index
    %c0_48 = arith.constant 0 : index
    %48 = vector.load %arg0[%c61_47, %c0_48] : memref<400x8xf32, #tpu.memory_space<vmem>>, vector<9x8xf32>
    %c70_49 = arith.constant 70 : index
    %c0_50 = arith.constant 0 : index
    %49 = vector.load %arg0[%c70_49, %c0_50] : memref<400x8xf32, #tpu.memory_space<vmem>>, vector<9x8xf32>
    %c71_51 = arith.constant 71 : index
    %c0_52 = arith.constant 0 : index
    %50 = vector.load %arg0[%c71_51, %c0_52] : memref<400x8xf32, #tpu.memory_space<vmem>>, vector<9x8xf32>
    %c80 = arith.constant 80 : index
    %c0_53 = arith.constant 0 : index
    %51 = vector.load %arg0[%c80, %c0_53] : memref<400x8xf32, #tpu.memory_space<vmem>>, vector<9x8xf32>
    %c81 = arith.constant 81 : index
    %c0_54 = arith.constant 0 : index
    %52 = vector.load %arg0[%c81, %c0_54] : memref<400x8xf32, #tpu.memory_space<vmem>>, vector<9x8xf32>
    %c90 = arith.constant 90 : index
    %c0_55 = arith.constant 0 : index
    %53 = vector.load %arg0[%c90, %c0_55] : memref<400x8xf32, #tpu.memory_space<vmem>>, vector<9x8xf32>
    %c91 = arith.constant 91 : index
    %c0_56 = arith.constant 0 : index
    %54 = vector.load %arg0[%c91, %c0_56] : memref<400x8xf32, #tpu.memory_space<vmem>>, vector<9x8xf32>
    %55 = tpu.concatenate %47, %48, %49, %50, %51, %52, %53, %54 in 1 : vector<9x8xf32>, vector<9x8xf32>, vector<9x8xf32>, vector<9x8xf32>, vector<9x8xf32>, vector<9x8xf32>, vector<9x8xf32>, vector<9x8xf32> -> vector<9x64xf32>
    %cst_57 = arith.constant dense<0.000000e+00> : vector<9x32xf32>
    %56 = tpu.matmul %55, %0, %cst_57 {dimension_numbers = #tpu.dot_dimension_numbers<[1], [0], [0], [1], [0, 0, 1, 1], [], []>} : vector<9x64xf32>, vector<64x32xf32>, vector<9x32xf32> -> vector<9x32xf32>
    %57 = vector.broadcast %1 : vector<1x32xf32> to vector<9x32xf32>
    %58 = arith.addf %56, %57 : vector<9x32xf32>
    %cst_58 = arith.constant 0.000000e+00 : f32
    %59 = vector.broadcast %cst_58 : f32 to vector<9x32xf32>
    %60 = arith.maximumf %58, %59 : vector<9x32xf32>
    %c27 = arith.constant 27 : index
    %c0_59 = arith.constant 0 : index
    %61 = vector.load %arg12[%c27, %c0_59] : memref<162x32xf32, #tpu.memory_space<vmem>>, vector<9x32xf32>
    tpu.vector_store %arg12[%c27, %c0_59], %60 {strides = array<i32>} : memref<162x32xf32, #tpu.memory_space<vmem>>, vector<9x32xf32>,
    %c80_60 = arith.constant 80 : index
    %c0_61 = arith.constant 0 : index
    %62 = vector.load %arg0[%c80_60, %c0_61] : memref<400x8xf32, #tpu.memory_space<vmem>>, vector<9x8xf32>
    %c81_62 = arith.constant 81 : index
    %c0_63 = arith.constant 0 : index
    %63 = vector.load %arg0[%c81_62, %c0_63] : memref<400x8xf32, #tpu.memory_space<vmem>>, vector<9x8xf32>
    %c90_64 = arith.constant 90 : index
    %c0_65 = arith.constant 0 : index
    %64 = vector.load %arg0[%c90_64, %c0_65] : memref<400x8xf32, #tpu.memory_space<vmem>>, vector<9x8xf32>
    %c91_66 = arith.constant 91 : index
    %c0_67 = arith.constant 0 : index
    %65 = vector.load %arg0[%c91_66, %c0_67] : memref<400x8xf32, #tpu.memory_space<vmem>>, vector<9x8xf32>
    %c100 = arith.constant 100 : index
    %c0_68 = arith.constant 0 : index
    %66 = vector.load %arg0[%c100, %c0_68] : memref<400x8xf32, #tpu.memory_space<vmem>>, vector<9x8xf32>
    %c101 = arith.constant 101 : index
    %c0_69 = arith.constant 0 : index
    %67 = vector.load %arg0[%c101, %c0_69] : memref<400x8xf32, #tpu.memory_space<vmem>>, vector<9x8xf32>
    %c110 = arith.constant 110 : index
    %c0_70 = arith.constant 0 : index
    %68 = vector.load %arg0[%c110, %c0_70] : memref<400x8xf32, #tpu.memory_space<vmem>>, vector<9x8xf32>
    %c111 = arith.constant 111 : index
    %c0_71 = arith.constant 0 : index
    %69 = vector.load %arg0[%c111, %c0_71] : memref<400x8xf32, #tpu.memory_space<vmem>>, vector<9x8xf32>
    %70 = tpu.concatenate %62, %63, %64, %65, %66, %67, %68, %69 in 1 : vector<9x8xf32>, vector<9x8xf32>, vector<9x8xf32>, vector<9x8xf32>, vector<9x8xf32>, vector<9x8xf32>, vector<9x8xf32>, vector<9x8xf32> -> vector<9x64xf32>
    %cst_72 = arith.constant dense<0.000000e+00> : vector<9x32xf32>
    %71 = tpu.matmul %70, %0, %cst_72 {dimension_numbers = #tpu.dot_dimension_numbers<[1], [0], [0], [1], [0, 0, 1, 1], [], []>} : vector<9x64xf32>, vector<64x32xf32>, vector<9x32xf32> -> vector<9x32xf32>
    %72 = vector.broadcast %1 : vector<1x32xf32> to vector<9x32xf32>
    %73 = arith.addf %71, %72 : vector<9x32xf32>
    %cst_73 = arith.constant 0.000000e+00 : f32
    %74 = vector.broadcast %cst_73 : f32 to vector<9x32xf32>
    %75 = arith.maximumf %73, %74 : vector<9x32xf32>
    %c36 = arith.constant 36 : index
    %c0_74 = arith.constant 0 : index
    %76 = vector.load %arg12[%c36, %c0_74] : memref<162x32xf32, #tpu.memory_space<vmem>>, vector<9x32xf32>
    tpu.vector_store %arg12[%c36, %c0_74], %75 {strides = array<i32>} : memref<162x32xf32, #tpu.memory_space<vmem>>, vector<9x32xf32>,
    %c100_75 = arith.constant 100 : index
    %c0_76 = arith.constant 0 : index
    %77 = vector.load %arg0[%c100_75, %c0_76] : memref<400x8xf32, #tpu.memory_space<vmem>>, vector<9x8xf32>
    %c101_77 = arith.constant 101 : index
    %c0_78 = arith.constant 0 : index
    %78 = vector.load %arg0[%c101_77, %c0_78] : memref<400x8xf32, #tpu.memory_space<vmem>>, vector<9x8xf32>
    %c110_79 = arith.constant 110 : index
    %c0_80 = arith.constant 0 : index
    %79 = vector.load %arg0[%c110_79, %c0_80] : memref<400x8xf32, #tpu.memory_space<vmem>>, vector<9x8xf32>
    %c111_81 = arith.constant 111 : index
    %c0_82 = arith.constant 0 : index
    %80 = vector.load %arg0[%c111_81, %c0_82] : memref<400x8xf32, #tpu.memory_space<vmem>>, vector<9x8xf32>
    %c120 = arith.constant 120 : index
    %c0_83 = arith.constant 0 : index
    %81 = vector.load %arg0[%c120, %c0_83] : memref<400x8xf32, #tpu.memory_space<vmem>>, vector<9x8xf32>
    %c121 = arith.constant 121 : index
    %c0_84 = arith.constant 0 : index
    %82 = vector.load %arg0[%c121, %c0_84] : memref<400x8xf32, #tpu.memory_space<vmem>>, vector<9x8xf32>
    %c130 = arith.constant 130 : index
    %c0_85 = arith.constant 0 : index
    %83 = vector.load %arg0[%c130, %c0_85] : memref<400x8xf32, #tpu.memory_space<vmem>>, vector<9x8xf32>
    %c131 = arith.constant 131 : index
    %c0_86 = arith.constant 0 : index
    %84 = vector.load %arg0[%c131, %c0_86] : memref<400x8xf32, #tpu.memory_space<vmem>>, vector<9x8xf32>
    %85 = tpu.concatenate %77, %78, %79, %80, %81, %82, %83, %84 in 1 : vector<9x8xf32>, vector<9x8xf32>, vector<9x8xf32>, vector<9x8xf32>, vector<9x8xf32>, vector<9x8xf32>, vector<9x8xf32>, vector<9x8xf32> -> vector<9x64xf32>
    %cst_87 = arith.constant dense<0.000000e+00> : vector<9x32xf32>
    %86 = tpu.matmul %85, %0, %cst_87 {dimension_numbers = #tpu.dot_dimension_numbers<[1], [0], [0], [1], [0, 0, 1, 1], [], []>} : vector<9x64xf32>, vector<64x32xf32>, vector<9x32xf32> -> vector<9x32xf32>
    %87 = vector.broadcast %1 : vector<1x32xf32> to vector<9x32xf32>
    %88 = arith.addf %86, %87 : vector<9x32xf32>
    %cst_88 = arith.constant 0.000000e+00 : f32
    %89 = vector.broadcast %cst_88 : f32 to vector<9x32xf32>
    %90 = arith.maximumf %88, %89 : vector<9x32xf32>
    %c45 = arith.constant 45 : index
    %c0_89 = arith.constant 0 : index
    %91 = vector.load %arg12[%c45, %c0_89] : memref<162x32xf32, #tpu.memory_space<vmem>>, vector<9x32xf32>
    tpu.vector_store %arg12[%c45, %c0_89], %90 {strides = array<i32>} : memref<162x32xf32, #tpu.memory_space<vmem>>, vector<9x32xf32>,
    %c120_90 = arith.constant 120 : index
    %c0_91 = arith.constant 0 : index
    %92 = vector.load %arg0[%c120_90, %c0_91] : memref<400x8xf32, #tpu.memory_space<vmem>>, vector<9x8xf32>
    %c121_92 = arith.constant 121 : index
    %c0_93 = arith.constant 0 : index
    %93 = vector.load %arg0[%c121_92, %c0_93] : memref<400x8xf32, #tpu.memory_space<vmem>>, vector<9x8xf32>
    %c130_94 = arith.constant 130 : index
    %c0_95 = arith.constant 0 : index
    %94 = vector.load %arg0[%c130_94, %c0_95] : memref<400x8xf32, #tpu.memory_space<vmem>>, vector<9x8xf32>
    %c131_96 = arith.constant 131 : index
    %c0_97 = arith.constant 0 : index
    %95 = vector.load %arg0[%c131_96, %c0_97] : memref<400x8xf32, #tpu.memory_space<vmem>>, vector<9x8xf32>
    %c140 = arith.constant 140 : index
    %c0_98 = arith.constant 0 : index
    %96 = vector.load %arg0[%c140, %c0_98] : memref<400x8xf32, #tpu.memory_space<vmem>>, vector<9x8xf32>
    %c141 = arith.constant 141 : index
    %c0_99 = arith.constant 0 : index
    %97 = vector.load %arg0[%c141, %c0_99] : memref<400x8xf32, #tpu.memory_space<vmem>>, vector<9x8xf32>
    %c150 = arith.constant 150 : index
    %c0_100 = arith.constant 0 : index
    %98 = vector.load %arg0[%c150, %c0_100] : memref<400x8xf32, #tpu.memory_space<vmem>>, vector<9x8xf32>
    %c151 = arith.constant 151 : index
    %c0_101 = arith.constant 0 : index
    %99 = vector.load %arg0[%c151, %c0_101] : memref<400x8xf32, #tpu.memory_space<vmem>>, vector<9x8xf32>
    %100 = tpu.concatenate %92, %93, %94, %95, %96, %97, %98, %99 in 1 : vector<9x8xf32>, vector<9x8xf32>, vector<9x8xf32>, vector<9x8xf32>, vector<9x8xf32>, vector<9x8xf32>, vector<9x8xf32>, vector<9x8xf32> -> vector<9x64xf32>
    %cst_102 = arith.constant dense<0.000000e+00> : vector<9x32xf32>
    %101 = tpu.matmul %100, %0, %cst_102 {dimension_numbers = #tpu.dot_dimension_numbers<[1], [0], [0], [1], [0, 0, 1, 1], [], []>} : vector<9x64xf32>, vector<64x32xf32>, vector<9x32xf32> -> vector<9x32xf32>
    %102 = vector.broadcast %1 : vector<1x32xf32> to vector<9x32xf32>
    %103 = arith.addf %101, %102 : vector<9x32xf32>
    %cst_103 = arith.constant 0.000000e+00 : f32
    %104 = vector.broadcast %cst_103 : f32 to vector<9x32xf32>
    %105 = arith.maximumf %103, %104 : vector<9x32xf32>
    %c54 = arith.constant 54 : index
    %c0_104 = arith.constant 0 : index
    %106 = vector.load %arg12[%c54, %c0_104] : memref<162x32xf32, #tpu.memory_space<vmem>>, vector<9x32xf32>
    tpu.vector_store %arg12[%c54, %c0_104], %105 {strides = array<i32>} : memref<162x32xf32, #tpu.memory_space<vmem>>, vector<9x32xf32>,
    %c140_105 = arith.constant 140 : index
    %c0_106 = arith.constant 0 : index
    %107 = vector.load %arg0[%c140_105, %c0_106] : memref<400x8xf32, #tpu.memory_space<vmem>>, vector<9x8xf32>
    %c141_107 = arith.constant 141 : index
    %c0_108 = arith.constant 0 : index
    %108 = vector.load %arg0[%c141_107, %c0_108] : memref<400x8xf32, #tpu.memory_space<vmem>>, vector<9x8xf32>
    %c150_109 = arith.constant 150 : index
    %c0_110 = arith.constant 0 : index
    %109 = vector.load %arg0[%c150_109, %c0_110] : memref<400x8xf32, #tpu.memory_space<vmem>>, vector<9x8xf32>
    %c151_111 = arith.constant 151 : index
    %c0_112 = arith.constant 0 : index
    %110 = vector.load %arg0[%c151_111, %c0_112] : memref<400x8xf32, #tpu.memory_space<vmem>>, vector<9x8xf32>
    %c160 = arith.constant 160 : index
    %c0_113 = arith.constant 0 : index
    %111 = vector.load %arg0[%c160, %c0_113] : memref<400x8xf32, #tpu.memory_space<vmem>>, vector<9x8xf32>
    %c161 = arith.constant 161 : index
    %c0_114 = arith.constant 0 : index
    %112 = vector.load %arg0[%c161, %c0_114] : memref<400x8xf32, #tpu.memory_space<vmem>>, vector<9x8xf32>
    %c170 = arith.constant 170 : index
    %c0_115 = arith.constant 0 : index
    %113 = vector.load %arg0[%c170, %c0_115] : memref<400x8xf32, #tpu.memory_space<vmem>>, vector<9x8xf32>
    %c171 = arith.constant 171 : index
    %c0_116 = arith.constant 0 : index
    %114 = vector.load %arg0[%c171, %c0_116] : memref<400x8xf32, #tpu.memory_space<vmem>>, vector<9x8xf32>
    %115 = tpu.concatenate %107, %108, %109, %110, %111, %112, %113, %114 in 1 : vector<9x8xf32>, vector<9x8xf32>, vector<9x8xf32>, vector<9x8xf32>, vector<9x8xf32>, vector<9x8xf32>, vector<9x8xf32>, vector<9x8xf32> -> vector<9x64xf32>
    %cst_117 = arith.constant dense<0.000000e+00> : vector<9x32xf32>
    %116 = tpu.matmul %115, %0, %cst_117 {dimension_numbers = #tpu.dot_dimension_numbers<[1], [0], [0], [1], [0, 0, 1, 1], [], []>} : vector<9x64xf32>, vector<64x32xf32>, vector<9x32xf32> -> vector<9x32xf32>
    %117 = vector.broadcast %1 : vector<1x32xf32> to vector<9x32xf32>
    %118 = arith.addf %116, %117 : vector<9x32xf32>
    %cst_118 = arith.constant 0.000000e+00 : f32
    %119 = vector.broadcast %cst_118 : f32 to vector<9x32xf32>
    %120 = arith.maximumf %118, %119 : vector<9x32xf32>
    %c63 = arith.constant 63 : index
    %c0_119 = arith.constant 0 : index
    %121 = vector.load %arg12[%c63, %c0_119] : memref<162x32xf32, #tpu.memory_space<vmem>>, vector<9x32xf32>
    tpu.vector_store %arg12[%c63, %c0_119], %120 {strides = array<i32>} : memref<162x32xf32, #tpu.memory_space<vmem>>, vector<9x32xf32>,
    %c160_120 = arith.constant 160 : index
    %c0_121 = arith.constant 0 : index
    %122 = vector.load %arg0[%c160_120, %c0_121] : memref<400x8xf32, #tpu.memory_space<vmem>>, vector<9x8xf32>
    %c161_122 = arith.constant 161 : index
    %c0_123 = arith.constant 0 : index
    %123 = vector.load %arg0[%c161_122, %c0_123] : memref<400x8xf32, #tpu.memory_space<vmem>>, vector<9x8xf32>
    %c170_124 = arith.constant 170 : index
    %c0_125 = arith.constant 0 : index
    %124 = vector.load %arg0[%c170_124, %c0_125] : memref<400x8xf32, #tpu.memory_space<vmem>>, vector<9x8xf32>
    %c171_126 = arith.constant 171 : index
    %c0_127 = arith.constant 0 : index
    %125 = vector.load %arg0[%c171_126, %c0_127] : memref<400x8xf32, #tpu.memory_space<vmem>>, vector<9x8xf32>
    %c180 = arith.constant 180 : index
    %c0_128 = arith.constant 0 : index
    %126 = vector.load %arg0[%c180, %c0_128] : memref<400x8xf32, #tpu.memory_space<vmem>>, vector<9x8xf32>
    %c181 = arith.constant 181 : index
    %c0_129 = arith.constant 0 : index
    %127 = vector.load %arg0[%c181, %c0_129] : memref<400x8xf32, #tpu.memory_space<vmem>>, vector<9x8xf32>
    %c190 = arith.constant 190 : index
    %c0_130 = arith.constant 0 : index
    %128 = vector.load %arg0[%c190, %c0_130] : memref<400x8xf32, #tpu.memory_space<vmem>>, vector<9x8xf32>
    %c191 = arith.constant 191 : index
    %c0_131 = arith.constant 0 : index
    %129 = vector.load %arg0[%c191, %c0_131] : memref<400x8xf32, #tpu.memory_space<vmem>>, vector<9x8xf32>
    %130 = tpu.concatenate %122, %123, %124, %125, %126, %127, %128, %129 in 1 : vector<9x8xf32>, vector<9x8xf32>, vector<9x8xf32>, vector<9x8xf32>, vector<9x8xf32>, vector<9x8xf32>, vector<9x8xf32>, vector<9x8xf32> -> vector<9x64xf32>
    %cst_132 = arith.constant dense<0.000000e+00> : vector<9x32xf32>
    %131 = tpu.matmul %130, %0, %cst_132 {dimension_numbers = #tpu.dot_dimension_numbers<[1], [0], [0], [1], [0, 0, 1, 1], [], []>} : vector<9x64xf32>, vector<64x32xf32>, vector<9x32xf32> -> vector<9x32xf32>
    %132 = vector.broadcast %1 : vector<1x32xf32> to vector<9x32xf32>
    %133 = arith.addf %131, %132 : vector<9x32xf32>
    %cst_133 = arith.constant 0.000000e+00 : f32
    %134 = vector.broadcast %cst_133 : f32 to vector<9x32xf32>
    %135 = arith.maximumf %133, %134 : vector<9x32xf32>
    %c72 = arith.constant 72 : index
    %c0_134 = arith.constant 0 : index
    %136 = vector.load %arg12[%c72, %c0_134] : memref<162x32xf32, #tpu.memory_space<vmem>>, vector<9x32xf32>
    tpu.vector_store %arg12[%c72, %c0_134], %135 {strides = array<i32>} : memref<162x32xf32, #tpu.memory_space<vmem>>, vector<9x32xf32>,
    %c200 = arith.constant 200 : index
    %c0_135 = arith.constant 0 : index
    %137 = vector.load %arg0[%c200, %c0_135] : memref<400x8xf32, #tpu.memory_space<vmem>>, vector<9x8xf32>
    %c201 = arith.constant 201 : index
    %c0_136 = arith.constant 0 : index
    %138 = vector.load %arg0[%c201, %c0_136] : memref<400x8xf32, #tpu.memory_space<vmem>>, vector<9x8xf32>
    %c210 = arith.constant 210 : index
    %c0_137 = arith.constant 0 : index
    %139 = vector.load %arg0[%c210, %c0_137] : memref<400x8xf32, #tpu.memory_space<vmem>>, vector<9x8xf32>
    %c211 = arith.constant 211 : index
    %c0_138 = arith.constant 0 : index
    %140 = vector.load %arg0[%c211, %c0_138] : memref<400x8xf32, #tpu.memory_space<vmem>>, vector<9x8xf32>
    %c220 = arith.constant 220 : index
    %c0_139 = arith.constant 0 : index
    %141 = vector.load %arg0[%c220, %c0_139] : memref<400x8xf32, #tpu.memory_space<vmem>>, vector<9x8xf32>
    %c221 = arith.constant 221 : index
    %c0_140 = arith.constant 0 : index
    %142 = vector.load %arg0[%c221, %c0_140] : memref<400x8xf32, #tpu.memory_space<vmem>>, vector<9x8xf32>
    %c230 = arith.constant 230 : index
    %c0_141 = arith.constant 0 : index
    %143 = vector.load %arg0[%c230, %c0_141] : memref<400x8xf32, #tpu.memory_space<vmem>>, vector<9x8xf32>
    %c231 = arith.constant 231 : index
    %c0_142 = arith.constant 0 : index
    %144 = vector.load %arg0[%c231, %c0_142] : memref<400x8xf32, #tpu.memory_space<vmem>>, vector<9x8xf32>
    %145 = tpu.concatenate %137, %138, %139, %140, %141, %142, %143, %144 in 1 : vector<9x8xf32>, vector<9x8xf32>, vector<9x8xf32>, vector<9x8xf32>, vector<9x8xf32>, vector<9x8xf32>, vector<9x8xf32>, vector<9x8xf32> -> vector<9x64xf32>
    %cst_143 = arith.constant dense<0.000000e+00> : vector<9x32xf32>
    %146 = tpu.matmul %145, %0, %cst_143 {dimension_numbers = #tpu.dot_dimension_numbers<[1], [0], [0], [1], [0, 0, 1, 1], [], []>} : vector<9x64xf32>, vector<64x32xf32>, vector<9x32xf32> -> vector<9x32xf32>
    %147 = vector.broadcast %1 : vector<1x32xf32> to vector<9x32xf32>
    %148 = arith.addf %146, %147 : vector<9x32xf32>
    %cst_144 = arith.constant 0.000000e+00 : f32
    %149 = vector.broadcast %cst_144 : f32 to vector<9x32xf32>
    %150 = arith.maximumf %148, %149 : vector<9x32xf32>
    %c81_145 = arith.constant 81 : index
    %c0_146 = arith.constant 0 : index
    %151 = vector.load %arg12[%c81_145, %c0_146] : memref<162x32xf32, #tpu.memory_space<vmem>>, vector<9x32xf32>
    tpu.vector_store %arg12[%c81_145, %c0_146], %150 {strides = array<i32>} : memref<162x32xf32, #tpu.memory_space<vmem>>, vector<9x32xf32>,
    %c220_147 = arith.constant 220 : index
    %c0_148 = arith.constant 0 : index
    %152 = vector.load %arg0[%c220_147, %c0_148] : memref<400x8xf32, #tpu.memory_space<vmem>>, vector<9x8xf32>
    %c221_149 = arith.constant 221 : index
    %c0_150 = arith.constant 0 : index
    %153 = vector.load %arg0[%c221_149, %c0_150] : memref<400x8xf32, #tpu.memory_space<vmem>>, vector<9x8xf32>
    %c230_151 = arith.constant 230 : index
    %c0_152 = arith.constant 0 : index
    %154 = vector.load %arg0[%c230_151, %c0_152] : memref<400x8xf32, #tpu.memory_space<vmem>>, vector<9x8xf32>
    %c231_153 = arith.constant 231 : index
    %c0_154 = arith.constant 0 : index
    %155 = vector.load %arg0[%c231_153, %c0_154] : memref<400x8xf32, #tpu.memory_space<vmem>>, vector<9x8xf32>
    %c240 = arith.constant 240 : index
    %c0_155 = arith.constant 0 : index
    %156 = vector.load %arg0[%c240, %c0_155] : memref<400x8xf32, #tpu.memory_space<vmem>>, vector<9x8xf32>
    %c241 = arith.constant 241 : index
    %c0_156 = arith.constant 0 : index
    %157 = vector.load %arg0[%c241, %c0_156] : memref<400x8xf32, #tpu.memory_space<vmem>>, vector<9x8xf32>
    %c250 = arith.constant 250 : index
    %c0_157 = arith.constant 0 : index
    %158 = vector.load %arg0[%c250, %c0_157] : memref<400x8xf32, #tpu.memory_space<vmem>>, vector<9x8xf32>
    %c251 = arith.constant 251 : index
    %c0_158 = arith.constant 0 : index
    %159 = vector.load %arg0[%c251, %c0_158] : memref<400x8xf32, #tpu.memory_space<vmem>>, vector<9x8xf32>
    %160 = tpu.concatenate %152, %153, %154, %155, %156, %157, %158, %159 in 1 : vector<9x8xf32>, vector<9x8xf32>, vector<9x8xf32>, vector<9x8xf32>, vector<9x8xf32>, vector<9x8xf32>, vector<9x8xf32>, vector<9x8xf32> -> vector<9x64xf32>
    %cst_159 = arith.constant dense<0.000000e+00> : vector<9x32xf32>
    %161 = tpu.matmul %160, %0, %cst_159 {dimension_numbers = #tpu.dot_dimension_numbers<[1], [0], [0], [1], [0, 0, 1, 1], [], []>} : vector<9x64xf32>, vector<64x32xf32>, vector<9x32xf32> -> vector<9x32xf32>
    %162 = vector.broadcast %1 : vector<1x32xf32> to vector<9x32xf32>
    %163 = arith.addf %161, %162 : vector<9x32xf32>
    %cst_160 = arith.constant 0.000000e+00 : f32
    %164 = vector.broadcast %cst_160 : f32 to vector<9x32xf32>
    %165 = arith.maximumf %163, %164 : vector<9x32xf32>
    %c90_161 = arith.constant 90 : index
    %c0_162 = arith.constant 0 : index
    %166 = vector.load %arg12[%c90_161, %c0_162] : memref<162x32xf32, #tpu.memory_space<vmem>>, vector<9x32xf32>
    tpu.vector_store %arg12[%c90_161, %c0_162], %165 {strides = array<i32>} : memref<162x32xf32, #tpu.memory_space<vmem>>, vector<9x32xf32>,
    %c240_163 = arith.constant 240 : index
    %c0_164 = arith.constant 0 : index
    %167 = vector.load %arg0[%c240_163, %c0_164] : memref<400x8xf32, #tpu.memory_space<vmem>>, vector<9x8xf32>
    %c241_165 = arith.constant 241 : index
    %c0_166 = arith.constant 0 : index
    %168 = vector.load %arg0[%c241_165, %c0_166] : memref<400x8xf32, #tpu.memory_space<vmem>>, vector<9x8xf32>
    %c250_167 = arith.constant 250 : index
    %c0_168 = arith.constant 0 : index
    %169 = vector.load %arg0[%c250_167, %c0_168] : memref<400x8xf32, #tpu.memory_space<vmem>>, vector<9x8xf32>
    %c251_169 = arith.constant 251 : index
    %c0_170 = arith.constant 0 : index
    %170 = vector.load %arg0[%c251_169, %c0_170] : memref<400x8xf32, #tpu.memory_space<vmem>>, vector<9x8xf32>
    %c260 = arith.constant 260 : index
    %c0_171 = arith.constant 0 : index
    %171 = vector.load %arg0[%c260, %c0_171] : memref<400x8xf32, #tpu.memory_space<vmem>>, vector<9x8xf32>
    %c261 = arith.constant 261 : index
    %c0_172 = arith.constant 0 : index
    %172 = vector.load %arg0[%c261, %c0_172] : memref<400x8xf32, #tpu.memory_space<vmem>>, vector<9x8xf32>
    %c270 = arith.constant 270 : index
    %c0_173 = arith.constant 0 : index
    %173 = vector.load %arg0[%c270, %c0_173] : memref<400x8xf32, #tpu.memory_space<vmem>>, vector<9x8xf32>
    %c271 = arith.constant 271 : index
    %c0_174 = arith.constant 0 : index
    %174 = vector.load %arg0[%c271, %c0_174] : memref<400x8xf32, #tpu.memory_space<vmem>>, vector<9x8xf32>
    %175 = tpu.concatenate %167, %168, %169, %170, %171, %172, %173, %174 in 1 : vector<9x8xf32>, vector<9x8xf32>, vector<9x8xf32>, vector<9x8xf32>, vector<9x8xf32>, vector<9x8xf32>, vector<9x8xf32>, vector<9x8xf32> -> vector<9x64xf32>
    %cst_175 = arith.constant dense<0.000000e+00> : vector<9x32xf32>
    %176 = tpu.matmul %175, %0, %cst_175 {dimension_numbers = #tpu.dot_dimension_numbers<[1], [0], [0], [1], [0, 0, 1, 1], [], []>} : vector<9x64xf32>, vector<64x32xf32>, vector<9x32xf32> -> vector<9x32xf32>
    %177 = vector.broadcast %1 : vector<1x32xf32> to vector<9x32xf32>
    %178 = arith.addf %176, %177 : vector<9x32xf32>
    %cst_176 = arith.constant 0.000000e+00 : f32
    %179 = vector.broadcast %cst_176 : f32 to vector<9x32xf32>
    %180 = arith.maximumf %178, %179 : vector<9x32xf32>
    %c99 = arith.constant 99 : index
    %c0_177 = arith.constant 0 : index
    %181 = vector.load %arg12[%c99, %c0_177] : memref<162x32xf32, #tpu.memory_space<vmem>>, vector<9x32xf32>
    tpu.vector_store %arg12[%c99, %c0_177], %180 {strides = array<i32>} : memref<162x32xf32, #tpu.memory_space<vmem>>, vector<9x32xf32>,
    %c260_178 = arith.constant 260 : index
    %c0_179 = arith.constant 0 : index
    %182 = vector.load %arg0[%c260_178, %c0_179] : memref<400x8xf32, #tpu.memory_space<vmem>>, vector<9x8xf32>
    %c261_180 = arith.constant 261 : index
    %c0_181 = arith.constant 0 : index
    %183 = vector.load %arg0[%c261_180, %c0_181] : memref<400x8xf32, #tpu.memory_space<vmem>>, vector<9x8xf32>
    %c270_182 = arith.constant 270 : index
    %c0_183 = arith.constant 0 : index
    %184 = vector.load %arg0[%c270_182, %c0_183] : memref<400x8xf32, #tpu.memory_space<vmem>>, vector<9x8xf32>
    %c271_184 = arith.constant 271 : index
    %c0_185 = arith.constant 0 : index
    %185 = vector.load %arg0[%c271_184, %c0_185] : memref<400x8xf32, #tpu.memory_space<vmem>>, vector<9x8xf32>
    %c280 = arith.constant 280 : index
    %c0_186 = arith.constant 0 : index
    %186 = vector.load %arg0[%c280, %c0_186] : memref<400x8xf32, #tpu.memory_space<vmem>>, vector<9x8xf32>
    %c281 = arith.constant 281 : index
    %c0_187 = arith.constant 0 : index
    %187 = vector.load %arg0[%c281, %c0_187] : memref<400x8xf32, #tpu.memory_space<vmem>>, vector<9x8xf32>
    %c290 = arith.constant 290 : index
    %c0_188 = arith.constant 0 : index
    %188 = vector.load %arg0[%c290, %c0_188] : memref<400x8xf32, #tpu.memory_space<vmem>>, vector<9x8xf32>
    %c291 = arith.constant 291 : index
    %c0_189 = arith.constant 0 : index
    %189 = vector.load %arg0[%c291, %c0_189] : memref<400x8xf32, #tpu.memory_space<vmem>>, vector<9x8xf32>
    %190 = tpu.concatenate %182, %183, %184, %185, %186, %187, %188, %189 in 1 : vector<9x8xf32>, vector<9x8xf32>, vector<9x8xf32>, vector<9x8xf32>, vector<9x8xf32>, vector<9x8xf32>, vector<9x8xf32>, vector<9x8xf32> -> vector<9x64xf32>
    %cst_190 = arith.constant dense<0.000000e+00> : vector<9x32xf32>
    %191 = tpu.matmul %190, %0, %cst_190 {dimension_numbers = #tpu.dot_dimension_numbers<[1], [0], [0], [1], [0, 0, 1, 1], [], []>} : vector<9x64xf32>, vector<64x32xf32>, vector<9x32xf32> -> vector<9x32xf32>
    %192 = vector.broadcast %1 : vector<1x32xf32> to vector<9x32xf32>
    %193 = arith.addf %191, %192 : vector<9x32xf32>
    %cst_191 = arith.constant 0.000000e+00 : f32
    %194 = vector.broadcast %cst_191 : f32 to vector<9x32xf32>
    %195 = arith.maximumf %193, %194 : vector<9x32xf32>
    %c108 = arith.constant 108 : index
    %c0_192 = arith.constant 0 : index
    %196 = vector.load %arg12[%c108, %c0_192] : memref<162x32xf32, #tpu.memory_space<vmem>>, vector<9x32xf32>
    tpu.vector_store %arg12[%c108, %c0_192], %195 {strides = array<i32>} : memref<162x32xf32, #tpu.memory_space<vmem>>, vector<9x32xf32>,
    %c280_193 = arith.constant 280 : index
    %c0_194 = arith.constant 0 : index
    %197 = vector.load %arg0[%c280_193, %c0_194] : memref<400x8xf32, #tpu.memory_space<vmem>>, vector<9x8xf32>
    %c281_195 = arith.constant 281 : index
    %c0_196 = arith.constant 0 : index
    %198 = vector.load %arg0[%c281_195, %c0_196] : memref<400x8xf32, #tpu.memory_space<vmem>>, vector<9x8xf32>
    %c290_197 = arith.constant 290 : index
    %c0_198 = arith.constant 0 : index
    %199 = vector.load %arg0[%c290_197, %c0_198] : memref<400x8xf32, #tpu.memory_space<vmem>>, vector<9x8xf32>
    %c291_199 = arith.constant 291 : index
    %c0_200 = arith.constant 0 : index
    %200 = vector.load %arg0[%c291_199, %c0_200] : memref<400x8xf32, #tpu.memory_space<vmem>>, vector<9x8xf32>
    %c300 = arith.constant 300 : index
    %c0_201 = arith.constant 0 : index
    %201 = vector.load %arg0[%c300, %c0_201] : memref<400x8xf32, #tpu.memory_space<vmem>>, vector<9x8xf32>
    %c301 = arith.constant 301 : index
    %c0_202 = arith.constant 0 : index
    %202 = vector.load %arg0[%c301, %c0_202] : memref<400x8xf32, #tpu.memory_space<vmem>>, vector<9x8xf32>
    %c310 = arith.constant 310 : index
    %c0_203 = arith.constant 0 : index
    %203 = vector.load %arg0[%c310, %c0_203] : memref<400x8xf32, #tpu.memory_space<vmem>>, vector<9x8xf32>
    %c311 = arith.constant 311 : index
    %c0_204 = arith.constant 0 : index
    %204 = vector.load %arg0[%c311, %c0_204] : memref<400x8xf32, #tpu.memory_space<vmem>>, vector<9x8xf32>
    %205 = tpu.concatenate %197, %198, %199, %200, %201, %202, %203, %204 in 1 : vector<9x8xf32>, vector<9x8xf32>, vector<9x8xf32>, vector<9x8xf32>, vector<9x8xf32>, vector<9x8xf32>, vector<9x8xf32>, vector<9x8xf32> -> vector<9x64xf32>
    %cst_205 = arith.constant dense<0.000000e+00> : vector<9x32xf32>
    %206 = tpu.matmul %205, %0, %cst_205 {dimension_numbers = #tpu.dot_dimension_numbers<[1], [0], [0], [1], [0, 0, 1, 1], [], []>} : vector<9x64xf32>, vector<64x32xf32>, vector<9x32xf32> -> vector<9x32xf32>
    %207 = vector.broadcast %1 : vector<1x32xf32> to vector<9x32xf32>
    %208 = arith.addf %206, %207 : vector<9x32xf32>
    %cst_206 = arith.constant 0.000000e+00 : f32
    %209 = vector.broadcast %cst_206 : f32 to vector<9x32xf32>
    %210 = arith.maximumf %208, %209 : vector<9x32xf32>
    %c117 = arith.constant 117 : index
    %c0_207 = arith.constant 0 : index
    %211 = vector.load %arg12[%c117, %c0_207] : memref<162x32xf32, #tpu.memory_space<vmem>>, vector<9x32xf32>
    tpu.vector_store %arg12[%c117, %c0_207], %210 {strides = array<i32>} : memref<162x32xf32, #tpu.memory_space<vmem>>, vector<9x32xf32>,
    %c300_208 = arith.constant 300 : index
    %c0_209 = arith.constant 0 : index
    %212 = vector.load %arg0[%c300_208, %c0_209] : memref<400x8xf32, #tpu.memory_space<vmem>>, vector<9x8xf32>
    %c301_210 = arith.constant 301 : index
    %c0_211 = arith.constant 0 : index
    %213 = vector.load %arg0[%c301_210, %c0_211] : memref<400x8xf32, #tpu.memory_space<vmem>>, vector<9x8xf32>
    %c310_212 = arith.constant 310 : index
    %c0_213 = arith.constant 0 : index
    %214 = vector.load %arg0[%c310_212, %c0_213] : memref<400x8xf32, #tpu.memory_space<vmem>>, vector<9x8xf32>
    %c311_214 = arith.constant 311 : index
    %c0_215 = arith.constant 0 : index
    %215 = vector.load %arg0[%c311_214, %c0_215] : memref<400x8xf32, #tpu.memory_space<vmem>>, vector<9x8xf32>
    %c320 = arith.constant 320 : index
    %c0_216 = arith.constant 0 : index
    %216 = vector.load %arg0[%c320, %c0_216] : memref<400x8xf32, #tpu.memory_space<vmem>>, vector<9x8xf32>
    %c321 = arith.constant 321 : index
    %c0_217 = arith.constant 0 : index
    %217 = vector.load %arg0[%c321, %c0_217] : memref<400x8xf32, #tpu.memory_space<vmem>>, vector<9x8xf32>
    %c330 = arith.constant 330 : index
    %c0_218 = arith.constant 0 : index
    %218 = vector.load %arg0[%c330, %c0_218] : memref<400x8xf32, #tpu.memory_space<vmem>>, vector<9x8xf32>
    %c331 = arith.constant 331 : index
    %c0_219 = arith.constant 0 : index
    %219 = vector.load %arg0[%c331, %c0_219] : memref<400x8xf32, #tpu.memory_space<vmem>>, vector<9x8xf32>
    %220 = tpu.concatenate %212, %213, %214, %215, %216, %217, %218, %219 in 1 : vector<9x8xf32>, vector<9x8xf32>, vector<9x8xf32>, vector<9x8xf32>, vector<9x8xf32>, vector<9x8xf32>, vector<9x8xf32>, vector<9x8xf32> -> vector<9x64xf32>
    %cst_220 = arith.constant dense<0.000000e+00> : vector<9x32xf32>
    %221 = tpu.matmul %220, %0, %cst_220 {dimension_numbers = #tpu.dot_dimension_numbers<[1], [0], [0], [1], [0, 0, 1, 1], [], []>} : vector<9x64xf32>, vector<64x32xf32>, vector<9x32xf32> -> vector<9x32xf32>
    %222 = vector.broadcast %1 : vector<1x32xf32> to vector<9x32xf32>
    %223 = arith.addf %221, %222 : vector<9x32xf32>
    %cst_221 = arith.constant 0.000000e+00 : f32
    %224 = vector.broadcast %cst_221 : f32 to vector<9x32xf32>
    %225 = arith.maximumf %223, %224 : vector<9x32xf32>
    %c126 = arith.constant 126 : index
    %c0_222 = arith.constant 0 : index
    %226 = vector.load %arg12[%c126, %c0_222] : memref<162x32xf32, #tpu.memory_space<vmem>>, vector<9x32xf32>
    tpu.vector_store %arg12[%c126, %c0_222], %225 {strides = array<i32>} : memref<162x32xf32, #tpu.memory_space<vmem>>, vector<9x32xf32>,
    %c320_223 = arith.constant 320 : index
    %c0_224 = arith.constant 0 : index
    %227 = vector.load %arg0[%c320_223, %c0_224] : memref<400x8xf32, #tpu.memory_space<vmem>>, vector<9x8xf32>
    %c321_225 = arith.constant 321 : index
    %c0_226 = arith.constant 0 : index
    %228 = vector.load %arg0[%c321_225, %c0_226] : memref<400x8xf32, #tpu.memory_space<vmem>>, vector<9x8xf32>
    %c330_227 = arith.constant 330 : index
    %c0_228 = arith.constant 0 : index
    %229 = vector.load %arg0[%c330_227, %c0_228] : memref<400x8xf32, #tpu.memory_space<vmem>>, vector<9x8xf32>
    %c331_229 = arith.constant 331 : index
    %c0_230 = arith.constant 0 : index
    %230 = vector.load %arg0[%c331_229, %c0_230] : memref<400x8xf32, #tpu.memory_space<vmem>>, vector<9x8xf32>
    %c340 = arith.constant 340 : index
    %c0_231 = arith.constant 0 : index
    %231 = vector.load %arg0[%c340, %c0_231] : memref<400x8xf32, #tpu.memory_space<vmem>>, vector<9x8xf32>
    %c341 = arith.constant 341 : index
    %c0_232 = arith.constant 0 : index
    %232 = vector.load %arg0[%c341, %c0_232] : memref<400x8xf32, #tpu.memory_space<vmem>>, vector<9x8xf32>
    %c350 = arith.constant 350 : index
    %c0_233 = arith.constant 0 : index
    %233 = vector.load %arg0[%c350, %c0_233] : memref<400x8xf32, #tpu.memory_space<vmem>>, vector<9x8xf32>
    %c351 = arith.constant 351 : index
    %c0_234 = arith.constant 0 : index
    %234 = vector.load %arg0[%c351, %c0_234] : memref<400x8xf32, #tpu.memory_space<vmem>>, vector<9x8xf32>
    %235 = tpu.concatenate %227, %228, %229, %230, %231, %232, %233, %234 in 1 : vector<9x8xf32>, vector<9x8xf32>, vector<9x8xf32>, vector<9x8xf32>, vector<9x8xf32>, vector<9x8xf32>, vector<9x8xf32>, vector<9x8xf32> -> vector<9x64xf32>
    %cst_235 = arith.constant dense<0.000000e+00> : vector<9x32xf32>
    %236 = tpu.matmul %235, %0, %cst_235 {dimension_numbers = #tpu.dot_dimension_numbers<[1], [0], [0], [1], [0, 0, 1, 1], [], []>} : vector<9x64xf32>, vector<64x32xf32>, vector<9x32xf32> -> vector<9x32xf32>
    %237 = vector.broadcast %1 : vector<1x32xf32> to vector<9x32xf32>
    %238 = arith.addf %236, %237 : vector<9x32xf32>
    %cst_236 = arith.constant 0.000000e+00 : f32
    %239 = vector.broadcast %cst_236 : f32 to vector<9x32xf32>
    %240 = arith.maximumf %238, %239 : vector<9x32xf32>
    %c135 = arith.constant 135 : index
    %c0_237 = arith.constant 0 : index
    %241 = vector.load %arg12[%c135, %c0_237] : memref<162x32xf32, #tpu.memory_space<vmem>>, vector<9x32xf32>
    tpu.vector_store %arg12[%c135, %c0_237], %240 {strides = array<i32>} : memref<162x32xf32, #tpu.memory_space<vmem>>, vector<9x32xf32>,
    %c340_238 = arith.constant 340 : index
    %c0_239 = arith.constant 0 : index
    %242 = vector.load %arg0[%c340_238, %c0_239] : memref<400x8xf32, #tpu.memory_space<vmem>>, vector<9x8xf32>
    %c341_240 = arith.constant 341 : index
    %c0_241 = arith.constant 0 : index
    %243 = vector.load %arg0[%c341_240, %c0_241] : memref<400x8xf32, #tpu.memory_space<vmem>>, vector<9x8xf32>
    %c350_242 = arith.constant 350 : index
    %c0_243 = arith.constant 0 : index
    %244 = vector.load %arg0[%c350_242, %c0_243] : memref<400x8xf32, #tpu.memory_space<vmem>>, vector<9x8xf32>
    %c351_244 = arith.constant 351 : index
    %c0_245 = arith.constant 0 : index
    %245 = vector.load %arg0[%c351_244, %c0_245] : memref<400x8xf32, #tpu.memory_space<vmem>>, vector<9x8xf32>
    %c360 = arith.constant 360 : index
    %c0_246 = arith.constant 0 : index
    %246 = vector.load %arg0[%c360, %c0_246] : memref<400x8xf32, #tpu.memory_space<vmem>>, vector<9x8xf32>
    %c361 = arith.constant 361 : index
    %c0_247 = arith.constant 0 : index
    %247 = vector.load %arg0[%c361, %c0_247] : memref<400x8xf32, #tpu.memory_space<vmem>>, vector<9x8xf32>
    %c370 = arith.constant 370 : index
    %c0_248 = arith.constant 0 : index
    %248 = vector.load %arg0[%c370, %c0_248] : memref<400x8xf32, #tpu.memory_space<vmem>>, vector<9x8xf32>
    %c371 = arith.constant 371 : index
    %c0_249 = arith.constant 0 : index
    %249 = vector.load %arg0[%c371, %c0_249] : memref<400x8xf32, #tpu.memory_space<vmem>>, vector<9x8xf32>
    %250 = tpu.concatenate %242, %243, %244, %245, %246, %247, %248, %249 in 1 : vector<9x8xf32>, vector<9x8xf32>, vector<9x8xf32>, vector<9x8xf32>, vector<9x8xf32>, vector<9x8xf32>, vector<9x8xf32>, vector<9x8xf32> -> vector<9x64xf32>
    %cst_250 = arith.constant dense<0.000000e+00> : vector<9x32xf32>
    %251 = tpu.matmul %250, %0, %cst_250 {dimension_numbers = #tpu.dot_dimension_numbers<[1], [0], [0], [1], [0, 0, 1, 1], [], []>} : vector<9x64xf32>, vector<64x32xf32>, vector<9x32xf32> -> vector<9x32xf32>
    %252 = vector.broadcast %1 : vector<1x32xf32> to vector<9x32xf32>
    %253 = arith.addf %251, %252 : vector<9x32xf32>
    %cst_251 = arith.constant 0.000000e+00 : f32
    %254 = vector.broadcast %cst_251 : f32 to vector<9x32xf32>
    %255 = arith.maximumf %253, %254 : vector<9x32xf32>
    %c144 = arith.constant 144 : index
    %c0_252 = arith.constant 0 : index
    %256 = vector.load %arg12[%c144, %c0_252] : memref<162x32xf32, #tpu.memory_space<vmem>>, vector<9x32xf32>
    tpu.vector_store %arg12[%c144, %c0_252], %255 {strides = array<i32>} : memref<162x32xf32, #tpu.memory_space<vmem>>, vector<9x32xf32>,
    %c360_253 = arith.constant 360 : index
    %c0_254 = arith.constant 0 : index
    %257 = vector.load %arg0[%c360_253, %c0_254] : memref<400x8xf32, #tpu.memory_space<vmem>>, vector<9x8xf32>
    %c361_255 = arith.constant 361 : index
    %c0_256 = arith.constant 0 : index
    %258 = vector.load %arg0[%c361_255, %c0_256] : memref<400x8xf32, #tpu.memory_space<vmem>>, vector<9x8xf32>
    %c370_257 = arith.constant 370 : index
    %c0_258 = arith.constant 0 : index
    %259 = vector.load %arg0[%c370_257, %c0_258] : memref<400x8xf32, #tpu.memory_space<vmem>>, vector<9x8xf32>
    %c371_259 = arith.constant 371 : index
    %c0_260 = arith.constant 0 : index
    %260 = vector.load %arg0[%c371_259, %c0_260] : memref<400x8xf32, #tpu.memory_space<vmem>>, vector<9x8xf32>
    %c380 = arith.constant 380 : index
    %c0_261 = arith.constant 0 : index
    %261 = vector.load %arg0[%c380, %c0_261] : memref<400x8xf32, #tpu.memory_space<vmem>>, vector<9x8xf32>
    %c381 = arith.constant 381 : index
    %c0_262 = arith.constant 0 : index
    %262 = vector.load %arg0[%c381, %c0_262] : memref<400x8xf32, #tpu.memory_space<vmem>>, vector<9x8xf32>
    %c390 = arith.constant 390 : index
    %c0_263 = arith.constant 0 : index
    %263 = vector.load %arg0[%c390, %c0_263] : memref<400x8xf32, #tpu.memory_space<vmem>>, vector<9x8xf32>
    %c391 = arith.constant 391 : index
    %c0_264 = arith.constant 0 : index
    %264 = vector.load %arg0[%c391, %c0_264] : memref<400x8xf32, #tpu.memory_space<vmem>>, vector<9x8xf32>
    %265 = tpu.concatenate %257, %258, %259, %260, %261, %262, %263, %264 in 1 : vector<9x8xf32>, vector<9x8xf32>, vector<9x8xf32>, vector<9x8xf32>, vector<9x8xf32>, vector<9x8xf32>, vector<9x8xf32>, vector<9x8xf32> -> vector<9x64xf32>
    %cst_265 = arith.constant dense<0.000000e+00> : vector<9x32xf32>
    %266 = tpu.matmul %265, %0, %cst_265 {dimension_numbers = #tpu.dot_dimension_numbers<[1], [0], [0], [1], [0, 0, 1, 1], [], []>} : vector<9x64xf32>, vector<64x32xf32>, vector<9x32xf32> -> vector<9x32xf32>
    %267 = vector.broadcast %1 : vector<1x32xf32> to vector<9x32xf32>
    %268 = arith.addf %266, %267 : vector<9x32xf32>
    %cst_266 = arith.constant 0.000000e+00 : f32
    %269 = vector.broadcast %cst_266 : f32 to vector<9x32xf32>
    %270 = arith.maximumf %268, %269 : vector<9x32xf32>
    %c153 = arith.constant 153 : index
    %c0_267 = arith.constant 0 : index
    %271 = vector.load %arg12[%c153, %c0_267] : memref<162x32xf32, #tpu.memory_space<vmem>>, vector<9x32xf32>
    tpu.vector_store %arg12[%c153, %c0_267], %270 {strides = array<i32>} : memref<162x32xf32, #tpu.memory_space<vmem>>, vector<9x32xf32>,
    %c0_268 = arith.constant 0 : index
    %c0_269 = arith.constant 0 : index
    %272 = vector.load %arg3[%c0_268, %c0_269] : memref<512x64xf32, #tpu.memory_space<vmem>>, vector<512x64xf32>
    %c0_270 = arith.constant 0 : index
    %c0_271 = arith.constant 0 : index
    %273 = vector.load %arg4[%c0_270, %c0_271] : memref<1x64xf32, #tpu.memory_space<vmem>>, vector<1x64xf32>
    %c0_272 = arith.constant 0 : index
    %c0_273 = arith.constant 0 : index
    %274 = tpu.strided_load %arg12[%c0_272, %c0_273] {strides = array<i32: 2, 1>} : memref<162x32xf32, #tpu.memory_space<vmem>>, vector<3x32xf32>
    %c1_274 = arith.constant 1 : index
    %c0_275 = arith.constant 0 : index
    %275 = tpu.strided_load %arg12[%c1_274, %c0_275] {strides = array<i32: 2, 1>} : memref<162x32xf32, #tpu.memory_space<vmem>>, vector<3x32xf32>
    %c2 = arith.constant 2 : index
    %c0_276 = arith.constant 0 : index
    %276 = tpu.strided_load %arg12[%c2, %c0_276] {strides = array<i32: 2, 1>} : memref<162x32xf32, #tpu.memory_space<vmem>>, vector<3x32xf32>
    %c3 = arith.constant 3 : index
    %c0_277 = arith.constant 0 : index
    %277 = tpu.strided_load %arg12[%c3, %c0_277] {strides = array<i32: 2, 1>} : memref<162x32xf32, #tpu.memory_space<vmem>>, vector<3x32xf32>
    %c9_278 = arith.constant 9 : index
    %c0_279 = arith.constant 0 : index
    %278 = tpu.strided_load %arg12[%c9_278, %c0_279] {strides = array<i32: 2, 1>} : memref<162x32xf32, #tpu.memory_space<vmem>>, vector<3x32xf32>
    %c10_280 = arith.constant 10 : index
    %c0_281 = arith.constant 0 : index
    %279 = tpu.strided_load %arg12[%c10_280, %c0_281] {strides = array<i32: 2, 1>} : memref<162x32xf32, #tpu.memory_space<vmem>>, vector<3x32xf32>
    %c11_282 = arith.constant 11 : index
    %c0_283 = arith.constant 0 : index
    %280 = tpu.strided_load %arg12[%c11_282, %c0_283] {strides = array<i32: 2, 1>} : memref<162x32xf32, #tpu.memory_space<vmem>>, vector<3x32xf32>
    %c12 = arith.constant 12 : index
    %c0_284 = arith.constant 0 : index
    %281 = tpu.strided_load %arg12[%c12, %c0_284] {strides = array<i32: 2, 1>} : memref<162x32xf32, #tpu.memory_space<vmem>>, vector<3x32xf32>
    %c18_285 = arith.constant 18 : index
    %c0_286 = arith.constant 0 : index
    %282 = tpu.strided_load %arg12[%c18_285, %c0_286] {strides = array<i32: 2, 1>} : memref<162x32xf32, #tpu.memory_space<vmem>>, vector<3x32xf32>
    %c19 = arith.constant 19 : index
    %c0_287 = arith.constant 0 : index
    %283 = tpu.strided_load %arg12[%c19, %c0_287] {strides = array<i32: 2, 1>} : memref<162x32xf32, #tpu.memory_space<vmem>>, vector<3x32xf32>
    %c20_288 = arith.constant 20 : index
    %c0_289 = arith.constant 0 : index
    %284 = tpu.strided_load %arg12[%c20_288, %c0_289] {strides = array<i32: 2, 1>} : memref<162x32xf32, #tpu.memory_space<vmem>>, vector<3x32xf32>
    %c21_290 = arith.constant 21 : index
    %c0_291 = arith.constant 0 : index
    %285 = tpu.strided_load %arg12[%c21_290, %c0_291] {strides = array<i32: 2, 1>} : memref<162x32xf32, #tpu.memory_space<vmem>>, vector<3x32xf32>
    %c27_292 = arith.constant 27 : index
    %c0_293 = arith.constant 0 : index
    %286 = tpu.strided_load %arg12[%c27_292, %c0_293] {strides = array<i32: 2, 1>} : memref<162x32xf32, #tpu.memory_space<vmem>>, vector<3x32xf32>
    %c28 = arith.constant 28 : index
    %c0_294 = arith.constant 0 : index
    %287 = tpu.strided_load %arg12[%c28, %c0_294] {strides = array<i32: 2, 1>} : memref<162x32xf32, #tpu.memory_space<vmem>>, vector<3x32xf32>
    %c29 = arith.constant 29 : index
    %c0_295 = arith.constant 0 : index
    %288 = tpu.strided_load %arg12[%c29, %c0_295] {strides = array<i32: 2, 1>} : memref<162x32xf32, #tpu.memory_space<vmem>>, vector<3x32xf32>
    %c30_296 = arith.constant 30 : index
    %c0_297 = arith.constant 0 : index
    %289 = tpu.strided_load %arg12[%c30_296, %c0_297] {strides = array<i32: 2, 1>} : memref<162x32xf32, #tpu.memory_space<vmem>>, vector<3x32xf32>
    %290 = tpu.concatenate %274, %275, %276, %277, %278, %279, %280, %281, %282, %283, %284, %285, %286, %287, %288, %289 in 1 : vector<3x32xf32>, vector<3x32xf32>, vector<3x32xf32>, vector<3x32xf32>, vector<3x32xf32>, vector<3x32xf32>, vector<3x32xf32>, vector<3x32xf32>, vector<3x32xf32>, vector<3x32xf32>, vector<3x32xf32>, vector<3x32xf32>, vector<3x32xf32>, vector<3x32xf32>, vector<3x32xf32>, vector<3x32xf32> -> vector<3x512xf32>
    %cst_298 = arith.constant dense<0.000000e+00> : vector<3x64xf32>
    %291 = tpu.matmul %290, %272, %cst_298 {dimension_numbers = #tpu.dot_dimension_numbers<[1], [0], [0], [1], [0, 0, 1, 1], [], []>} : vector<3x512xf32>, vector<512x64xf32>, vector<3x64xf32> -> vector<3x64xf32>
    %292 = vector.broadcast %273 : vector<1x64xf32> to vector<3x64xf32>
    %293 = arith.addf %291, %292 : vector<3x64xf32>
    %cst_299 = arith.constant 0.000000e+00 : f32
    %294 = vector.broadcast %cst_299 : f32 to vector<3x64xf32>
    %295 = arith.maximumf %293, %294 : vector<3x64xf32>
    %c0_300 = arith.constant 0 : index
    %c0_301 = arith.constant 0 : index
    %296 = vector.load %arg13[%c0_300, %c0_301] : memref<18x64xf32, #tpu.memory_space<vmem>>, vector<3x64xf32>
    tpu.vector_store %arg13[%c0_300, %c0_301], %295 {strides = array<i32>} : memref<18x64xf32, #tpu.memory_space<vmem>>, vector<3x64xf32>,
    %c18_302 = arith.constant 18 : index
    %c0_303 = arith.constant 0 : index
    %297 = tpu.strided_load %arg12[%c18_302, %c0_303] {strides = array<i32: 2, 1>} : memref<162x32xf32, #tpu.memory_space<vmem>>, vector<3x32xf32>
    %c19_304 = arith.constant 19 : index
    %c0_305 = arith.constant 0 : index
    %298 = tpu.strided_load %arg12[%c19_304, %c0_305] {strides = array<i32: 2, 1>} : memref<162x32xf32, #tpu.memory_space<vmem>>, vector<3x32xf32>
    %c20_306 = arith.constant 20 : index
    %c0_307 = arith.constant 0 : index
    %299 = tpu.strided_load %arg12[%c20_306, %c0_307] {strides = array<i32: 2, 1>} : memref<162x32xf32, #tpu.memory_space<vmem>>, vector<3x32xf32>
    %c21_308 = arith.constant 21 : index
    %c0_309 = arith.constant 0 : index
    %300 = tpu.strided_load %arg12[%c21_308, %c0_309] {strides = array<i32: 2, 1>} : memref<162x32xf32, #tpu.memory_space<vmem>>, vector<3x32xf32>
    %c27_310 = arith.constant 27 : index
    %c0_311 = arith.constant 0 : index
    %301 = tpu.strided_load %arg12[%c27_310, %c0_311] {strides = array<i32: 2, 1>} : memref<162x32xf32, #tpu.memory_space<vmem>>, vector<3x32xf32>
    %c28_312 = arith.constant 28 : index
    %c0_313 = arith.constant 0 : index
    %302 = tpu.strided_load %arg12[%c28_312, %c0_313] {strides = array<i32: 2, 1>} : memref<162x32xf32, #tpu.memory_space<vmem>>, vector<3x32xf32>
    %c29_314 = arith.constant 29 : index
    %c0_315 = arith.constant 0 : index
    %303 = tpu.strided_load %arg12[%c29_314, %c0_315] {strides = array<i32: 2, 1>} : memref<162x32xf32, #tpu.memory_space<vmem>>, vector<3x32xf32>
    %c30_316 = arith.constant 30 : index
    %c0_317 = arith.constant 0 : index
    %304 = tpu.strided_load %arg12[%c30_316, %c0_317] {strides = array<i32: 2, 1>} : memref<162x32xf32, #tpu.memory_space<vmem>>, vector<3x32xf32>
    %c36_318 = arith.constant 36 : index
    %c0_319 = arith.constant 0 : index
    %305 = tpu.strided_load %arg12[%c36_318, %c0_319] {strides = array<i32: 2, 1>} : memref<162x32xf32, #tpu.memory_space<vmem>>, vector<3x32xf32>
    %c37 = arith.constant 37 : index
    %c0_320 = arith.constant 0 : index
    %306 = tpu.strided_load %arg12[%c37, %c0_320] {strides = array<i32: 2, 1>} : memref<162x32xf32, #tpu.memory_space<vmem>>, vector<3x32xf32>
    %c38 = arith.constant 38 : index
    %c0_321 = arith.constant 0 : index
    %307 = tpu.strided_load %arg12[%c38, %c0_321] {strides = array<i32: 2, 1>} : memref<162x32xf32, #tpu.memory_space<vmem>>, vector<3x32xf32>
    %c39 = arith.constant 39 : index
    %c0_322 = arith.constant 0 : index
    %308 = tpu.strided_load %arg12[%c39, %c0_322] {strides = array<i32: 2, 1>} : memref<162x32xf32, #tpu.memory_space<vmem>>, vector<3x32xf32>
    %c45_323 = arith.constant 45 : index
    %c0_324 = arith.constant 0 : index
    %309 = tpu.strided_load %arg12[%c45_323, %c0_324] {strides = array<i32: 2, 1>} : memref<162x32xf32, #tpu.memory_space<vmem>>, vector<3x32xf32>
    %c46 = arith.constant 46 : index
    %c0_325 = arith.constant 0 : index
    %310 = tpu.strided_load %arg12[%c46, %c0_325] {strides = array<i32: 2, 1>} : memref<162x32xf32, #tpu.memory_space<vmem>>, vector<3x32xf32>
    %c47 = arith.constant 47 : index
    %c0_326 = arith.constant 0 : index
    %311 = tpu.strided_load %arg12[%c47, %c0_326] {strides = array<i32: 2, 1>} : memref<162x32xf32, #tpu.memory_space<vmem>>, vector<3x32xf32>
    %c48 = arith.constant 48 : index
    %c0_327 = arith.constant 0 : index
    %312 = tpu.strided_load %arg12[%c48, %c0_327] {strides = array<i32: 2, 1>} : memref<162x32xf32, #tpu.memory_space<vmem>>, vector<3x32xf32>
    %313 = tpu.concatenate %297, %298, %299, %300, %301, %302, %303, %304, %305, %306, %307, %308, %309, %310, %311, %312 in 1 : vector<3x32xf32>, vector<3x32xf32>, vector<3x32xf32>, vector<3x32xf32>, vector<3x32xf32>, vector<3x32xf32>, vector<3x32xf32>, vector<3x32xf32>, vector<3x32xf32>, vector<3x32xf32>, vector<3x32xf32>, vector<3x32xf32>, vector<3x32xf32>, vector<3x32xf32>, vector<3x32xf32>, vector<3x32xf32> -> vector<3x512xf32>
    %cst_328 = arith.constant dense<0.000000e+00> : vector<3x64xf32>
    %314 = tpu.matmul %313, %272, %cst_328 {dimension_numbers = #tpu.dot_dimension_numbers<[1], [0], [0], [1], [0, 0, 1, 1], [], []>} : vector<3x512xf32>, vector<512x64xf32>, vector<3x64xf32> -> vector<3x64xf32>
    %315 = vector.broadcast %273 : vector<1x64xf32> to vector<3x64xf32>
    %316 = arith.addf %314, %315 : vector<3x64xf32>
    %cst_329 = arith.constant 0.000000e+00 : f32
    %317 = vector.broadcast %cst_329 : f32 to vector<3x64xf32>
    %318 = arith.maximumf %316, %317 : vector<3x64xf32>
    %c3_330 = arith.constant 3 : index
    %c0_331 = arith.constant 0 : index
    %319 = vector.load %arg13[%c3_330, %c0_331] : memref<18x64xf32, #tpu.memory_space<vmem>>, vector<3x64xf32>
    tpu.vector_store %arg13[%c3_330, %c0_331], %318 {strides = array<i32>} : memref<18x64xf32, #tpu.memory_space<vmem>>, vector<3x64xf32>,
    %c36_332 = arith.constant 36 : index
    %c0_333 = arith.constant 0 : index
    %320 = tpu.strided_load %arg12[%c36_332, %c0_333] {strides = array<i32: 2, 1>} : memref<162x32xf32, #tpu.memory_space<vmem>>, vector<3x32xf32>
    %c37_334 = arith.constant 37 : index
    %c0_335 = arith.constant 0 : index
    %321 = tpu.strided_load %arg12[%c37_334, %c0_335] {strides = array<i32: 2, 1>} : memref<162x32xf32, #tpu.memory_space<vmem>>, vector<3x32xf32>
    %c38_336 = arith.constant 38 : index
    %c0_337 = arith.constant 0 : index
    %322 = tpu.strided_load %arg12[%c38_336, %c0_337] {strides = array<i32: 2, 1>} : memref<162x32xf32, #tpu.memory_space<vmem>>, vector<3x32xf32>
    %c39_338 = arith.constant 39 : index
    %c0_339 = arith.constant 0 : index
    %323 = tpu.strided_load %arg12[%c39_338, %c0_339] {strides = array<i32: 2, 1>} : memref<162x32xf32, #tpu.memory_space<vmem>>, vector<3x32xf32>
    %c45_340 = arith.constant 45 : index
    %c0_341 = arith.constant 0 : index
    %324 = tpu.strided_load %arg12[%c45_340, %c0_341] {strides = array<i32: 2, 1>} : memref<162x32xf32, #tpu.memory_space<vmem>>, vector<3x32xf32>
    %c46_342 = arith.constant 46 : index
    %c0_343 = arith.constant 0 : index
    %325 = tpu.strided_load %arg12[%c46_342, %c0_343] {strides = array<i32: 2, 1>} : memref<162x32xf32, #tpu.memory_space<vmem>>, vector<3x32xf32>
    %c47_344 = arith.constant 47 : index
    %c0_345 = arith.constant 0 : index
    %326 = tpu.strided_load %arg12[%c47_344, %c0_345] {strides = array<i32: 2, 1>} : memref<162x32xf32, #tpu.memory_space<vmem>>, vector<3x32xf32>
    %c48_346 = arith.constant 48 : index
    %c0_347 = arith.constant 0 : index
    %327 = tpu.strided_load %arg12[%c48_346, %c0_347] {strides = array<i32: 2, 1>} : memref<162x32xf32, #tpu.memory_space<vmem>>, vector<3x32xf32>
    %c54_348 = arith.constant 54 : index
    %c0_349 = arith.constant 0 : index
    %328 = tpu.strided_load %arg12[%c54_348, %c0_349] {strides = array<i32: 2, 1>} : memref<162x32xf32, #tpu.memory_space<vmem>>, vector<3x32xf32>
    %c55 = arith.constant 55 : index
    %c0_350 = arith.constant 0 : index
    %329 = tpu.strided_load %arg12[%c55, %c0_350] {strides = array<i32: 2, 1>} : memref<162x32xf32, #tpu.memory_space<vmem>>, vector<3x32xf32>
    %c56 = arith.constant 56 : index
    %c0_351 = arith.constant 0 : index
    %330 = tpu.strided_load %arg12[%c56, %c0_351] {strides = array<i32: 2, 1>} : memref<162x32xf32, #tpu.memory_space<vmem>>, vector<3x32xf32>
    %c57 = arith.constant 57 : index
    %c0_352 = arith.constant 0 : index
    %331 = tpu.strided_load %arg12[%c57, %c0_352] {strides = array<i32: 2, 1>} : memref<162x32xf32, #tpu.memory_space<vmem>>, vector<3x32xf32>
    %c63_353 = arith.constant 63 : index
    %c0_354 = arith.constant 0 : index
    %332 = tpu.strided_load %arg12[%c63_353, %c0_354] {strides = array<i32: 2, 1>} : memref<162x32xf32, #tpu.memory_space<vmem>>, vector<3x32xf32>
    %c64 = arith.constant 64 : index
    %c0_355 = arith.constant 0 : index
    %333 = tpu.strided_load %arg12[%c64, %c0_355] {strides = array<i32: 2, 1>} : memref<162x32xf32, #tpu.memory_space<vmem>>, vector<3x32xf32>
    %c65 = arith.constant 65 : index
    %c0_356 = arith.constant 0 : index
    %334 = tpu.strided_load %arg12[%c65, %c0_356] {strides = array<i32: 2, 1>} : memref<162x32xf32, #tpu.memory_space<vmem>>, vector<3x32xf32>
    %c66 = arith.constant 66 : index
    %c0_357 = arith.constant 0 : index
    %335 = tpu.strided_load %arg12[%c66, %c0_357] {strides = array<i32: 2, 1>} : memref<162x32xf32, #tpu.memory_space<vmem>>, vector<3x32xf32>
    %336 = tpu.concatenate %320, %321, %322, %323, %324, %325, %326, %327, %328, %329, %330, %331, %332, %333, %334, %335 in 1 : vector<3x32xf32>, vector<3x32xf32>, vector<3x32xf32>, vector<3x32xf32>, vector<3x32xf32>, vector<3x32xf32>, vector<3x32xf32>, vector<3x32xf32>, vector<3x32xf32>, vector<3x32xf32>, vector<3x32xf32>, vector<3x32xf32>, vector<3x32xf32>, vector<3x32xf32>, vector<3x32xf32>, vector<3x32xf32> -> vector<3x512xf32>
    %cst_358 = arith.constant dense<0.000000e+00> : vector<3x64xf32>
    %337 = tpu.matmul %336, %272, %cst_358 {dimension_numbers = #tpu.dot_dimension_numbers<[1], [0], [0], [1], [0, 0, 1, 1], [], []>} : vector<3x512xf32>, vector<512x64xf32>, vector<3x64xf32> -> vector<3x64xf32>
    %338 = vector.broadcast %273 : vector<1x64xf32> to vector<3x64xf32>
    %339 = arith.addf %337, %338 : vector<3x64xf32>
    %cst_359 = arith.constant 0.000000e+00 : f32
    %340 = vector.broadcast %cst_359 : f32 to vector<3x64xf32>
    %341 = arith.maximumf %339, %340 : vector<3x64xf32>
    %c6 = arith.constant 6 : index
    %c0_360 = arith.constant 0 : index
    %342 = vector.load %arg13[%c6, %c0_360] : memref<18x64xf32, #tpu.memory_space<vmem>>, vector<3x64xf32>
    tpu.vector_store %arg13[%c6, %c0_360], %341 {strides = array<i32>} : memref<18x64xf32, #tpu.memory_space<vmem>>, vector<3x64xf32>,
    %c81_361 = arith.constant 81 : index
    %c0_362 = arith.constant 0 : index
    %343 = tpu.strided_load %arg12[%c81_361, %c0_362] {strides = array<i32: 2, 1>} : memref<162x32xf32, #tpu.memory_space<vmem>>, vector<3x32xf32>
    %c82 = arith.constant 82 : index
    %c0_363 = arith.constant 0 : index
    %344 = tpu.strided_load %arg12[%c82, %c0_363] {strides = array<i32: 2, 1>} : memref<162x32xf32, #tpu.memory_space<vmem>>, vector<3x32xf32>
    %c83 = arith.constant 83 : index
    %c0_364 = arith.constant 0 : index
    %345 = tpu.strided_load %arg12[%c83, %c0_364] {strides = array<i32: 2, 1>} : memref<162x32xf32, #tpu.memory_space<vmem>>, vector<3x32xf32>
    %c84 = arith.constant 84 : index
    %c0_365 = arith.constant 0 : index
    %346 = tpu.strided_load %arg12[%c84, %c0_365] {strides = array<i32: 2, 1>} : memref<162x32xf32, #tpu.memory_space<vmem>>, vector<3x32xf32>
    %c90_366 = arith.constant 90 : index
    %c0_367 = arith.constant 0 : index
    %347 = tpu.strided_load %arg12[%c90_366, %c0_367] {strides = array<i32: 2, 1>} : memref<162x32xf32, #tpu.memory_space<vmem>>, vector<3x32xf32>
    %c91_368 = arith.constant 91 : index
    %c0_369 = arith.constant 0 : index
    %348 = tpu.strided_load %arg12[%c91_368, %c0_369] {strides = array<i32: 2, 1>} : memref<162x32xf32, #tpu.memory_space<vmem>>, vector<3x32xf32>
    %c92 = arith.constant 92 : index
    %c0_370 = arith.constant 0 : index
    %349 = tpu.strided_load %arg12[%c92, %c0_370] {strides = array<i32: 2, 1>} : memref<162x32xf32, #tpu.memory_space<vmem>>, vector<3x32xf32>
    %c93 = arith.constant 93 : index
    %c0_371 = arith.constant 0 : index
    %350 = tpu.strided_load %arg12[%c93, %c0_371] {strides = array<i32: 2, 1>} : memref<162x32xf32, #tpu.memory_space<vmem>>, vector<3x32xf32>
    %c99_372 = arith.constant 99 : index
    %c0_373 = arith.constant 0 : index
    %351 = tpu.strided_load %arg12[%c99_372, %c0_373] {strides = array<i32: 2, 1>} : memref<162x32xf32, #tpu.memory_space<vmem>>, vector<3x32xf32>
    %c100_374 = arith.constant 100 : index
    %c0_375 = arith.constant 0 : index
    %352 = tpu.strided_load %arg12[%c100_374, %c0_375] {strides = array<i32: 2, 1>} : memref<162x32xf32, #tpu.memory_space<vmem>>, vector<3x32xf32>
    %c101_376 = arith.constant 101 : index
    %c0_377 = arith.constant 0 : index
    %353 = tpu.strided_load %arg12[%c101_376, %c0_377] {strides = array<i32: 2, 1>} : memref<162x32xf32, #tpu.memory_space<vmem>>, vector<3x32xf32>
    %c102 = arith.constant 102 : index
    %c0_378 = arith.constant 0 : index
    %354 = tpu.strided_load %arg12[%c102, %c0_378] {strides = array<i32: 2, 1>} : memref<162x32xf32, #tpu.memory_space<vmem>>, vector<3x32xf32>
    %c108_379 = arith.constant 108 : index
    %c0_380 = arith.constant 0 : index
    %355 = tpu.strided_load %arg12[%c108_379, %c0_380] {strides = array<i32: 2, 1>} : memref<162x32xf32, #tpu.memory_space<vmem>>, vector<3x32xf32>
    %c109 = arith.constant 109 : index
    %c0_381 = arith.constant 0 : index
    %356 = tpu.strided_load %arg12[%c109, %c0_381] {strides = array<i32: 2, 1>} : memref<162x32xf32, #tpu.memory_space<vmem>>, vector<3x32xf32>
    %c110_382 = arith.constant 110 : index
    %c0_383 = arith.constant 0 : index
    %357 = tpu.strided_load %arg12[%c110_382, %c0_383] {strides = array<i32: 2, 1>} : memref<162x32xf32, #tpu.memory_space<vmem>>, vector<3x32xf32>
    %c111_384 = arith.constant 111 : index
    %c0_385 = arith.constant 0 : index
    %358 = tpu.strided_load %arg12[%c111_384, %c0_385] {strides = array<i32: 2, 1>} : memref<162x32xf32, #tpu.memory_space<vmem>>, vector<3x32xf32>
    %359 = tpu.concatenate %343, %344, %345, %346, %347, %348, %349, %350, %351, %352, %353, %354, %355, %356, %357, %358 in 1 : vector<3x32xf32>, vector<3x32xf32>, vector<3x32xf32>, vector<3x32xf32>, vector<3x32xf32>, vector<3x32xf32>, vector<3x32xf32>, vector<3x32xf32>, vector<3x32xf32>, vector<3x32xf32>, vector<3x32xf32>, vector<3x32xf32>, vector<3x32xf32>, vector<3x32xf32>, vector<3x32xf32>, vector<3x32xf32> -> vector<3x512xf32>
    %cst_386 = arith.constant dense<0.000000e+00> : vector<3x64xf32>
    %360 = tpu.matmul %359, %272, %cst_386 {dimension_numbers = #tpu.dot_dimension_numbers<[1], [0], [0], [1], [0, 0, 1, 1], [], []>} : vector<3x512xf32>, vector<512x64xf32>, vector<3x64xf32> -> vector<3x64xf32>
    %361 = vector.broadcast %273 : vector<1x64xf32> to vector<3x64xf32>
    %362 = arith.addf %360, %361 : vector<3x64xf32>
    %cst_387 = arith.constant 0.000000e+00 : f32
    %363 = vector.broadcast %cst_387 : f32 to vector<3x64xf32>
    %364 = arith.maximumf %362, %363 : vector<3x64xf32>
    %c9_388 = arith.constant 9 : index
    %c0_389 = arith.constant 0 : index
    %365 = vector.load %arg13[%c9_388, %c0_389] : memref<18x64xf32, #tpu.memory_space<vmem>>, vector<3x64xf32>
    tpu.vector_store %arg13[%c9_388, %c0_389], %364 {strides = array<i32>} : memref<18x64xf32, #tpu.memory_space<vmem>>, vector<3x64xf32>,
    %c99_390 = arith.constant 99 : index
    %c0_391 = arith.constant 0 : index
    %366 = tpu.strided_load %arg12[%c99_390, %c0_391] {strides = array<i32: 2, 1>} : memref<162x32xf32, #tpu.memory_space<vmem>>, vector<3x32xf32>
    %c100_392 = arith.constant 100 : index
    %c0_393 = arith.constant 0 : index
    %367 = tpu.strided_load %arg12[%c100_392, %c0_393] {strides = array<i32: 2, 1>} : memref<162x32xf32, #tpu.memory_space<vmem>>, vector<3x32xf32>
    %c101_394 = arith.constant 101 : index
    %c0_395 = arith.constant 0 : index
    %368 = tpu.strided_load %arg12[%c101_394, %c0_395] {strides = array<i32: 2, 1>} : memref<162x32xf32, #tpu.memory_space<vmem>>, vector<3x32xf32>
    %c102_396 = arith.constant 102 : index
    %c0_397 = arith.constant 0 : index
    %369 = tpu.strided_load %arg12[%c102_396, %c0_397] {strides = array<i32: 2, 1>} : memref<162x32xf32, #tpu.memory_space<vmem>>, vector<3x32xf32>
    %c108_398 = arith.constant 108 : index
    %c0_399 = arith.constant 0 : index
    %370 = tpu.strided_load %arg12[%c108_398, %c0_399] {strides = array<i32: 2, 1>} : memref<162x32xf32, #tpu.memory_space<vmem>>, vector<3x32xf32>
    %c109_400 = arith.constant 109 : index
    %c0_401 = arith.constant 0 : index
    %371 = tpu.strided_load %arg12[%c109_400, %c0_401] {strides = array<i32: 2, 1>} : memref<162x32xf32, #tpu.memory_space<vmem>>, vector<3x32xf32>
    %c110_402 = arith.constant 110 : index
    %c0_403 = arith.constant 0 : index
    %372 = tpu.strided_load %arg12[%c110_402, %c0_403] {strides = array<i32: 2, 1>} : memref<162x32xf32, #tpu.memory_space<vmem>>, vector<3x32xf32>
    %c111_404 = arith.constant 111 : index
    %c0_405 = arith.constant 0 : index
    %373 = tpu.strided_load %arg12[%c111_404, %c0_405] {strides = array<i32: 2, 1>} : memref<162x32xf32, #tpu.memory_space<vmem>>, vector<3x32xf32>
    %c117_406 = arith.constant 117 : index
    %c0_407 = arith.constant 0 : index
    %374 = tpu.strided_load %arg12[%c117_406, %c0_407] {strides = array<i32: 2, 1>} : memref<162x32xf32, #tpu.memory_space<vmem>>, vector<3x32xf32>
    %c118 = arith.constant 118 : index
    %c0_408 = arith.constant 0 : index
    %375 = tpu.strided_load %arg12[%c118, %c0_408] {strides = array<i32: 2, 1>} : memref<162x32xf32, #tpu.memory_space<vmem>>, vector<3x32xf32>
    %c119 = arith.constant 119 : index
    %c0_409 = arith.constant 0 : index
    %376 = tpu.strided_load %arg12[%c119, %c0_409] {strides = array<i32: 2, 1>} : memref<162x32xf32, #tpu.memory_space<vmem>>, vector<3x32xf32>
    %c120_410 = arith.constant 120 : index
    %c0_411 = arith.constant 0 : index
    %377 = tpu.strided_load %arg12[%c120_410, %c0_411] {strides = array<i32: 2, 1>} : memref<162x32xf32, #tpu.memory_space<vmem>>, vector<3x32xf32>
    %c126_412 = arith.constant 126 : index
    %c0_413 = arith.constant 0 : index
    %378 = tpu.strided_load %arg12[%c126_412, %c0_413] {strides = array<i32: 2, 1>} : memref<162x32xf32, #tpu.memory_space<vmem>>, vector<3x32xf32>
    %c127 = arith.constant 127 : index
    %c0_414 = arith.constant 0 : index
    %379 = tpu.strided_load %arg12[%c127, %c0_414] {strides = array<i32: 2, 1>} : memref<162x32xf32, #tpu.memory_space<vmem>>, vector<3x32xf32>
    %c128 = arith.constant 128 : index
    %c0_415 = arith.constant 0 : index
    %380 = tpu.strided_load %arg12[%c128, %c0_415] {strides = array<i32: 2, 1>} : memref<162x32xf32, #tpu.memory_space<vmem>>, vector<3x32xf32>
    %c129 = arith.constant 129 : index
    %c0_416 = arith.constant 0 : index
    %381 = tpu.strided_load %arg12[%c129, %c0_416] {strides = array<i32: 2, 1>} : memref<162x32xf32, #tpu.memory_space<vmem>>, vector<3x32xf32>
    %382 = tpu.concatenate %366, %367, %368, %369, %370, %371, %372, %373, %374, %375, %376, %377, %378, %379, %380, %381 in 1 : vector<3x32xf32>, vector<3x32xf32>, vector<3x32xf32>, vector<3x32xf32>, vector<3x32xf32>, vector<3x32xf32>, vector<3x32xf32>, vector<3x32xf32>, vector<3x32xf32>, vector<3x32xf32>, vector<3x32xf32>, vector<3x32xf32>, vector<3x32xf32>, vector<3x32xf32>, vector<3x32xf32>, vector<3x32xf32> -> vector<3x512xf32>
    %cst_417 = arith.constant dense<0.000000e+00> : vector<3x64xf32>
    %383 = tpu.matmul %382, %272, %cst_417 {dimension_numbers = #tpu.dot_dimension_numbers<[1], [0], [0], [1], [0, 0, 1, 1], [], []>} : vector<3x512xf32>, vector<512x64xf32>, vector<3x64xf32> -> vector<3x64xf32>
    %384 = vector.broadcast %273 : vector<1x64xf32> to vector<3x64xf32>
    %385 = arith.addf %383, %384 : vector<3x64xf32>
    %cst_418 = arith.constant 0.000000e+00 : f32
    %386 = vector.broadcast %cst_418 : f32 to vector<3x64xf32>
    %387 = arith.maximumf %385, %386 : vector<3x64xf32>
    %c12_419 = arith.constant 12 : index
    %c0_420 = arith.constant 0 : index
    %388 = vector.load %arg13[%c12_419, %c0_420] : memref<18x64xf32, #tpu.memory_space<vmem>>, vector<3x64xf32>
    tpu.vector_store %arg13[%c12_419, %c0_420], %387 {strides = array<i32>} : memref<18x64xf32, #tpu.memory_space<vmem>>, vector<3x64xf32>,
    %c117_421 = arith.constant 117 : index
    %c0_422 = arith.constant 0 : index
    %389 = tpu.strided_load %arg12[%c117_421, %c0_422] {strides = array<i32: 2, 1>} : memref<162x32xf32, #tpu.memory_space<vmem>>, vector<3x32xf32>
    %c118_423 = arith.constant 118 : index
    %c0_424 = arith.constant 0 : index
    %390 = tpu.strided_load %arg12[%c118_423, %c0_424] {strides = array<i32: 2, 1>} : memref<162x32xf32, #tpu.memory_space<vmem>>, vector<3x32xf32>
    %c119_425 = arith.constant 119 : index
    %c0_426 = arith.constant 0 : index
    %391 = tpu.strided_load %arg12[%c119_425, %c0_426] {strides = array<i32: 2, 1>} : memref<162x32xf32, #tpu.memory_space<vmem>>, vector<3x32xf32>
    %c120_427 = arith.constant 120 : index
    %c0_428 = arith.constant 0 : index
    %392 = tpu.strided_load %arg12[%c120_427, %c0_428] {strides = array<i32: 2, 1>} : memref<162x32xf32, #tpu.memory_space<vmem>>, vector<3x32xf32>
    %c126_429 = arith.constant 126 : index
    %c0_430 = arith.constant 0 : index
    %393 = tpu.strided_load %arg12[%c126_429, %c0_430] {strides = array<i32: 2, 1>} : memref<162x32xf32, #tpu.memory_space<vmem>>, vector<3x32xf32>
    %c127_431 = arith.constant 127 : index
    %c0_432 = arith.constant 0 : index
    %394 = tpu.strided_load %arg12[%c127_431, %c0_432] {strides = array<i32: 2, 1>} : memref<162x32xf32, #tpu.memory_space<vmem>>, vector<3x32xf32>
    %c128_433 = arith.constant 128 : index
    %c0_434 = arith.constant 0 : index
    %395 = tpu.strided_load %arg12[%c128_433, %c0_434] {strides = array<i32: 2, 1>} : memref<162x32xf32, #tpu.memory_space<vmem>>, vector<3x32xf32>
    %c129_435 = arith.constant 129 : index
    %c0_436 = arith.constant 0 : index
    %396 = tpu.strided_load %arg12[%c129_435, %c0_436] {strides = array<i32: 2, 1>} : memref<162x32xf32, #tpu.memory_space<vmem>>, vector<3x32xf32>
    %c135_437 = arith.constant 135 : index
    %c0_438 = arith.constant 0 : index
    %397 = tpu.strided_load %arg12[%c135_437, %c0_438] {strides = array<i32: 2, 1>} : memref<162x32xf32, #tpu.memory_space<vmem>>, vector<3x32xf32>
    %c136 = arith.constant 136 : index
    %c0_439 = arith.constant 0 : index
    %398 = tpu.strided_load %arg12[%c136, %c0_439] {strides = array<i32: 2, 1>} : memref<162x32xf32, #tpu.memory_space<vmem>>, vector<3x32xf32>
    %c137 = arith.constant 137 : index
    %c0_440 = arith.constant 0 : index
    %399 = tpu.strided_load %arg12[%c137, %c0_440] {strides = array<i32: 2, 1>} : memref<162x32xf32, #tpu.memory_space<vmem>>, vector<3x32xf32>
    %c138 = arith.constant 138 : index
    %c0_441 = arith.constant 0 : index
    %400 = tpu.strided_load %arg12[%c138, %c0_441] {strides = array<i32: 2, 1>} : memref<162x32xf32, #tpu.memory_space<vmem>>, vector<3x32xf32>
    %c144_442 = arith.constant 144 : index
    %c0_443 = arith.constant 0 : index
    %401 = tpu.strided_load %arg12[%c144_442, %c0_443] {strides = array<i32: 2, 1>} : memref<162x32xf32, #tpu.memory_space<vmem>>, vector<3x32xf32>
    %c145 = arith.constant 145 : index
    %c0_444 = arith.constant 0 : index
    %402 = tpu.strided_load %arg12[%c145, %c0_444] {strides = array<i32: 2, 1>} : memref<162x32xf32, #tpu.memory_space<vmem>>, vector<3x32xf32>
    %c146 = arith.constant 146 : index
    %c0_445 = arith.constant 0 : index
    %403 = tpu.strided_load %arg12[%c146, %c0_445] {strides = array<i32: 2, 1>} : memref<162x32xf32, #tpu.memory_space<vmem>>, vector<3x32xf32>
    %c147 = arith.constant 147 : index
    %c0_446 = arith.constant 0 : index
    %404 = tpu.strided_load %arg12[%c147, %c0_446] {strides = array<i32: 2, 1>} : memref<162x32xf32, #tpu.memory_space<vmem>>, vector<3x32xf32>
    %405 = tpu.concatenate %389, %390, %391, %392, %393, %394, %395, %396, %397, %398, %399, %400, %401, %402, %403, %404 in 1 : vector<3x32xf32>, vector<3x32xf32>, vector<3x32xf32>, vector<3x32xf32>, vector<3x32xf32>, vector<3x32xf32>, vector<3x32xf32>, vector<3x32xf32>, vector<3x32xf32>, vector<3x32xf32>, vector<3x32xf32>, vector<3x32xf32>, vector<3x32xf32>, vector<3x32xf32>, vector<3x32xf32>, vector<3x32xf32> -> vector<3x512xf32>
    %cst_447 = arith.constant dense<0.000000e+00> : vector<3x64xf32>
    %406 = tpu.matmul %405, %272, %cst_447 {dimension_numbers = #tpu.dot_dimension_numbers<[1], [0], [0], [1], [0, 0, 1, 1], [], []>} : vector<3x512xf32>, vector<512x64xf32>, vector<3x64xf32> -> vector<3x64xf32>
    %407 = vector.broadcast %273 : vector<1x64xf32> to vector<3x64xf32>
    %408 = arith.addf %406, %407 : vector<3x64xf32>
    %cst_448 = arith.constant 0.000000e+00 : f32
    %409 = vector.broadcast %cst_448 : f32 to vector<3x64xf32>
    %410 = arith.maximumf %408, %409 : vector<3x64xf32>
    %c15 = arith.constant 15 : index
    %c0_449 = arith.constant 0 : index
    %411 = vector.load %arg13[%c15, %c0_449] : memref<18x64xf32, #tpu.memory_space<vmem>>, vector<3x64xf32>
    tpu.vector_store %arg13[%c15, %c0_449], %410 {strides = array<i32>} : memref<18x64xf32, #tpu.memory_space<vmem>>, vector<3x64xf32>,
    %c0_450 = arith.constant 0 : index
    %c0_451 = arith.constant 0 : index
    %412 = vector.load %arg5[%c0_450, %c0_451] : memref<576x32xf32, #tpu.memory_space<vmem>>, vector<576x32xf32>
    %c0_452 = arith.constant 0 : index
    %c0_453 = arith.constant 0 : index
    %413 = vector.load %arg6[%c0_452, %c0_453] : memref<1x32xf32, #tpu.memory_space<vmem>>, vector<1x32xf32>
    %c0_454 = arith.constant 0 : index
    %c0_455 = arith.constant 0 : index
    %414 = vector.load %arg13[%c0_454, %c0_455] : memref<18x64xf32, #tpu.memory_space<vmem>>, vector<1x64xf32>
    %c1_456 = arith.constant 1 : index
    %c0_457 = arith.constant 0 : index
    %415 = vector.load %arg13[%c1_456, %c0_457] : memref<18x64xf32, #tpu.memory_space<vmem>>, vector<1x64xf32>
    %c2_458 = arith.constant 2 : index
    %c0_459 = arith.constant 0 : index
    %416 = vector.load %arg13[%c2_458, %c0_459] : memref<18x64xf32, #tpu.memory_space<vmem>>, vector<1x64xf32>
    %c3_460 = arith.constant 3 : index
    %c0_461 = arith.constant 0 : index
    %417 = vector.load %arg13[%c3_460, %c0_461] : memref<18x64xf32, #tpu.memory_space<vmem>>, vector<1x64xf32>
    %c4 = arith.constant 4 : index
    %c0_462 = arith.constant 0 : index
    %418 = vector.load %arg13[%c4, %c0_462] : memref<18x64xf32, #tpu.memory_space<vmem>>, vector<1x64xf32>
    %c5 = arith.constant 5 : index
    %c0_463 = arith.constant 0 : index
    %419 = vector.load %arg13[%c5, %c0_463] : memref<18x64xf32, #tpu.memory_space<vmem>>, vector<1x64xf32>
    %c6_464 = arith.constant 6 : index
    %c0_465 = arith.constant 0 : index
    %420 = vector.load %arg13[%c6_464, %c0_465] : memref<18x64xf32, #tpu.memory_space<vmem>>, vector<1x64xf32>
    %c7 = arith.constant 7 : index
    %c0_466 = arith.constant 0 : index
    %421 = vector.load %arg13[%c7, %c0_466] : memref<18x64xf32, #tpu.memory_space<vmem>>, vector<1x64xf32>
    %c8 = arith.constant 8 : index
    %c0_467 = arith.constant 0 : index
    %422 = vector.load %arg13[%c8, %c0_467] : memref<18x64xf32, #tpu.memory_space<vmem>>, vector<1x64xf32>
    %423 = tpu.concatenate %414, %415, %416, %417, %418, %419, %420, %421, %422 in 1 : vector<1x64xf32>, vector<1x64xf32>, vector<1x64xf32>, vector<1x64xf32>, vector<1x64xf32>, vector<1x64xf32>, vector<1x64xf32>, vector<1x64xf32>, vector<1x64xf32> -> vector<1x576xf32>
    %cst_468 = arith.constant dense<0.000000e+00> : vector<1x32xf32>
    %424 = tpu.matmul %423, %412, %cst_468 {dimension_numbers = #tpu.dot_dimension_numbers<[1], [0], [0], [1], [0, 0, 1, 1], [], []>} : vector<1x576xf32>, vector<576x32xf32>, vector<1x32xf32> -> vector<1x32xf32>
    %425 = arith.addf %424, %413 : vector<1x32xf32>
    %cst_469 = arith.constant 0.000000e+00 : f32
    %426 = vector.broadcast %cst_469 : f32 to vector<1x32xf32>
    %427 = arith.maximumf %425, %426 : vector<1x32xf32>
    %c0_470 = arith.constant 0 : index
    %c0_471 = arith.constant 0 : index
    %428 = vector.load %arg14[%c0_470, %c0_471] : memref<2x32xf32, #tpu.memory_space<vmem>>, vector<1x32xf32>
    tpu.vector_store %arg14[%c0_470, %c0_471], %427 {strides = array<i32>} : memref<2x32xf32, #tpu.memory_space<vmem>>, vector<1x32xf32>,
    %c9_472 = arith.constant 9 : index
    %c0_473 = arith.constant 0 : index
    %429 = vector.load %arg13[%c9_472, %c0_473] : memref<18x64xf32, #tpu.memory_space<vmem>>, vector<1x64xf32>
    %c10_474 = arith.constant 10 : index
    %c0_475 = arith.constant 0 : index
    %430 = vector.load %arg13[%c10_474, %c0_475] : memref<18x64xf32, #tpu.memory_space<vmem>>, vector<1x64xf32>
    %c11_476 = arith.constant 11 : index
    %c0_477 = arith.constant 0 : index
    %431 = vector.load %arg13[%c11_476, %c0_477] : memref<18x64xf32, #tpu.memory_space<vmem>>, vector<1x64xf32>
    %c12_478 = arith.constant 12 : index
    %c0_479 = arith.constant 0 : index
    %432 = vector.load %arg13[%c12_478, %c0_479] : memref<18x64xf32, #tpu.memory_space<vmem>>, vector<1x64xf32>
    %c13 = arith.constant 13 : index
    %c0_480 = arith.constant 0 : index
    %433 = vector.load %arg13[%c13, %c0_480] : memref<18x64xf32, #tpu.memory_space<vmem>>, vector<1x64xf32>
    %c14 = arith.constant 14 : index
    %c0_481 = arith.constant 0 : index
    %434 = vector.load %arg13[%c14, %c0_481] : memref<18x64xf32, #tpu.memory_space<vmem>>, vector<1x64xf32>
    %c15_482 = arith.constant 15 : index
    %c0_483 = arith.constant 0 : index
    %435 = vector.load %arg13[%c15_482, %c0_483] : memref<18x64xf32, #tpu.memory_space<vmem>>, vector<1x64xf32>
    %c16 = arith.constant 16 : index
    %c0_484 = arith.constant 0 : index
    %436 = vector.load %arg13[%c16, %c0_484] : memref<18x64xf32, #tpu.memory_space<vmem>>, vector<1x64xf32>
    %c17 = arith.constant 17 : index
    %c0_485 = arith.constant 0 : index
    %437 = vector.load %arg13[%c17, %c0_485] : memref<18x64xf32, #tpu.memory_space<vmem>>, vector<1x64xf32>
    %438 = tpu.concatenate %429, %430, %431, %432, %433, %434, %435, %436, %437 in 1 : vector<1x64xf32>, vector<1x64xf32>, vector<1x64xf32>, vector<1x64xf32>, vector<1x64xf32>, vector<1x64xf32>, vector<1x64xf32>, vector<1x64xf32>, vector<1x64xf32> -> vector<1x576xf32>
    %cst_486 = arith.constant dense<0.000000e+00> : vector<1x32xf32>
    %439 = tpu.matmul %438, %412, %cst_486 {dimension_numbers = #tpu.dot_dimension_numbers<[1], [0], [0], [1], [0, 0, 1, 1], [], []>} : vector<1x576xf32>, vector<576x32xf32>, vector<1x32xf32> -> vector<1x32xf32>
    %440 = arith.addf %439, %413 : vector<1x32xf32>
    %cst_487 = arith.constant 0.000000e+00 : f32
    %441 = vector.broadcast %cst_487 : f32 to vector<1x32xf32>
    %442 = arith.maximumf %440, %441 : vector<1x32xf32>
    %c1_488 = arith.constant 1 : index
    %c0_489 = arith.constant 0 : index
    %443 = vector.load %arg14[%c1_488, %c0_489] : memref<2x32xf32, #tpu.memory_space<vmem>>, vector<1x32xf32>
    tpu.vector_store %arg14[%c1_488, %c0_489], %442 {strides = array<i32>} : memref<2x32xf32, #tpu.memory_space<vmem>>, vector<1x32xf32>,
    %cst_490 = arith.constant 0.000000e+00 : f32
    %444 = vector.broadcast %cst_490 : f32 to vector<2x32xf32>
    %c0_491 = arith.constant 0 : index
    %c0_492 = arith.constant 0 : index
    %445 = vector.load %arg14[%c0_491, %c0_492] : memref<2x32xf32, #tpu.memory_space<vmem>>, vector<2x32xf32>
    %c0_493 = arith.constant 0 : index
    %c0_494 = arith.constant 0 : index
    %c0_495 = arith.constant 0 : index
    %446 = vector.load %arg7[%c0_493, %c0_494, %c0_495] : memref<1x32x32xf32, #tpu.memory_space<vmem>>, vector<1x32x32xf32>
    %447 = vector.shape_cast %446 : vector<1x32x32xf32> to vector<32x32xf32>
    %cst_496 = arith.constant dense<0.000000e+00> : vector<2x32xf32>
    %448 = tpu.matmul %445, %447, %cst_496 {dimension_numbers = #tpu.dot_dimension_numbers<[1], [0], [0], [1], [0, 0, 1, 1], [], []>} : vector<2x32xf32>, vector<32x32xf32>, vector<2x32xf32> -> vector<2x32xf32>
    %449 = arith.addf %444, %448 : vector<2x32xf32>
    %c0_497 = arith.constant 0 : index
    %c0_498 = arith.constant 0 : index
    %450 = vector.load %arg8[%c0_497, %c0_498] : memref<1x32xf32, #tpu.memory_space<vmem>>, vector<1x32xf32>
    %451 = vector.broadcast %450 : vector<1x32xf32> to vector<2x32xf32>
    %452 = arith.addf %449, %451 : vector<2x32xf32>
    %c0_499 = arith.constant 0 : index
    %c0_500 = arith.constant 0 : index
    %453 = vector.load %arg9[%c0_499, %c0_500] : memref<32x4xf32, #tpu.memory_space<vmem>>, vector<32x4xf32>
    %cst_501 = arith.constant dense<0.000000e+00> : vector<2x4xf32>
    %454 = tpu.matmul %452, %453, %cst_501 {dimension_numbers = #tpu.dot_dimension_numbers<[1], [0], [0], [1], [0, 0, 1, 1], [], []>} : vector<2x32xf32>, vector<32x4xf32>, vector<2x4xf32> -> vector<2x4xf32>
    %c0_502 = arith.constant 0 : index
    %c0_503 = arith.constant 0 : index
    %455 = vector.load %arg10[%c0_502, %c0_503] : memref<1x4xf32, #tpu.memory_space<vmem>>, vector<1x4xf32>
    %456 = vector.broadcast %455 : vector<1x4xf32> to vector<2x4xf32>
    %457 = arith.addf %454, %456 : vector<2x4xf32>
    %c0_504 = arith.constant 0 : index
    %c0_505 = arith.constant 0 : index
    %458 = vector.load %arg11[%c0_504, %c0_505] : memref<2x4xf32, #tpu.memory_space<vmem>>, vector<2x4xf32>
    tpu.vector_store %arg11[%c0_504, %c0_505], %457 {strides = array<i32>} : memref<2x4xf32, #tpu.memory_space<vmem>>, vector<2x4xf32>,
    return
  }
}

</mosaic_0001>

<bundles_post_ra>
// kernel: convolutional_dqn_forward.1
= control target key start
LH: loop header
LB: loop body
LE: loop exit
PB: predicated region body
PF: predicated region fallthrough
CT: control target
= control target key end

     0   :  { %s4055_s23 = smov 24   ;;  %s4056_s24 = smov 16   ;;  %s7652_s0 = inlined_call_operand.vmem [shape: f32[400,8], index: 0, kind: input, shape index: {}]   ;;  %s7653_s1 = inlined_call_operand.vmem [shape: f32[64,32], index: 1, kind: input, shape index: {}]   ;;  %s7654_s2 = inlined_call_operand.vmem [shape: f32[1,32], index: 2, kind: input, shape index: {}]   ;;  %s7655_s3 = inlined_call_operand.vmem [shape: f32[512,64], index: 3, kind: input, shape index: {}]   ;;  %s7656_s4 = inlined_call_operand.vmem [shape: f32[1,64], index: 4, kind: input, shape index: {}]   ;;  %s7657_s5 = inlined_call_operand.vmem [shape: f32[576,32], index: 5, kind: input, shape index: {}]   ;;  %s7658_s6 = inlined_call_operand.vmem [shape: f32[1,32], index: 6, kind: input, shape index: {}]   ;;  %s7659_s7 = inlined_call_operand.vmem [shape: f32[1,32,32], index: 7, kind: input, shape index: {}]   ;;  %s7660_s8 = inlined_call_operand.vmem [shape: f32[1,32], index: 8, kind: input, shape index: {}]   ;;  %s7661_s9 = inlined_call_operand.vmem [shape: f32[32,4], index: 9, kind: input, shape index: {}]   ;;  %s7662_s10 = inlined_call_operand.vmem [shape: f32[1,4], index: 10, kind: input, shape index: {}]   ;;  %s7663_s11 = inlined_call_operand.hbm [shape: f32[2,4], index: 11, kind: output, shape index: {}]  }
   0x1   :  { %v54_v0 = vld [vmem:[%s7652_s0 + $0xb] sm:$0xff]  ;;  %v50_v2 = vld [vmem:[%s7652_s0 + $0x1] sm:$0xff]  ;;  %s4057_s25 = smov 8   ;;  %v55_v3 = vld [vmem:[%s7652_s0 + $0x13] sm:$0x1] }
   0x2   :  { %v52_v1 = vld [vmem:[%s7652_s0 + $0xa] sm:$0xff]  ;;  %82 = vrot.lane.b32.xlu2 %v54_v0, %s4055_s23  ;;  %66 = vrot.lane.b32.xlu0 %v50_v2, %s4057_s25  ;;  %v53_v4 = vld [vmem:[%s7652_s0 + $0x12] sm:$0x1] }
   0x3   :  { %74 = vrot.lane.b32.xlu1 %v52_v1, %s4056_s24 }
   0x4   :  { %16 = vsyncpa [#allocation6], 0  ;;  %v51_v5 = vld [vmem:[%s7652_s0 + $0x9] sm:$0x1]  ;;  %v58_v6 = vld [vmem:[%s7652_s0 + $0x15] sm:$0xff]  ;;  %s4058_s19 = smov 40  }
   0x5   :  { %v57_v7 = vld [vmem:[%s7652_s0 + $0x1c] sm:$0x1]  ;;  %v4158_v8 = vld [vmem:[%s7652_s0 + $0x14] sm:$0xff]  ;;  %s4059_s20 = smov 32   ;;  %v61_v9 = vld [vmem:[%s7652_s0 + $0x26] sm:$0x1] }
   0x6   :  { %v60_v10 = vld [vmem:[%s7652_s0 + $0x1e] sm:$0xff]  ;;  %v59_v11 = vld [vmem:[%s7652_s0 + $0x1d] sm:$0x1]  ;;  %s4060_s30 = smov 48   ;;  %v63_v12 = vld [vmem:[%s7652_s0 + $0x27] sm:$0x1] }
   0x7   :  { %v62_v13 = vld [vmem:[%s7652_s0 + $0x1f] sm:$0xff]  ;;  %s4061_s16 = smov 56   ;;  %v182_v15 = vld [vmem:[%s7652_s0 + $0x1d] sm:$0x1]  ;;  %v4197_v16 = vld [vmem:[%s7652_s0 + $0x28] sm:$0xff]  ;;  %vm120_vm0 = vcmask 64512  }
   0x8   :  { %v184_v14 = vld [vmem:[%s7652_s0 + $0x26] sm:$0x1]  ;;  %v186_v17 = vld [vmem:[%s7652_s0 + $0x27] sm:$0x1]  ;;  %v190_v18 = vld [vmem:[%s7652_s0 + $0x31] sm:$0x1] }
   0x9   :  { %v189_v19 = vld [vmem:[%s7652_s0 + $0x29] sm:$0xff]  ;;  %v193_v21 = vld [vmem:[%s7652_s0 + $0x33] sm:$0xff]  ;;  %v301_v24 = vld [vmem:[%s7652_s0 + $0x31] sm:$0x1]  ;;  %vm123_vm1 = vcmask 130048   ;;  %vm126_vm2 = vcmask 195584  }
   0xa   :  { %84 = vrot.lane.b32.xlu2 %v55_v3, %s4055_s23  ;;  %68 = vrot.lane.b32.xlu0 %v51_v5, %s4057_s25  ;;  %v188_v20 = vld [vmem:[%s7652_s0 + $0x30] sm:$0x1]  ;;  %v192_v22 = vld [vmem:[%s7652_s0 + $0x3a] sm:$0x1]  ;;  %vm129_vm3 = vcmask 261120   ;;  %vm132_vm4 = vcmask 326656  }
   0xb   :  { %76 = vrot.lane.b32.xlu1 %v53_v4, %s4056_s24  ;;  %v191_v23 = vld [vmem:[%s7652_s0 + $0x32] sm:$0xff]  ;;  %v194_v25 = vld [vmem:[%s7652_s0 + $0x3b] sm:$0x1]  ;;  %v303_v26 = vld [vmem:[%s7652_s0 + $0x3a] sm:$0x1]  ;;  %vm135_vm5 = vcmask 392192  }
   0xc   :  { %v307_v27 = vld [vmem:[%s7652_s0 + $0x44] sm:$0x1]  ;;  %v4251_v28 = vld [vmem:[%s7652_s0 + $0x3c] sm:$0xff]  ;;  %v305_v29 = vld [vmem:[%s7652_s0 + $0x3b] sm:$0x1]  ;;  %vm138_vm6 = vcmask 457728  }
   0xd   :  { %v421_v31 = vld [vmem:[%s7652_s0 + $0x46] sm:$0xff]  ;;  %v419_v32 = vld [vmem:[%s7652_s0 + $0x3d] sm:$0xff]  ;;  %v4281_v35 = vld [vmem:[%s7653_s1 + $0x30] sm:$0xff]  ;;  %vm144_vm7 = vcmask 523264   ;;  %vm177_vm8 = vcmask 253952   ;;  %s4062_s12 = smov 64  }
   0xe   :  { %v4276_v34 = vld [vmem:[%s7653_s1 + $0x38] sm:$0xff]  ;;  %v4286_v36 = vld [vmem:[%s7652_s0 + $0x50] sm:$0xff]  ;;  %v423_v37 = vld [vmem:[%s7652_s0 + $0x47] sm:$0xff]  ;;  %s4063_s15 = smov 96   ;;  %vm2348_vm9 = vcmask 785408   ;;  %vm2443_vm10 = vcmask 518144  }
   0xf   :  { %159 = vmatpush.msra.mxu0 %v4276_v34  ;;  %279 = vmatpush.msra.mxu1 %v4276_v34  ;;  %v4304_v38 = vld [vmem:[%s7653_s1 + $0x28] sm:$0xff]  ;;  %v4314_v40 = vld [vmem:[%s7653_s1 + $0x20] sm:$0xff]  ;;  %v4322_v41 = vld [vmem:[%s7653_s1 + $0x18] sm:$0xff]  ;;  %vm3687_vm11 = vcmask 25600  }
  0x10   :  { %398 = vmatpush.msra.mxu2 %v4276_v34  ;;  %517 = vmatpush.msra.mxu3 %v4276_v34  ;;  %v429_v42 = vld [vmem:[%s7652_s0 + $0x5a] sm:$0xff]  ;;  %v427_v43 = vld [vmem:[%s7652_s0 + $0x51] sm:$0xff]  ;;  %v4349_v45 = vld [vmem:[%s7653_s1 + $0x8] sm:$0xff] }
  0x11   :  { %160 = vmatpush.msra.mxu0 %v4281_v35  ;;  %280 = vmatpush.msra.mxu1 %v4281_v35  ;;  %v4337_v44 = vld [vmem:[%s7653_s1 + $0x10] sm:$0xff]  ;;  %v4361_v49 = vld [vmem:[%s7653_s1] sm:$0xff]  ;;  %v311_v50 = vld [vmem:[%s7652_s0 + $0x4e] sm:$0x1] }
  0x12   :  { %98 = vrot.lane.b32.xlu2 %v58_v6, %s4058_s19  ;;  %90 = vrot.lane.b32.xlu0 %v4158_v8, %s4059_s20  ;;  %v309_v51 = vld [vmem:[%s7652_s0 + $0x45] sm:$0x1]  ;;  %v431_v52 = vld [vmem:[%s7652_s0 + $0x5b] sm:$0xff] }
  0x13   :  { %92 = vrot.lane.b32.xlu1 %v57_v7, %s4059_s20  ;;  %399 = vmatpush.msra.mxu2 %v4281_v35  ;;  %v313_v56 = vld [vmem:[%s7652_s0 + $0x4f] sm:$0x1]  ;;  %v48_v60 = vld [vmem:[%s7652_s0] sm:$0xff]  ;;  %v49_v4 = vld [vmem:[%s7652_s0 + $0x8] sm:$0x1] }
  0x14   :  { %161 = vmatpush.msra.mxu0 %v4304_v38  ;;  %281 = vmatpush.msra.mxu1 %v4304_v38  ;;  %v4424_v61 = vld [vmem:[%s7652_s0 + $0x65] sm:$0xff] }
  0x15   :  { %400 = vmatpush.msra.mxu2 %v4304_v38  ;;  %518 = vmatpush.msra.mxu3 %v4281_v35  ;;  %v420_v62 = vld [vmem:[%s7652_s0 + $0x45] sm:$0x1] }
  0x16   :  { %162 = vmatpush.msra.mxu0 %v4314_v40  ;;  %282 = vmatpush.msra.mxu1 %v4314_v40  ;;  %v4456_v5 = vld [vmem:[%s7652_s0 + $0x64] sm:$0xff] }
  0x17   :  { %401 = vmatpush.msra.mxu2 %v4314_v40  ;;  %519 = vmatpush.msra.mxu3 %v4304_v38 }
  0x18   :  { %163 = vmatpush.msra.mxu0 %v4322_v41  ;;  %283 = vmatpush.msra.mxu1 %v4322_v41 }
  0x19   :  { %402 = vmatpush.msra.mxu2 %v4322_v41  ;;  %520 = vmatpush.msra.mxu3 %v4314_v40 }
  0x1a   :  { %108 = vrot.lane.b32.xlu2 %v61_v9, %s4060_s30  ;;  %100 = vrot.lane.b32.xlu0 %v59_v11, %s4058_s19  ;;  %v4466_v9 = vld [vmem:[%s7652_s0 + $0x79] sm:$0xff] }
  0x1b   :  { %106 = vrot.lane.b32.xlu1 %v60_v10, %s4060_s30  ;;  %164 = vmatpush.msra.mxu0 %v4337_v44 }
  0x1c   :  { %284 = vmatpush.msra.mxu1 %v4337_v44  ;;  %403 = vmatpush.msra.mxu2 %v4337_v44 }
  0x1d   :  { %165 = vmatpush.msra.mxu0 %v4349_v45  ;;  %521 = vmatpush.msra.mxu3 %v4322_v41 }
  0x1e   :  { %285 = vmatpush.msra.mxu1 %v4349_v45  ;;  %404 = vmatpush.msra.mxu2 %v4349_v45 }
  0x1f   :  { %166 = vmatpush.msra.mxu0 %v4361_v49  ;;  %522 = vmatpush.msra.mxu3 %v4337_v44 }
  0x20   :  { %286 = vmatpush.msra.mxu1 %v4361_v49  ;;  %405 = vmatpush.msra.mxu2 %v4361_v49 }
  0x21   :  { %523 = vmatpush.msra.mxu3 %v4349_v45  ;;  %636 = vmatpush.msrb.mxu0 %v4276_v34 }
  0x22   :  { %197 = vrot.lane.b32.xlu2 %v58_v6, %s4057_s25  ;;  %114 = vrot.lane.b32.xlu0 %v62_v13, %s4061_s16  ;;  %v422_v6 = vld [vmem:[%s7652_s0 + $0x4e] sm:$0x1] }
  0x23   :  { %116 = vrot.lane.b32.xlu1 %v63_v12, %s4061_s16  ;;  %524 = vmatpush.msra.mxu3 %v4361_v49 }
  0x24   :  { %637 = vmatpush.msrb.mxu0 %v4281_v35  ;;  %755 = vmatpush.msrb.mxu1 %v4276_v34 }
  0x25   :  { %874 = vmatpush.msrb.mxu2 %v4276_v34  ;;  %993 = vmatpush.msrb.mxu3 %v4276_v34 }
  0x26   :  { %638 = vmatpush.msrb.mxu0 %v4304_v38  ;;  %756 = vmatpush.msrb.mxu1 %v4281_v35 }
  0x27   :  { %875 = vmatpush.msrb.mxu2 %v4281_v35  ;;  %994 = vmatpush.msrb.mxu3 %v4281_v35 }
  0x28   :  { %639 = vmatpush.msrb.mxu0 %v4314_v40  ;;  %757 = vmatpush.msrb.mxu1 %v4304_v38 }
  0x29   :  { %876 = vmatpush.msrb.mxu2 %v4304_v38  ;;  %995 = vmatpush.msrb.mxu3 %v4304_v38 }
  0x2a   :  { %207 = vrot.lane.b32.xlu2 %v184_v14, %s4056_s24  ;;  %199 = vrot.lane.b32.xlu0 %v182_v15, %s4057_s25 }
  0x2b   :  { %205 = vrot.lane.b32.xlu1 %v60_v10, %s4056_s24  ;;  %640 = vmatpush.msrb.mxu0 %v4322_v41 }
  0x2c   :  { %758 = vmatpush.msrb.mxu1 %v4314_v40  ;;  %877 = vmatpush.msrb.mxu2 %v4314_v40 }
  0x2d   :  { %641 = vmatpush.msrb.mxu0 %v4337_v44  ;;  %996 = vmatpush.msrb.mxu3 %v4314_v40 }
  0x2e   :  { %759 = vmatpush.msrb.mxu1 %v4322_v41  ;;  %878 = vmatpush.msrb.mxu2 %v4322_v41 }
  0x2f   :  { %642 = vmatpush.msrb.mxu0 %v4349_v45  ;;  %997 = vmatpush.msrb.mxu3 %v4322_v41 }
  0x30   :  { %760 = vmatpush.msrb.mxu1 %v4337_v44  ;;  %879 = vmatpush.msrb.mxu2 %v4337_v44 }
  0x31   :  { %643 = vmatpush.msrb.mxu0 %v4361_v49  ;;  %998 = vmatpush.msrb.mxu3 %v4337_v44 }
  0x32   :  { %221 = vrot.lane.b32.xlu2 %v4197_v16, %s4059_s20  ;;  %213 = vrot.lane.b32.xlu0 %v62_v13, %s4055_s23 }
  0x33   :  { %215 = vrot.lane.b32.xlu1 %v186_v17, %s4055_s23  ;;  %761 = vmatpush.msrb.mxu1 %v4349_v45 }
  0x34   :  { %880 = vmatpush.msrb.mxu2 %v4349_v45  ;;  %999 = vmatpush.msrb.mxu3 %v4349_v45 }
  0x35   :  { %762 = vmatpush.msrb.mxu1 %v4361_v49 }
  0x36   :  { %881 = vmatpush.msrb.mxu2 %v4361_v49  ;;  %1000 = vmatpush.msrb.mxu3 %v4361_v49 }
  0x3a   :  { %231 = vrot.lane.b32.xlu2 %v190_v18, %s4058_s19  ;;  %223 = vrot.lane.b32.xlu0 %v188_v20, %s4059_s20  ;;  %v424_v20 = vld [vmem:[%s7652_s0 + $0x4f] sm:$0x1] }
  0x3b   :  { %229 = vrot.lane.b32.xlu1 %v189_v19, %s4058_s19 }
  0x42   :  { %245 = vrot.lane.b32.xlu2 %v193_v21, %s4061_s16  ;;  %237 = vrot.lane.b32.xlu0 %v191_v23, %s4060_s30 }
  0x43   :  { %239 = vrot.lane.b32.xlu1 %v192_v22, %s4060_s30 }
  0x4a   :  { %318 = vrot.lane.b32.xlu2 %v301_v24, %s4057_s25  ;;  %247 = vrot.lane.b32.xlu0 %v194_v25, %s4061_s16 }
  0x4b   :  { %316 = vrot.lane.b32.xlu1 %v189_v19, %s4057_s25 }
  0x52   :  { %332 = vrot.lane.b32.xlu2 %v193_v21, %s4055_s23  ;;  %324 = vrot.lane.b32.xlu0 %v191_v23, %s4056_s24  ;;  %v4490_v21 = vld [vmem:[%s7652_s0 + $0x82] sm:$0xff]  ;;  %v659_v23 = vld [vmem:[%s7652_s0 + $0x6e] sm:$0xff] }
  0x53   :  { %326 = vrot.lane.b32.xlu1 %v303_v26, %s4056_s24 }
  0x5a   :  { %342 = vrot.lane.b32.xlu2 %v307_v27, %s4059_s20  ;;  %334 = vrot.lane.b32.xlu0 %v305_v29, %s4055_s23 }
  0x5b   :  { %340 = vrot.lane.b32.xlu1 %v4251_v28, %s4059_s20 }
  0x5c   :  { %v4260_v30 = vpop.permute.xlu2 %82 }
  0x62   :  { %443 = vrot.lane.b32.xlu2 %v421_v31, %s4056_s24  ;;  %348 = vrot.lane.b32.xlu0 %v419_v32, %s4058_s19 }
  0x63   :  { %435 = vrot.lane.b32.xlu1 %v419_v32, %s4057_s25  ;;  %v4514_v32 = vld [vmem:[%s7652_s0 + $0x83] sm:$0xff] }
  0x64   :  { %v4271_v33 = vpop.permute.xlu2 %84 }
  0x6a   :  { %459 = vrot.lane.b32.xlu2 %v4286_v36, %s4059_s20  ;;  %451 = vrot.lane.b32.xlu0 %v423_v37, %s4055_s23 }
  0x6b   :  { %356 = vrot.lane.b32.xlu1 %v421_v31, %s4060_s30 }
  0x6c   :  { %v4307_v39 = vpop.permute.xlu2 %98 }
  0x72   :  { %475 = vrot.lane.b32.xlu2 %v429_v42, %s4060_s30  ;;  %364 = vrot.lane.b32.xlu0 %v423_v37, %s4061_s16 }
  0x73   :  { %467 = vrot.lane.b32.xlu1 %v427_v43, %s4058_s19 }
  0x74   :  { %v4351_v46 = vpop.permute.xlu2 %108  ;;  %v67_v48 = vpop.permute.xlu0 %66 }
  0x75   :  { %v4353_v47 = vpop.permute.xlu1 %74  ;;  %v121_v63 = vsel %vm120_vm0, %v48_v60, %v67_v48 }
  0x76   :  { %v124_v2 = vsel %vm123_vm1, %v121_v63, %v4353_v47 }
  0x77   :  { %v127_v7 = vsel %vm126_vm2, %v124_v2, %v4260_v30 }
  0x7a   :  { %358 = vrot.lane.b32.xlu2 %v311_v50, %s4060_s30  ;;  %483 = vrot.lane.b32.xlu0 %v431_v52, %s4061_s16 }
  0x7b   :  { %350 = vrot.lane.b32.xlu1 %v309_v51, %s4058_s19 }
  0x7c   :  { %v4385_v53 = vpop.permute.xlu2 %197  ;;  %v69_v55 = vpop.permute.xlu0 %68 }
  0x7d   :  { %v4387_v54 = vpop.permute.xlu1 %76  ;;  %v122_v11 = vsel %vm120_vm0, %v49_v4, %v69_v55  ;;  %v251_v51 = vsel %vm120_vm0, %v4158_v8, %v4385_v53  ;;  %v4555_v55 = vld [vmem:[%s7652_s0 + $0x8c] sm:$0xff] }
  0x7e   :  { %v125_v15 = vsel %vm123_vm1, %v122_v11, %v4387_v54 }
  0x7f   :  { %v128_v22 = vsel %vm126_vm2, %v125_v15, %v4271_v33  ;;  %v661_v33 = vld [vmem:[%s7652_s0 + $0x6f] sm:$0xff]  ;;  %v432_v15 = vld [vmem:[%s7652_s0 + $0x63] sm:$0x1] }
  0x82   :  { %562 = vrot.lane.b32.xlu2 %v429_v42, %s4056_s24  ;;  %366 = vrot.lane.b32.xlu0 %v313_v56, %s4061_s16  ;;  %v180_v56 = vld [vmem:[%s7652_s0 + $0x1c] sm:$0x1] }
  0x83   :  { %554 = vrot.lane.b32.xlu1 %v427_v43, %s4057_s25  ;;  %v4532_v43 = vld [vmem:[%s7652_s0 + $0x78] sm:$0xff] }
  0x84   :  { %v4408_v57 = vpop.permute.xlu2 %207  ;;  %v91_v59 = vpop.permute.xlu0 %90 }
  0x85   :  { %v4410_v58 = vpop.permute.xlu1 %92  ;;  %v130_v10 = vsel %vm129_vm3, %v127_v7, %v91_v59 }
  0x86   :  { %v133_v12 = vsel %vm132_vm4, %v130_v10, %v4307_v39  ;;  %v131_v24 = vsel %vm129_vm3, %v128_v22, %v4410_v58 }
  0x8a   :  { %673 = vrot.lane.b32.xlu2 %v4424_v61, %s4057_s25  ;;  %437 = vrot.lane.b32.xlu0 %v420_v62, %s4057_s25 }
  0x8b   :  { %570 = vrot.lane.b32.xlu1 %v431_v52, %s4055_s23  ;;  %v428_v52 = vld [vmem:[%s7652_s0 + $0x59] sm:$0x1] }
  0x8c   :  { %v4441_v0 = vpop.permute.xlu2 %221  ;;  %v101_v3 = vpop.permute.xlu0 %100 }
  0x8d   :  { %v107_v1 = vpop.permute.xlu1 %106  ;;  %v134_v25 = vsel %vm132_vm4, %v131_v24, %v101_v3  ;;  %v430_v3 = vld [vmem:[%s7652_s0 + $0x62] sm:$0x1] }
  0x8e   :  { %v136_v17 = vsel %vm135_vm5, %v133_v12, %v107_v1  ;;  %v137_v30 = vsel %vm135_vm5, %v134_v25, %v4351_v46  ;;  %v426_v46 = vld [vmem:[%s7652_s0 + $0x58] sm:$0x1]  ;;  %v541_v24 = vld [vmem:[%s7652_s0 + $0x62] sm:$0x1]  ;;  %v777_v25 = vld [vmem:[%s7652_s0 + $0x81] sm:$0x1] }
  0x92   :  { %578 = vrot.lane.b32.xlu2 %v4456_v5, %s4059_s20  ;;  %792 = vrot.lane.b32.xlu0 %v4466_v9, %s4057_s25 }
  0x93   :  { %445 = vrot.lane.b32.xlu1 %v422_v6, %s4056_s24 }
  0x94   :  { %v4477_v13 = vpop.permute.xlu2 %231  ;;  %v115_v18 = vpop.permute.xlu0 %114 }
  0x95   :  { %v117_v14 = vpop.permute.xlu1 %116  ;;  %v139_v19 = vsel %vm138_vm6, %v136_v17, %v115_v18 }
  0x96   :  { %3705 = vmatmul.msk.f32.vlgmr.msra.gmra.mxu0 %vm144_vm7, %v139_v19  ;;  %v140_v31 = vsel %vm138_vm6, %v137_v30, %v117_v14  ;;  %v539_v19 = vld [vmem:[%s7652_s0 + $0x59] sm:$0x1]  ;;  %v543_v30 = vld [vmem:[%s7652_s0 + $0x63] sm:$0x1] }
  0x97   :  { %1112 = vmatpush.msra.mxu0 %v4276_v34 }
  0x99   :  { %1113 = vmatpush.msra.mxu0 %v4281_v35 }
  0x9a   :  { %453 = vrot.lane.b32.xlu2 %v424_v20, %s4055_s23  ;;  %681 = vrot.lane.b32.xlu0 %v659_v23, %s4056_s24  ;;  %v788_v20 = vld [vmem:[%s7652_s0 + $0x97] sm:$0xff] }
  0x9b   :  { %800 = vrot.lane.b32.xlu1 %v4490_v21, %s4056_s24  ;;  %1114 = vmatpush.msra.mxu0 %v4304_v38 }
  0x9c   :  { %v246_v26 = vpop.permute.xlu2 %245  ;;  %v200_v29 = vpop.permute.xlu0 %199 }
  0x9d   :  { %v206_v27 = vpop.permute.xlu1 %205  ;;  %1115 = vmatpush.msra.mxu0 %v4314_v40  ;;  %v252_v8 = vsel %vm120_vm0, %v180_v56, %v200_v29 }
  0x9e   :  { %3706 = vmatmul.msk.f32.gmra.mxu0 %vm144_vm7, %v140_v31  ;;  %v253_v54 = vsel %vm123_vm1, %v251_v51, %v206_v27  ;;  %v254_v1 = vsel %vm123_vm1, %v252_v8, %v4408_v57  ;;  %v779_v31 = vld [vmem:[%s7652_s0 + $0x8a] sm:$0x1] }
  0x9f   :  { %1116 = vmatpush.msra.mxu0 %v4322_v41 }
  0xa1   :  { %1117 = vmatpush.msra.mxu0 %v4337_v44 }
  0xa2   :  { %808 = vrot.lane.b32.xlu2 %v4514_v32, %s4055_s23  ;;  %586 = vrot.lane.b32.xlu0 %v4424_v61, %s4058_s19 }
  0xa3   :  { %689 = vrot.lane.b32.xlu1 %v661_v33, %s4055_s23  ;;  %1118 = vmatpush.msra.mxu0 %v4349_v45 }
  0xa4   :  { %v4526_v37 = vpop.permute.xlu2 %318  ;;  %v214_v42 = vpop.permute.xlu0 %213 }
  0xa5   :  { %v216_v39 = vpop.permute.xlu1 %215  ;;  %1119 = vmatpush.msra.mxu0 %v4361_v49  ;;  %v255_v58 = vsel %vm126_vm2, %v253_v54, %v214_v42 }
  0xa6   :  { %v257_v53 = vsel %vm129_vm3, %v255_v58, %v4441_v0  ;;  %v784_v0 = vld [vmem:[%s7652_s0 + $0x8d] sm:$0xff]  ;;  %v256_v4 = vsel %vm126_vm2, %v254_v1, %v216_v39 }
  0xa7   :  { %v299_v1 = vld [vmem:[%s7652_s0 + $0x30] sm:$0x1] }
  0xaa   :  { %697 = vrot.lane.b32.xlu2 %v4532_v43, %s4059_s20  ;;  %461 = vrot.lane.b32.xlu0 %v426_v46, %s4059_s20 }
  0xab   :  { %594 = vrot.lane.b32.xlu1 %v659_v23, %s4060_s30 }
  0xac   :  { %v4543_v47 = vpop.permute.xlu2 %332  ;;  %v224_v50 = vpop.permute.xlu0 %223 }
  0xad   :  { %v230_v48 = vpop.permute.xlu1 %229  ;;  %v258_v6 = vsel %vm129_vm3, %v256_v4, %v224_v50  ;;  %v781_v50 = vld [vmem:[%s7652_s0 + $0x8b] sm:$0x1] }
  0xae   :  { %v259_v61 = vsel %vm132_vm4, %v257_v53, %v230_v48  ;;  %v260_v57 = vsel %vm132_vm4, %v258_v6, %v4477_v13  ;;  %v545_v48 = vld [vmem:[%s7652_s0 + $0x6c] sm:$0x1] }
  0xb2   :  { %602 = vrot.lane.b32.xlu2 %v661_v33, %s4061_s16  ;;  %816 = vrot.lane.b32.xlu0 %v4555_v55, %s4059_s20 }
  0xb3   :  { %469 = vrot.lane.b32.xlu1 %v428_v52, %s4058_s19 }
  0xb4   :  { %v4568_v59 = vpop.permute.xlu2 %342  ;;  %v238_v62 = vpop.permute.xlu0 %237 }
  0xb5   :  { %v240_v60 = vpop.permute.xlu1 %239  ;;  %v261_v63 = vsel %vm135_vm5, %v259_v61, %v238_v62  ;;  %v547_v61 = vld [vmem:[%s7652_s0 + $0x6d] sm:$0x1]  ;;  %v4674_v62 = vld [vmem:[%s7652_s0 + $0xa0] sm:$0xff] }
  0xb6   :  { %v263_v2 = vsel %vm138_vm6, %v261_v63, %v246_v26  ;;  %v262_v11 = vsel %vm135_vm5, %v260_v57, %v240_v60  ;;  %v783_v63 = vld [vmem:[%s7652_s0 + $0x94] sm:$0x1] }
  0xb7   :  { %3707 = vmatmul.msk.f32.vlgmr.msra.gmra.mxu1 %vm144_vm7, %v263_v2 }
  0xb8   :  { %1231 = vmatpush.msra.mxu1 %v4276_v34 }
  0xba   :  { %477 = vrot.lane.b32.xlu2 %v430_v3, %s4060_s30  ;;  %705 = vrot.lane.b32.xlu0 %v4466_v9, %s4058_s19  ;;  %v786_v9 = vld [vmem:[%s7652_s0 + $0x96] sm:$0xff] }
  0xbb   :  { %824 = vrot.lane.b32.xlu1 %v784_v0, %s4058_s19  ;;  %1232 = vmatpush.msra.mxu1 %v4281_v35 }
  0xbc   :  { %v444_v7 = vpop.permute.xlu2 %443  ;;  %v248_v12 = vpop.permute.xlu0 %247 }
  0xbd   :  { %v317_v10 = vpop.permute.xlu1 %316  ;;  %1233 = vmatpush.msra.mxu1 %v4304_v38  ;;  %v264_v14 = vsel %vm138_vm6, %v262_v11, %v248_v12 }
  0xbe   :  { %v370_v42 = vsel %vm120_vm0, %v4197_v16, %v317_v10 }
  0xbf   :  { %1234 = vmatpush.msra.mxu1 %v4314_v40 }
  0xc0   :  { %3708 = vmatmul.msk.f32.gmra.mxu1 %vm144_vm7, %v264_v14  ;;  %v785_v14 = vld [vmem:[%s7652_s0 + $0x95] sm:$0x1] }
  0xc1   :  { %1235 = vmatpush.msra.mxu1 %v4322_v41 }
  0xc2   :  { %485 = vrot.lane.b32.xlu2 %v432_v15, %s4061_s16  ;;  %713 = vrot.lane.b32.xlu0 %v4490_v21, %s4060_s30  ;;  %v658_v15 = vld [vmem:[%s7652_s0 + $0x6d] sm:$0x1] }
  0xc3   :  { %832 = vrot.lane.b32.xlu1 %v786_v9, %s4060_s30  ;;  %1236 = vmatpush.msra.mxu1 %v4337_v44 }
  0xc4   :  { %v460_v13 = vpop.permute.xlu2 %459  ;;  %v325_v18 = vpop.permute.xlu0 %324 }
  0xc5   :  { %v327_v17 = vpop.permute.xlu1 %326  ;;  %1237 = vmatpush.msra.mxu1 %v4349_v45  ;;  %v372_v46 = vsel %vm123_vm1, %v370_v42, %v325_v18  ;;  %v664_v42 = vld [vmem:[%s7652_s0 + $0x80] sm:$0x1] }
  0xc6   :  { %v374_v51 = vsel %vm126_vm2, %v372_v46, %v4543_v47  ;;  %v4770_v46 = vld [vmem:[%s7652_s0 + $0xab] sm:$0xff] }
  0xc7   :  { %1238 = vmatpush.msra.mxu1 %v4361_v49 }
  0xca   :  { %556 = vrot.lane.b32.xlu2 %v539_v19, %s4057_s25  ;;  %721 = vrot.lane.b32.xlu0 %v4514_v32, %s4061_s16 }
  0xcb   :  { %840 = vrot.lane.b32.xlu1 %v788_v20, %s4061_s16 }
  0xcc   :  { %v476_v21 = vpop.permute.xlu2 %475  ;;  %v335_v23 = vpop.permute.xlu0 %334 }
  0xcd   :  { %v341_v22 = vpop.permute.xlu1 %340 }
  0xce   :  { %v376_v16 = vsel %vm129_vm3, %v374_v51, %v341_v22  ;;  %v660_v22 = vld [vmem:[%s7652_s0 + $0x76] sm:$0x1] }
  0xd2   :  { %564 = vrot.lane.b32.xlu2 %v541_v24, %s4056_s24  ;;  %794 = vrot.lane.b32.xlu0 %v777_v25, %s4057_s25 }
  0xd3   :  { %911 = vrot.lane.b32.xlu1 %v784_v0, %s4057_s25  ;;  %v371_v0 = vsel %vm120_vm0, %v299_v1, %v4526_v37  ;;  %v903_v37 = vld [vmem:[%s7652_s0 + $0xa1] sm:$0xff]  ;;  %v898_v1 = vld [vmem:[%s7652_s0 + $0x9e] sm:$0x1] }
  0xd4   :  { %v4630_v26 = vpop.permute.xlu2 %358  ;;  %v349_v29 = vpop.permute.xlu0 %348  ;;  %v373_v57 = vsel %vm123_vm1, %v371_v0, %v327_v17 }
  0xd5   :  { %v436_v27 = vpop.permute.xlu1 %435  ;;  %v378_v54 = vsel %vm132_vm4, %v376_v16, %v349_v29  ;;  %v375_v11 = vsel %vm126_vm2, %v373_v57, %v335_v23  ;;  %v549_v23 = vld [vmem:[%s7652_s0 + $0x76] sm:$0x1]  ;;  %v551_v29 = vld [vmem:[%s7652_s0 + $0x77] sm:$0x1]  ;;  %v896_v16 = vld [vmem:[%s7652_s0 + $0x95] sm:$0x1] }
  0xd6   :  { %v489_v52 = vsel %vm120_vm0, %v4251_v28, %v436_v27  ;;  %v662_v27 = vld [vmem:[%s7652_s0 + $0x77] sm:$0x1] }
  0xd7   :  { %v491_v47 = vsel %vm123_vm1, %v489_v52, %v444_v7 }
  0xda   :  { %572 = vrot.lane.b32.xlu2 %v543_v30, %s4055_s23  ;;  %802 = vrot.lane.b32.xlu0 %v779_v31, %s4056_s24  ;;  %v905_v30 = vld [vmem:[%s7652_s0 + $0xaa] sm:$0xff] }
  0xdb   :  { %919 = vrot.lane.b32.xlu1 %v786_v9, %s4056_s24  ;;  %v377_v9 = vsel %vm129_vm3, %v375_v11, %v4568_v59 }
  0xdc   :  { %v4641_v32 = vpop.permute.xlu2 %562  ;;  %v452_v39 = vpop.permute.xlu0 %451 }
  0xdd   :  { %v357_v33 = vpop.permute.xlu1 %356  ;;  %v493_v28 = vsel %vm126_vm2, %v491_v47, %v452_v39 }
  0xde   :  { %v380_v8 = vsel %vm135_vm5, %v378_v54, %v357_v33  ;;  %v495_v2 = vsel %vm129_vm3, %v493_v28, %v460_v13  ;;  %v666_v54 = vld [vmem:[%s7652_s0 + $0x81] sm:$0x1] }
  0xe2   :  { %580 = vrot.lane.b32.xlu2 %v545_v48, %s4059_s20  ;;  %810 = vrot.lane.b32.xlu0 %v781_v50, %s4055_s23  ;;  %v789_v48 = vld [vmem:[%s7652_s0 + $0x9f] sm:$0x1] }
  0xe3   :  { %927 = vrot.lane.b32.xlu1 %v788_v20, %s4055_s23 }
  0xe4   :  { %v4661_v56 = vpop.permute.xlu2 %673  ;;  %v365_v53 = vpop.permute.xlu0 %364 }
  0xe5   :  { %v468_v58 = vpop.permute.xlu1 %467  ;;  %v382_v60 = vsel %vm138_vm6, %v380_v8, %v365_v53 }
  0xe6   :  { %3709 = vmatmul.msk.f32.vlgmr.msra.gmra.mxu2 %vm144_vm7, %v382_v60  ;;  %v497_v3 = vsel %vm132_vm4, %v495_v2, %v468_v58  ;;  %v4792_v58 = vld [vmem:[%s7654_s2] ss:$0 sm:$0xff]  ;;  %v668_v2 = vld [vmem:[%s7652_s0 + $0x8a] sm:$0x1] }
  0xe7   :  { %1350 = vmatpush.msra.mxu2 %v4276_v34  ;;  %v499_v10 = vsel %vm135_vm5, %v497_v3, %v476_v21  ;;  %v787_v21 = vld [vmem:[%s7652_s0 + $0x9e] sm:$0x1] }
  0xe9   :  { %1351 = vmatpush.msra.mxu2 %v4281_v35 }
  0xea   :  { %588 = vrot.lane.b32.xlu2 %v547_v61, %s4058_s19  ;;  %818 = vrot.lane.b32.xlu0 %v783_v63, %s4059_s20 }
  0xeb   :  { %935 = vrot.lane.b32.xlu1 %v4674_v62, %s4059_s20  ;;  %1352 = vmatpush.msra.mxu2 %v4304_v38 }
  0xec   :  { %v4692_v4 = vpop.permute.xlu2 %578  ;;  %v484_v7 = vpop.permute.xlu0 %483 }
  0xed   :  { %v351_v6 = vpop.permute.xlu1 %350  ;;  %v501_v12 = vsel %vm138_vm6, %v499_v10, %v484_v7  ;;  %1353 = vmatpush.msra.mxu2 %v4314_v40  ;;  %v418_v7 = vld [vmem:[%s7652_s0 + $0x44] sm:$0x1] }
  0xee   :  { %3711 = vmatmul.msk.f32.vlgmr.msra.gmra.mxu3 %vm144_vm7, %v501_v12  ;;  %v379_v13 = vsel %vm132_vm4, %v377_v9, %v351_v6 }
  0xef   :  { %1469 = vmatpush.msra.mxu3 %v4276_v34  ;;  %1354 = vmatpush.msra.mxu2 %v4322_v41  ;;  %v381_v59 = vsel %vm135_vm5, %v379_v13, %v4630_v26 }
  0xf1   :  { %1355 = vmatpush.msra.mxu2 %v4337_v44  ;;  %1470 = vmatpush.msra.mxu3 %v4281_v35 }
  0xf2   :  { %943 = vrot.lane.b32.xlu2 %v903_v37, %s4058_s19  ;;  %675 = vrot.lane.b32.xlu0 %v658_v15, %s4057_s25  ;;  %v670_v15 = vld [vmem:[%s7652_s0 + $0x8b] sm:$0x1] }
  0xf3   :  { %826 = vrot.lane.b32.xlu1 %v785_v14, %s4058_s19  ;;  %1356 = vmatpush.msra.mxu2 %v4349_v45 }
  0xf4   :  { %v4719_v17 = vpop.permute.xlu2 %453  ;;  %v367_v19 = vpop.permute.xlu0 %366  ;;  %1471 = vmatpush.msra.mxu3 %v4304_v38 }
  0xf5   :  { %v555_v18 = vpop.permute.xlu1 %554  ;;  %v383_v20 = vsel %vm138_vm6, %v381_v59, %v367_v19  ;;  %1357 = vmatpush.msra.mxu2 %v4361_v49 }
  0xf6   :  { %3710 = vmatmul.msk.f32.gmra.mxu2 %vm144_vm7, %v383_v20  ;;  %1472 = vmatpush.msra.mxu3 %v4314_v40  ;;  %v608_v53 = vsel %vm120_vm0, %v4286_v36, %v555_v18  ;;  %v4813_v36 = vld [vmem:[%s7652_s0 + $0xdd] sm:$0xff] }
  0xf7   :  { %v610_v3 = vsel %vm123_vm1, %v608_v53, %v4641_v32 }
  0xf8   :  { %1473 = vmatpush.msra.mxu3 %v4322_v41 }
  0xfa   :  { %834 = vrot.lane.b32.xlu2 %v787_v21, %s4060_s30  ;;  %596 = vrot.lane.b32.xlu0 %v549_v23, %s4060_s30 }
  0xfb   :  { %683 = vrot.lane.b32.xlu1 %v660_v22, %s4056_s24  ;;  %1474 = vmatpush.msra.mxu3 %v4337_v44 }
  0xfc   :  { %v4743_v24 = vpop.permute.xlu2 %808  ;;  %v438_v26 = vpop.permute.xlu0 %437 }
  0xfd   :  { %v571_v25 = vpop.permute.xlu1 %570  ;;  %1475 = vmatpush.msra.mxu3 %v4349_v45  ;;  %v490_v9 = vsel %vm120_vm0, %v418_v7, %v438_v26  ;;  %v900_v26 = vld [vmem:[%s7652_s0 + $0x9f] sm:$0x1] }
  0xfe   :  { %v612_v0 = vsel %vm126_vm2, %v610_v3, %v571_v25  ;;  %v4857_v25 = vld [vmem:[%s7652_s0 + $0xe7] sm:$0xff] }
  0xff   :  { %1476 = vmatpush.msra.mxu3 %v4361_v49  ;;  %v614_v6 = vsel %vm129_vm3, %v612_v0, %v4692_v4  ;;  %v4835_v4 = vld [vmem:[%s7652_s0 + $0xe6] sm:$0xff] }
 0x102   :  { %691 = vrot.lane.b32.xlu2 %v662_v27, %s4055_s23  ;;  %951 = vrot.lane.b32.xlu0 %v905_v30, %s4060_s30 }
 0x103   :  { %604 = vrot.lane.b32.xlu1 %v551_v29, %s4061_s16 }
 0x104   :  { %v4760_v31 = vpop.permute.xlu2 %697  ;;  %v4762_v39 = vpop.permute.xlu0 %792 }
 0x105   :  { %v446_v33 = vpop.permute.xlu1 %445 }
 0x106   :  { %v492_v13 = vsel %vm123_vm1, %v490_v9, %v446_v33  ;;  %v4878_v33 = vld [vmem:[%s7652_s0 + $0xf0] sm:$0xff]  ;;  %v1262_v9 = vld [vmem:[%s7652_s0 + $0xfa] sm:$0xff] }
 0x107   :  { %v494_v18 = vsel %vm126_vm2, %v492_v13, %v4719_v17 }
 0x10a   :  { %699 = vrot.lane.b32.xlu2 %v664_v42, %s4059_s20  ;;  %842 = vrot.lane.b32.xlu0 %v789_v48, %s4061_s16  ;;  %v1020_v42 = vld [vmem:[%s7652_s0 + $0xb4] sm:$0xff] }
 0x10b   :  { %959 = vrot.lane.b32.xlu1 %v4770_v46, %s4061_s16 }
 0x10c   :  { %v603_v50 = vpop.permute.xlu2 %602  ;;  %v4781_v52 = vpop.permute.xlu0 %681 }
 0x10d   :  { %v4779_v51 = vpop.permute.xlu1 %800 }
 0x112   :  { %1030 = vrot.lane.b32.xlu2 %v903_v37, %s4057_s25  ;;  %707 = vrot.lane.b32.xlu0 %v666_v54, %s4058_s19  ;;  %v727_v54 = vsel %vm120_vm0, %v4456_v5, %v4661_v56  ;;  %v1022_v5 = vld [vmem:[%s7652_s0 + $0xb5] sm:$0xff]  ;;  %v904_v56 = vld [vmem:[%s7652_s0 + $0xa9] sm:$0x1] }
 0x113   :  { %913 = vrot.lane.b32.xlu1 %v896_v16, %s4057_s25  ;;  %v168_v8 = vpop.f32.mrf.mxu0 }
 0x114   :  { %v478_v47 = vpop.permute.xlu2 %477  ;;  %v169_v28 = vadd.f32 %v4792_v58, %v168_v8  ;;  %v587_v61 = vpop.permute.xlu0 %586  ;;  %v846_v8 = vsel %vm120_vm0, %v4532_v43, %v4762_v39 }
 0x115   :  { %v4800_v60 = vpop.permute.xlu1 %689  ;;  %v616_v10 = vsel %vm132_vm4, %v614_v6, %v587_v61  ;;  %v848_v53 = vsel %vm123_vm1, %v846_v8, %v4779_v51 }
 0x116   :  { %v174_v63 = vmax.f32 %v169_v28, 0.0  ;;  %v729_v28 = vsel %vm123_vm1, %v727_v54, %v4781_v52  ;;  %v850_v51 = vsel %vm126_vm2, %v848_v53, %v4743_v24 }
 0x117   :  { %v731_v43 = vsel %vm126_vm2, %v729_v28, %v4800_v60 }
 0x118   :  { %176 = vst.msk [vmem:[#allocation2] sm:$0xff] %vm129_vm3, %v174_v63  ;;  %v1133_v63 = vld [vmem:[%s7652_s0 + $0xc9] sm:$0xff] }
 0x11a   :  { %921 = vrot.lane.b32.xlu2 %v898_v1, %s4056_s24  ;;  %1268 = vrot.lane.b32.xlu0 %v4813_v36, %s4057_s25  ;;  %v733_v1 = vsel %vm129_vm3, %v731_v43, %v4760_v31 }
 0x11b   :  { %715 = vrot.lane.b32.xlu1 %v668_v2, %s4060_s30  ;;  %v171_v32 = vpop.f32.mrf.mxu0 }
 0x11c   :  { %v486_v57 = vpop.permute.xlu2 %485  ;;  %v462_v12 = vpop.permute.xlu0 %461 }
 0x11d   :  { %v595_v11 = vpop.permute.xlu1 %594  ;;  %v496_v59 = vsel %vm129_vm3, %v494_v18, %v462_v12  ;;  %v1260_v12 = vld [vmem:[%s7652_s0 + $0xf1] sm:$0xff] }
 0x11e   :  { %v618_v37 = vsel %vm135_vm5, %v616_v10, %v595_v11  ;;  %v1024_v10 = vld [vmem:[%s7652_s0 + $0xbe] sm:$0xff]  ;;  %v906_v11 = vld [vmem:[%s7652_s0 + $0xb2] sm:$0x1] }
 0x11f   :  { %v620_v14 = vsel %vm138_vm6, %v618_v37, %v603_v50 }
 0x120   :  { %3713 = vmatmul.msk.f32.vlgmr.msrb.gmra.mxu0 %vm144_vm7, %v620_v14 }
 0x121   :  { %1588 = vmatpush.msrb.mxu0 %v4276_v34 }
 0x122   :  { %723 = vrot.lane.b32.xlu2 %v670_v15, %s4061_s16  ;;  %1038 = vrot.lane.b32.xlu0 %v905_v30, %s4056_s24 }
 0x123   :  { %1276 = vrot.lane.b32.xlu1 %v4835_v4, %s4056_s24  ;;  %1589 = vmatpush.msrb.mxu0 %v4281_v35 }
 0x124   :  { %v4848_v19 = vpop.permute.xlu2 %556  ;;  %v817_v21 = vpop.permute.xlu0 %816 }
 0x125   :  { %v470_v20 = vpop.permute.xlu1 %469  ;;  %1590 = vmatpush.msrb.mxu0 %v4304_v38  ;;  %v852_v52 = vsel %vm129_vm3, %v850_v51, %v817_v21 }
 0x126   :  { %v498_v22 = vsel %vm132_vm4, %v496_v59, %v470_v20  ;;  %v1137_v59 = vld [vmem:[%s7652_s0 + $0xd3] sm:$0xff] }
 0x127   :  { %v500_v23 = vsel %vm135_vm5, %v498_v22, %v478_v47  ;;  %1591 = vmatpush.msrb.mxu0 %v4314_v40  ;;  %v1015_v22 = vld [vmem:[%s7652_s0 + $0xa9] sm:$0x1] }
 0x128   :  { %v502_v17 = vsel %vm138_vm6, %v500_v23, %v486_v57 }
 0x129   :  { %3712 = vmatmul.msk.f32.gmra.mxu3 %vm144_vm7, %v502_v17  ;;  %1592 = vmatpush.msrb.mxu0 %v4322_v41 }
 0x12a   :  { %1284 = vrot.lane.b32.xlu2 %v4857_v25, %s4055_s23  ;;  %929 = vrot.lane.b32.xlu0 %v900_v26, %s4055_s23  ;;  %v1017_v26 = vld [vmem:[%s7652_s0 + $0xb2] sm:$0x1] }
 0x12b   :  { %1046 = vrot.lane.b32.xlu1 %v4770_v46, %s4055_s23  ;;  %1593 = vmatpush.msrb.mxu0 %v4337_v44  ;;  %v902_v46 = vld [vmem:[%s7652_s0 + $0xa8] sm:$0x1] }
 0x12c   :  { %v4872_v27 = vpop.permute.xlu2 %564  ;;  %v706_v30 = vpop.permute.xlu0 %705 }
 0x12d   :  { %v825_v29 = vpop.permute.xlu1 %824  ;;  %1594 = vmatpush.msrb.mxu0 %v4349_v45  ;;  %v735_v2 = vsel %vm132_vm4, %v733_v1, %v706_v30 }
 0x12e   :  { %v854_v60 = vsel %vm132_vm4, %v852_v52, %v825_v29 }
 0x12f   :  { %1595 = vmatpush.msrb.mxu0 %v4361_v49 }
 0x132   :  { %1292 = vrot.lane.b32.xlu2 %v4878_v33, %s4059_s20  ;;  %937 = vrot.lane.b32.xlu0 %v902_v46, %s4059_s20  ;;  %v1019_v46 = vld [vmem:[%s7652_s0 + $0xb3] sm:$0x1] }
 0x133   :  { %1054 = vrot.lane.b32.xlu1 %v1020_v42, %s4059_s20  ;;  %v537_v42 = vld [vmem:[%s7652_s0 + $0x58] sm:$0x1] }
 0x134   :  { %v4891_v48 = vpop.permute.xlu2 %572  ;;  %v714_v16 = vpop.permute.xlu0 %713 }
 0x135   :  { %v833_v50 = vpop.permute.xlu1 %832  ;;  %v288_v47 = vpop.f32.mrf.mxu1  ;;  %v737_v0 = vsel %vm135_vm5, %v735_v2, %v714_v16 }
 0x136   :  { %v289_v61 = vadd.f32 %v4792_v58, %v288_v47  ;;  %v856_v24 = vsel %vm135_vm5, %v854_v60, %v833_v50 }
 0x138   :  { %v294_v39 = vmax.f32 %v289_v61, 0.0 }
 0x13a   :  { %1149 = vrot.lane.b32.xlu2 %v1133_v63, %s4057_s25  ;;  %296 = vst.msk [vmem:[#allocation2 + $0x9] sm:$0xff] %vm129_vm3, %v294_v39  ;;  %945 = vrot.lane.b32.xlu0 %v904_v56, %s4058_s19 }
 0x13b   :  { %1062 = vrot.lane.b32.xlu1 %v1022_v5, %s4058_s19  ;;  %v775_v5 = vld [vmem:[%s7652_s0 + $0x80] sm:$0x1] }
 0x13c   :  { %v4926_v3 = vpop.permute.xlu2 %580  ;;  %v722_v32 = vpop.permute.xlu0 %721 }
 0x13d   :  { %v841_v6 = vpop.permute.xlu1 %840  ;;  %v739_v31 = vsel %vm138_vm6, %v737_v0, %v722_v32  ;;  %v291_v7 = vpop.f32.mrf.mxu1 }
 0x13e   :  { %v858_v57 = vsel %vm138_vm6, %v856_v24, %v841_v6  ;;  %3715 = vmatmul.msk.f32.vlgmr.msrb.gmra.mxu1 %vm144_vm7, %v739_v31  ;;  %v1025_v6 = vld [vmem:[%s7652_s0 + $0xc6] sm:$0x1]  ;;  %v1023_v31 = vld [vmem:[%s7652_s0 + $0xbd] sm:$0x1] }
 0x13f   :  { %3717 = vmatmul.msk.f32.vlgmr.msrb.gmra.mxu2 %vm144_vm7, %v858_v57  ;;  %1707 = vmatpush.msrb.mxu1 %v4276_v34 }
 0x140   :  { %1826 = vmatpush.msrb.mxu2 %v4276_v34  ;;  %v908_v34 = vld [vmem:[%s7652_s0 + $0xb3] sm:$0x1] }
 0x141   :  { %1708 = vmatpush.msrb.mxu1 %v4281_v35 }
 0x142   :  { %1070 = vrot.lane.b32.xlu2 %v1024_v10, %s4060_s30  ;;  %1300 = vrot.lane.b32.xlu0 %v1260_v12, %s4058_s19 }
 0x143   :  { %953 = vrot.lane.b32.xlu1 %v906_v11, %s4060_s30  ;;  %1827 = vmatpush.msrb.mxu2 %v4281_v35  ;;  %v1135_v35 = vld [vmem:[%s7652_s0 + $0xd2] sm:$0xff] }
 0x144   :  { %v4949_v37 = vpop.permute.xlu2 %588  ;;  %v4954_v15 = vpop.permute.xlu0 %794  ;;  %1709 = vmatpush.msrb.mxu1 %v4304_v38 }
 0x145   :  { %v4952_v14 = vpop.permute.xlu1 %911  ;;  %1828 = vmatpush.msrb.mxu2 %v4304_v38  ;;  %v847_v2 = vsel %vm120_vm0, %v775_v5, %v4954_v15 }
 0x146   :  { %1710 = vmatpush.msrb.mxu1 %v4314_v40  ;;  %v965_v60 = vsel %vm120_vm0, %v4555_v55, %v4952_v14  ;;  %v1379_v55 = vld [vmem:[%s7652_s0 + $0x105] sm:$0xff] }
 0x147   :  { %1829 = vmatpush.msrb.mxu2 %v4314_v40  ;;  %v1264_v40 = vld [vmem:[%s7652_s0 + $0xfb] sm:$0xff] }
 0x148   :  { %1711 = vmatpush.msrb.mxu1 %v4322_v41 }
 0x149   :  { %1830 = vmatpush.msrb.mxu2 %v4322_v41  ;;  %v1026_v41 = vld [vmem:[%s7652_s0 + $0xbf] sm:$0xff] }
 0x14a   :  { %961 = vrot.lane.b32.xlu2 %v908_v34, %s4061_s16  ;;  %1157 = vrot.lane.b32.xlu0 %v1135_v35, %s4056_s24 }
 0x14b   :  { %1308 = vrot.lane.b32.xlu1 %v1262_v9, %s4060_s30  ;;  %1831 = vmatpush.msrb.mxu2 %v4337_v44 }
 0x14c   :  { %v4974_v38 = vpop.permute.xlu2 %943  ;;  %v4979_v18 = vpop.permute.xlu0 %802  ;;  %1712 = vmatpush.msrb.mxu1 %v4337_v44 }
 0x14d   :  { %v4977_v13 = vpop.permute.xlu1 %919  ;;  %1832 = vmatpush.msrb.mxu2 %v4349_v45  ;;  %v849_v0 = vsel %vm123_vm1, %v847_v2, %v4979_v18 }
 0x14e   :  { %1713 = vmatpush.msrb.mxu1 %v4349_v45  ;;  %v5006_v45 = vld [vmem:[%s7652_s0 + $0xdc] sm:$0xff]  ;;  %v967_v24 = vsel %vm123_vm1, %v965_v60, %v4977_v13 }
 0x14f   :  { %1833 = vmatpush.msrb.mxu2 %v4361_v49 }
 0x150   :  { %1714 = vmatpush.msrb.mxu1 %v4361_v49 }
 0x152   :  { %1316 = vrot.lane.b32.xlu2 %v1264_v40, %s4061_s16  ;;  %1078 = vrot.lane.b32.xlu0 %v1026_v41, %s4061_s16  ;;  %v5121_v41 = vld [vmem:[%s7653_s1 + $0x38] sm:$0xff] }
 0x153   :  { %1165 = vrot.lane.b32.xlu1 %v1137_v59, %s4055_s23  ;;  %v1381_v59 = vld [vmem:[%s7652_s0 + $0x10e] sm:$0xff] }
 0x154   :  { %v4998_v44 = vpop.permute.xlu2 %834  ;;  %v811_v21 = vpop.permute.xlu0 %810 }
 0x155   :  { %v928_v20 = vpop.permute.xlu1 %927  ;;  %v851_v57 = vsel %vm126_vm2, %v849_v0, %v811_v21  ;;  %v1134_v0 = vld [vmem:[%s7652_s0 + $0xd1] sm:$0x1] }
 0x156   :  { %v969_v32 = vsel %vm126_vm2, %v967_v24, %v928_v20  ;;  %v5133_v20 = vld [vmem:[%s7653_s1 + $0x30] sm:$0xff] }
 0x15a   :  { %1181 = vrot.lane.b32.xlu2 %v4813_v36, %s4058_s19  ;;  %1173 = vrot.lane.b32.xlu0 %v5006_v45, %s4059_s20 }
 0x15b   :  { %1032 = vrot.lane.b32.xlu1 %v1015_v22, %s4057_s25 }
 0x15c   :  { %v5013_v49 = vpop.permute.xlu2 %691  ;;  %v819_v17 = vpop.permute.xlu0 %818 }
 0x15d   :  { %v936_v23 = vpop.permute.xlu1 %935  ;;  %v853_v10 = vsel %vm129_vm3, %v851_v57, %v819_v17 }
 0x15e   :  { %v971_v7 = vsel %vm129_vm3, %v969_v32, %v936_v23 }
 0x162   :  { %1189 = vrot.lane.b32.xlu2 %v4835_v4, %s4060_s30  ;;  %1387 = vrot.lane.b32.xlu0 %v1260_v12, %s4057_s25  ;;  %v609_v4 = vsel %vm120_vm0, %v537_v42, %v4848_v19  ;;  %v5049_v19 = vld [vmem:[%s7652_s0 + $0x104] sm:$0xff] }
 0x163   :  { %1040 = vrot.lane.b32.xlu1 %v1017_v26, %s4056_s24  ;;  %v611_v8 = vsel %vm123_vm1, %v609_v4, %v4872_v27  ;;  %v5145_v26 = vld [vmem:[%s7653_s1 + $0x28] sm:$0xff]  ;;  %v5153_v42 = vld [vmem:[%s7653_s1 + $0x20] sm:$0xff]  ;;  %v5170_v4 = vld [vmem:[%s7653_s1 + $0x10] sm:$0xff] }
 0x164   :  { %v5022_v36 = vpop.permute.xlu2 %699  ;;  %v5024_v30 = vpop.permute.xlu0 %675  ;;  %v613_v61 = vsel %vm126_vm2, %v611_v8, %v4891_v48 }
 0x165   :  { %v827_v29 = vpop.permute.xlu1 %826  ;;  %v615_v27 = vsel %vm129_vm3, %v613_v61, %v4926_v3  ;;  %v5194_v61 = vld [vmem:[%s7652_s0 + $0x119] sm:$0xff] }
 0x166   :  { %v617_v48 = vsel %vm132_vm4, %v615_v27, %v4949_v37  ;;  %v855_v11 = vsel %vm132_vm4, %v853_v10, %v827_v29  ;;  %v973_v37 = vsel %vm132_vm4, %v971_v7, %v4974_v38  ;;  %v1383_v38 = vld [vmem:[%s7652_s0 + $0x10f] sm:$0xff]  ;;  %v5206_v27 = vld [vmem:[%s7652_s0 + $0x118] sm:$0xff]  ;;  %v1263_v10 = vld [vmem:[%s7652_s0 + $0x102] sm:$0x1] }
 0x167   :  { %v857_v35 = vsel %vm135_vm5, %v855_v11, %v4998_v44  ;;  %v656_v44 = vld [vmem:[%s7652_s0 + $0x6c] sm:$0x1]  ;;  %v1136_v11 = vld [vmem:[%s7652_s0 + $0xda] sm:$0x1] }
 0x168   :  { %v728_v22 = vsel %vm120_vm0, %v656_v44, %v5024_v30 }
 0x169   :  { %v407_v50 = vpop.f32.mrf.mxu2 }
 0x16a   :  { %1197 = vrot.lane.b32.xlu2 %v4857_v25, %s4061_s16  ;;  %v408_v16 = vadd.f32 %v4792_v58, %v407_v50  ;;  %1395 = vrot.lane.b32.xlu0 %v1262_v9, %s4056_s24  ;;  %v1021_v25 = vld [vmem:[%s7652_s0 + $0xbc] sm:$0x1] }
 0x16b   :  { %1048 = vrot.lane.b32.xlu1 %v1019_v46, %s4055_s23  ;;  %v5161_v46 = vld [vmem:[%s7653_s1 + $0x18] sm:$0xff] }
 0x16c   :  { %v5039_v54 = vpop.permute.xlu2 %1030  ;;  %v413_v47 = vmax.f32 %v408_v16, 0.0  ;;  %v597_v28 = vpop.permute.xlu0 %596 }
 0x16d   :  { %v5043_v53 = vpop.permute.xlu1 %683  ;;  %v619_v39 = vsel %vm135_vm5, %v617_v48, %v597_v28 }
 0x16e   :  { %415 = vst.msk [vmem:[#allocation2 + $0x12] sm:$0xff] %vm129_vm3, %v413_v47  ;;  %v730_v29 = vsel %vm123_vm1, %v728_v22, %v5043_v53  ;;  %v5181_v53 = vld [vmem:[%s7653_s1 + $0x8] sm:$0xff] }
 0x16f   :  { %v732_v30 = vsel %vm126_vm2, %v730_v29, %v5013_v49 }
 0x170   :  { %v734_v49 = vsel %vm129_vm3, %v732_v30, %v5022_v36  ;;  %v5189_v36 = vld [vmem:[%s7652_s0 + $0x122] sm:$0xff] }
 0x171   :  { %v526_v63 = vpop.f32.mrf.mxu3 }
 0x172   :  { %1411 = vrot.lane.b32.xlu2 %v5049_v19, %s4059_s20  ;;  %v527_v43 = vadd.f32 %v4792_v58, %v526_v63  ;;  %1403 = vrot.lane.b32.xlu0 %v1264_v40, %s4055_s23  ;;  %v1027_v40 = vld [vmem:[%s7652_s0 + $0xc7] sm:$0x1] }
 0x173   :  { %1056 = vrot.lane.b32.xlu1 %v1021_v25, %s4059_s20  ;;  %v5199_v63 = vld [vmem:[%s7653_s1] sm:$0xff] }
 0x174   :  { %v5068_v56 = vpop.permute.xlu2 %921  ;;  %v532_v51 = vmax.f32 %v527_v43, 0.0  ;;  %v952_v1 = vpop.permute.xlu0 %951 }
 0x175   :  { %v605_v52 = vpop.permute.xlu1 %604  ;;  %v975_v15 = vsel %vm135_vm5, %v973_v37, %v952_v1  ;;  %v894_v37 = vld [vmem:[%s7652_s0 + $0x94] sm:$0x1] }
 0x176   :  { %v621_v3 = vsel %vm138_vm6, %v619_v39, %v605_v52  ;;  %534 = vst.msk [vmem:[#allocation2 + $0x1b] sm:$0xff] %vm129_vm3, %v532_v51  ;;  %v1255_v39 = vld [vmem:[%s7652_s0 + $0xee] sm:$0x1]  ;;  %v1253_v51 = vld [vmem:[%s7652_s0 + $0xe5] sm:$0x1] }
 0x177   :  { %3714 = vmatmul.msk.f32.gmra.mxu0 %vm144_vm7, %v621_v3  ;;  %v5227_v52 = vld [vmem:[%s7652_s0 + $0x123] sm:$0xff] }
 0x179   :  { %v410_v12 = vpop.f32.mrf.mxu2 }
 0x17a   :  { %1072 = vrot.lane.b32.xlu2 %v1025_v6, %s4060_s30  ;;  %1064 = vrot.lane.b32.xlu0 %v1023_v31, %s4058_s19  ;;  %v1259_v6 = vld [vmem:[%s7652_s0 + $0xf8] sm:$0x1]  ;;  %v1261_v12 = vld [vmem:[%s7652_s0 + $0xf9] sm:$0x1] }
 0x17b   :  { %1419 = vrot.lane.b32.xlu1 %v1379_v55, %s4058_s19 }
 0x17c   :  { %v724_v14 = vpop.permute.xlu2 %723  ;;  %v843_v9 = vpop.permute.xlu0 %842 }
 0x17d   :  { %v960_v34 = vpop.permute.xlu1 %959  ;;  %v859_v18 = vsel %vm138_vm6, %v857_v35, %v843_v9 }
 0x17e   :  { %v977_v13 = vsel %vm138_vm6, %v975_v15, %v960_v34  ;;  %3718 = vmatmul.msk.f32.gmra.mxu2 %vm144_vm7, %v859_v18  ;;  %v1265_v18 = vld [vmem:[%s7652_s0 + $0x103] sm:$0x1] }
 0x17f   :  { %3719 = vmatmul.msk.f32.vlgmr.msrb.gmra.mxu3 %vm144_vm7, %v977_v13  ;;  %v1140_v13 = vld [vmem:[%s7652_s0 + $0xe4] sm:$0x1] }
 0x180   :  { %1945 = vmatpush.msrb.mxu3 %v5121_v41 }
 0x182   :  { %1435 = vrot.lane.b32.xlu2 %v1383_v38, %s4061_s16  ;;  %1427 = vrot.lane.b32.xlu0 %v1381_v59, %s4060_s30 }
 0x183   :  { %1080 = vrot.lane.b32.xlu1 %v1027_v40, %s4061_s16  ;;  %1946 = vmatpush.msrb.mxu3 %v5133_v20 }
 0x184   :  { %v5136_v21 = vpop.permute.xlu2 %1284  ;;  %v708_v17 = vpop.permute.xlu0 %707 }
 0x185   :  { %v5140_v23 = vpop.permute.xlu1 %913  ;;  %1947 = vmatpush.msrb.mxu3 %v5145_v26  ;;  %v736_v16 = vsel %vm132_vm4, %v734_v49, %v708_v17 }
 0x186   :  { %v966_v35 = vsel %vm120_vm0, %v894_v37, %v5140_v23 }
 0x187   :  { %1948 = vmatpush.msrb.mxu3 %v5153_v42  ;;  %v968_v40 = vsel %vm123_vm1, %v966_v35, %v5068_v56  ;;  %v1146_v35 = vld [vmem:[%s7652_s0 + $0xef] sm:$0x1] }
 0x189   :  { %1949 = vmatpush.msrb.mxu3 %v5161_v46 }
 0x18a   :  { %1522 = vrot.lane.b32.xlu2 %v1383_v38, %s4055_s23  ;;  %1506 = vrot.lane.b32.xlu0 %v1379_v55, %s4057_s25  ;;  %v1257_v55 = vld [vmem:[%s7652_s0 + $0xef] sm:$0x1]  ;;  %v1138_v38 = vld [vmem:[%s7652_s0 + $0xdb] sm:$0x1] }
 0x18b   :  { %1514 = vrot.lane.b32.xlu1 %v1381_v59, %s4056_s24  ;;  %1950 = vmatpush.msrb.mxu3 %v5170_v4 }
 0x18c   :  { %v5175_v50 = vpop.permute.xlu2 %1292  ;;  %v1269_v47 = vpop.permute.xlu0 %1268 }
 0x18d   :  { %v716_v8 = vpop.permute.xlu1 %715  ;;  %1951 = vmatpush.msrb.mxu3 %v5181_v53  ;;  %v1322_v23 = vsel %vm120_vm0, %v5006_v45, %v1269_v47  ;;  %v1142_v45 = vld [vmem:[%s7652_s0 + $0xe5] sm:$0x1] }
 0x18e   :  { %v738_v28 = vsel %vm135_vm5, %v736_v16, %v716_v8  ;;  %v5295_v8 = vld [vmem:[%s7652_s0 + $0x12d] sm:$0xff] }
 0x18f   :  { %v740_v25 = vsel %vm138_vm6, %v738_v28, %v724_v14  ;;  %1952 = vmatpush.msrb.mxu3 %v5199_v63  ;;  %v1372_v28 = vld [vmem:[%s7652_s0 + $0xf9] sm:$0x1] }
 0x190   :  { %3716 = vmatmul.msk.f32.gmra.mxu1 %vm144_vm7, %v740_v25 }
 0x192   :  { %1546 = vrot.lane.b32.xlu2 %v5189_v36, %s4060_s30  ;;  %1530 = vrot.lane.b32.xlu0 %v5206_v27, %s4059_s20 }
 0x193   :  { %1538 = vrot.lane.b32.xlu1 %v5194_v61, %s4058_s19 }
 0x194   :  { %v5214_v5 = vpop.permute.xlu2 %1149  ;;  %v5216_v48 = vpop.permute.xlu0 %1038 }
 0x195   :  { %v1277_v43 = vpop.permute.xlu1 %1276 }
 0x196   :  { %v1324_v56 = vsel %vm123_vm1, %v1322_v23, %v1277_v43 }
 0x197   :  { %v1326_v47 = vsel %vm126_vm2, %v1324_v56, %v5136_v21  ;;  %v1084_v21 = vsel %vm120_vm0, %v4674_v62, %v5039_v54  ;;  %v1144_v54 = vld [vmem:[%s7652_s0 + $0xee] sm:$0x1]  ;;  %v1378_v56 = vld [vmem:[%s7652_s0 + $0x10c] sm:$0x1] }
 0x198   :  { %v1328_v25 = vsel %vm129_vm3, %v1326_v47, %v5175_v50  ;;  %v1736_v47 = vld [vmem:[%s7652_s0 + $0x141] sm:$0xff] }
 0x19a   :  { %1278 = vrot.lane.b32.xlu2 %v1255_v39, %s4056_s24  ;;  %1554 = vrot.lane.b32.xlu0 %v5227_v52, %s4061_s16 }
 0x19b   :  { %1270 = vrot.lane.b32.xlu1 %v1253_v51, %s4057_s25 }
 0x19c   :  { %v5233_v1 = vpop.permute.xlu2 %1070  ;;  %v930_v2 = vpop.permute.xlu0 %929 }
 0x19d   :  { %v5235_v60 = vpop.permute.xlu1 %1046  ;;  %v645_v3 = vpop.f32.mrf.mxu0  ;;  %v970_v59 = vsel %vm126_vm2, %v968_v40, %v930_v2 }
 0x19e   :  { %v646_v24 = vadd.f32 %v4792_v58, %v645_v3 }
 0x1a0   :  { %v651_v32 = vmax.f32 %v646_v24, 0.0 }
 0x1a2   :  { %1151 = vrot.lane.b32.xlu2 %v1134_v0, %s4057_s25  ;;  %653 = vst.msk [vmem:[#allocation2 + $0x24] sm:$0xff] %vm129_vm3, %v651_v32  ;;  %1286 = vrot.lane.b32.xlu0 %v1257_v55, %s4055_s23  ;;  %v5324_v32 = vld [vmem:[%s7652_s0 + $0x136] sm:$0xff] }
 0x1a3   :  { %1294 = vrot.lane.b32.xlu1 %v1259_v6, %s4059_s20  ;;  %v1086_v6 = vsel %vm123_vm1, %v1084_v21, %v5216_v48 }
 0x1a4   :  { %v962_v57 = vpop.permute.xlu2 %961  ;;  %v938_v7 = vpop.permute.xlu0 %937  ;;  %v1088_v62 = vsel %vm126_vm2, %v1086_v6, %v5235_v60  ;;  %v1491_v6 = vld [vmem:[%s7652_s0 + $0x10d] sm:$0x1] }
 0x1a5   :  { %v1055_v31 = vpop.permute.xlu1 %1054  ;;  %v972_v44 = vsel %vm129_vm3, %v970_v59, %v938_v7 }
 0x1a6   :  { %v1090_v48 = vsel %vm129_vm3, %v1088_v62, %v1055_v31 }
 0x1aa   :  { %1310 = vrot.lane.b32.xlu2 %v1263_v10, %s4060_s30  ;;  %1302 = vrot.lane.b32.xlu0 %v1261_v12, %s4058_s19 }
 0x1ab   :  { %1159 = vrot.lane.b32.xlu1 %v1136_v11, %s4056_s24 }
 0x1ac   :  { %v529_v14 = vpop.f32.mrf.mxu3  ;;  %v1317_v15 = vpop.permute.xlu2 %1316 }
 0x1ad   :  { %v1063_v34 = vpop.permute.xlu1 %1062  ;;  %v946_v9 = vpop.permute.xlu0 %945 }
 0x1ae   :  { %v974_v17 = vsel %vm132_vm4, %v972_v44, %v946_v9  ;;  %v1092_v7 = vsel %vm132_vm4, %v1090_v48, %v1063_v34  ;;  %v5351_v34 = vld [vmem:[%s7652_s0 + $0x137] sm:$0xff]  ;;  %v1376_v9 = vld [vmem:[%s7652_s0 + $0x103] sm:$0x1] }
 0x1af   :  { %v1094_v31 = vsel %vm135_vm5, %v1092_v7, %v5233_v1  ;;  %v1131_v1 = vld [vmem:[%s7652_s0 + $0xc8] sm:$0xff] }
 0x1b2   :  { %1175 = vrot.lane.b32.xlu2 %v1140_v13, %s4059_s20  ;;  %1167 = vrot.lane.b32.xlu0 %v1138_v38, %s4055_s23  ;;  %v1203_v13 = vsel %vm120_vm0, %v1131_v1, %v5214_v5  ;;  %v1380_v5 = vld [vmem:[%s7652_s0 + $0x10d] sm:$0x1] }
 0x1b3   :  { %1318 = vrot.lane.b32.xlu1 %v1265_v18, %s4061_s16 }
 0x1b4   :  { %v5284_v22 = vpop.permute.xlu2 %1181 }
 0x1b5   :  { %v954_v29 = vpop.permute.xlu1 %953  ;;  %v1301_v30 = vpop.permute.xlu0 %1300 }
 0x1b6   :  { %v976_v49 = vsel %vm135_vm5, %v974_v17, %v954_v29  ;;  %v1330_v51 = vsel %vm132_vm4, %v1328_v25, %v1301_v30  ;;  %v5386_v30 = vld [vmem:[%s7652_s0 + $0x140] sm:$0xff] }
 0x1b7   :  { %v978_v16 = vsel %vm138_vm6, %v976_v49, %v962_v57  ;;  %v1374_v57 = vld [vmem:[%s7652_s0 + $0x102] sm:$0x1] }
 0x1b8   :  { %3720 = vmatmul.msk.f32.gmra.mxu3 %vm144_vm7, %v978_v16 }
 0x1ba   :  { %1744 = vrot.lane.b32.xlu2 %v5295_v8, %s4057_s25  ;;  %1183 = vrot.lane.b32.xlu0 %v1142_v45, %s4058_s19  ;;  %v1382_v45 = vld [vmem:[%s7652_s0 + $0x116] sm:$0x1] }
 0x1bb   :  { %1389 = vrot.lane.b32.xlu1 %v1372_v28, %s4057_s25  ;;  %v764_v43 = vpop.f32.mrf.mxu1 }
 0x1bc   :  { %v1190_v39 = vpop.permute.xlu2 %1189  ;;  %v765_v2 = vadd.f32 %v4792_v58, %v764_v43  ;;  %v5432_v43 = vld [vmem:[%s7652_s0 + $0x12c] sm:$0xff] }
 0x1bd   :  { %v1309_v3 = vpop.permute.xlu1 %1308  ;;  %v1158_v24 = vpop.permute.xlu0 %1157 }
 0x1be   :  { %v1332_v0 = vsel %vm135_vm5, %v1330_v51, %v1309_v3  ;;  %v770_v55 = vmax.f32 %v765_v2, 0.0  ;;  %v1205_v18 = vsel %vm123_vm1, %v1203_v13, %v1158_v24 }
 0x1bf   :  { %v1334_v50 = vsel %vm138_vm6, %v1332_v0, %v1317_v15 }
 0x1c0   :  { %3725 = vmatmul.msk.f32.vlgmr.msra.gmra.mxu2 %vm144_vm7, %v1334_v50  ;;  %772 = vst.msk [vmem:[#allocation2 + $0x2d] sm:$0xff] %vm129_vm3, %v770_v55 }
 0x1c2   :  { %v883_v10 = vpop.f32.mrf.mxu2  ;;  %1752 = vrot.lane.b32.xlu2 %v5324_v32, %s4056_s24  ;;  %1191 = vrot.lane.b32.xlu0 %v1144_v54, %s4060_s30 }
 0x1c3   :  { %1397 = vrot.lane.b32.xlu1 %v1374_v57, %s4056_s24  ;;  %v884_v60 = vadd.f32 %v4792_v58, %v883_v10 }
 0x1c4   :  { %v1198_v11 = vpop.permute.xlu2 %1197 }
 0x1c5   :  { %v889_v12 = vmax.f32 %v884_v60, 0.0  ;;  %v1166_v37 = vpop.permute.xlu1 %1165  ;;  %v1079_v14 = vpop.permute.xlu0 %1078 }
 0x1c6   :  { %v1096_v15 = vsel %vm138_vm6, %v1094_v31, %v1079_v14  ;;  %v1207_v40 = vsel %vm126_vm2, %v1205_v18, %v1166_v37 }
 0x1c7   :  { %891 = vst.msk [vmem:[#allocation2 + $0x36] sm:$0xff] %vm129_vm3, %v889_v12  ;;  %3721 = vmatmul.msk.f32.vlgmr.msra.gmra.mxu0 %vm144_vm7, %v1096_v15  ;;  %v1493_v12 = vld [vmem:[%s7652_s0 + $0x116] sm:$0x1] }
 0x1c8   :  { %2064 = vmatpush.msra.mxu0 %v5121_v41 }
 0x1ca   :  { %1760 = vrot.lane.b32.xlu2 %v5351_v34, %s4055_s23  ;;  %1199 = vrot.lane.b32.xlu0 %v1146_v35, %s4061_s16 }
 0x1cb   :  { %1405 = vrot.lane.b32.xlu1 %v1376_v9, %s4055_s23  ;;  %2065 = vmatpush.msra.mxu0 %v5133_v20  ;;  %v1495_v9 = vld [vmem:[%s7652_s0 + $0x117] sm:$0x1] }
 0x1cc   :  { %v5371_v38 = vpop.permute.xlu2 %1411 }
 0x1cd   :  { %v1033_v59 = vpop.permute.xlu1 %1032  ;;  %v1174_v44 = vpop.permute.xlu0 %1173  ;;  %2066 = vmatpush.msra.mxu0 %v5145_v26 }
 0x1ce   :  { %v1209_v23 = vsel %vm129_vm3, %v1207_v40, %v1174_v44 }
 0x1cf   :  { %v1211_v17 = vsel %vm132_vm4, %v1209_v23, %v5284_v22  ;;  %2067 = vmatpush.msra.mxu0 %v5153_v42  ;;  %v1499_v23 = vld [vmem:[%s7652_s0 + $0x121] sm:$0x1] }
 0x1d0   :  { %v1213_v29 = vsel %vm135_vm5, %v1211_v17, %v1190_v39 }
 0x1d1   :  { %v1215_v49 = vsel %vm138_vm6, %v1213_v29, %v1198_v11  ;;  %2068 = vmatpush.msra.mxu0 %v5161_v46 }
 0x1d2   :  { %3723 = vmatmul.msk.f32.vlgmr.msra.gmra.mxu1 %vm144_vm7, %v1215_v49  ;;  %1421 = vrot.lane.b32.xlu2 %v1380_v5, %s4058_s19 }
 0x1d3   :  { %1768 = vrot.lane.b32.xlu1 %v5386_v30, %s4059_s20  ;;  %1413 = vrot.lane.b32.xlu0 %v1378_v56, %s4059_s20 }
 0x1d4   :  { %v1073_v22 = vpop.permute.xlu2 %1072  ;;  %2069 = vmatpush.msra.mxu0 %v5170_v4  ;;  %2183 = vmatpush.msra.mxu1 %v5121_v41 }
 0x1d5   :  { %v1041_v16 = vpop.permute.xlu1 %1040  ;;  %v1388_v28 = vpop.permute.xlu0 %1387 }
 0x1d6   :  { %2070 = vmatpush.msra.mxu0 %v5181_v53  ;;  %2184 = vmatpush.msra.mxu1 %v5133_v20  ;;  %v1441_v24 = vsel %vm120_vm0, %v4878_v33, %v1388_v28  ;;  %v1857_v28 = vld [vmem:[%s7652_s0 + $0x15e] sm:$0xff] }
 0x1d8   :  { %2071 = vmatpush.msra.mxu0 %v5199_v63  ;;  %2185 = vmatpush.msra.mxu1 %v5145_v26  ;;  %v1384_v26 = vld [vmem:[%s7652_s0 + $0x117] sm:$0x1] }
 0x1da   :  { %1429 = vrot.lane.b32.xlu2 %v1382_v45, %s4060_s30  ;;  %2186 = vmatpush.msra.mxu1 %v5153_v42  ;;  %v1738_v42 = vld [vmem:[%s7652_s0 + $0x14a] sm:$0xff] }
 0x1db   :  { %1776 = vrot.lane.b32.xlu1 %v1736_v47, %s4058_s19  ;;  %1625 = vrot.lane.b32.xlu0 %v5194_v61, %s4057_s25  ;;  %v1501_v45 = vld [vmem:[%s7652_s0 + $0x12a] sm:$0x1] }
 0x1dc   :  { %v1436_v41 = vpop.permute.xlu2 %1435  ;;  %2187 = vmatpush.msra.mxu1 %v5161_v46 }
 0x1dd   :  { %v1049_v20 = vpop.permute.xlu1 %1048  ;;  %v1396_v25 = vpop.permute.xlu0 %1395 }
 0x1de   :  { %2188 = vmatpush.msra.mxu1 %v5170_v4  ;;  %v1443_v0 = vsel %vm123_vm1, %v1441_v24, %v1396_v25 }
 0x1e0   :  { %2189 = vmatpush.msra.mxu1 %v5181_v53  ;;  %v1740_v53 = vld [vmem:[%s7652_s0 + $0x14b] sm:$0xff] }
 0x1e2   :  { %1437 = vrot.lane.b32.xlu2 %v1384_v26, %s4061_s16  ;;  %2190 = vmatpush.msra.mxu1 %v5199_v63  ;;  %v1013_v63 = vld [vmem:[%s7652_s0 + $0xa8] sm:$0x1] }
 0x1e3   :  { %1784 = vrot.lane.b32.xlu1 %v1738_v42, %s4060_s30  ;;  %1633 = vrot.lane.b32.xlu0 %v5189_v36, %s4056_s24  ;;  %v1085_v2 = vsel %vm120_vm0, %v1013_v63, %v1033_v59 }
 0x1e4   :  { %v1523_v46 = vpop.permute.xlu2 %1522  ;;  %v1087_v3 = vsel %vm123_vm1, %v1085_v2, %v1041_v16 }
 0x1e5   :  { %v1057_v4 = vpop.permute.xlu1 %1056  ;;  %v1404_v61 = vpop.permute.xlu0 %1403  ;;  %v1089_v21 = vsel %vm126_vm2, %v1087_v3, %v1049_v20 }
 0x1e6   :  { %v1445_v55 = vsel %vm126_vm2, %v1443_v0, %v1404_v61 }
 0x1e7   :  { %v1447_v33 = vsel %vm129_vm3, %v1445_v55, %v5371_v38  ;;  %v1978_v55 = vld [vmem:[%s7652_s0 + $0x173] sm:$0xff] }
 0x1ea   :  { %1649 = vrot.lane.b32.xlu2 %v5432_v43, %s4059_s20 }
 0x1eb   :  { %1792 = vrot.lane.b32.xlu1 %v1740_v53, %s4061_s16  ;;  %1641 = vrot.lane.b32.xlu0 %v5227_v52, %s4055_s23  ;;  %v1091_v52 = vsel %vm129_vm3, %v1089_v21, %v1057_v4  ;;  %v1503_v4 = vld [vmem:[%s7652_s0 + $0x12b] sm:$0x1] }
 0x1ec   :  { %v1547_v36 = vpop.permute.xlu2 %1546 }
 0x1ed   :  { %v1420_v39 = vpop.permute.xlu1 %1419  ;;  %v1065_v51 = vpop.permute.xlu0 %1064 }
 0x1ee   :  { %v1093_v50 = vsel %vm132_vm4, %v1091_v52, %v1065_v51  ;;  %v1449_v54 = vsel %vm132_vm4, %v1447_v33, %v1420_v39  ;;  %v5553_v51 = vld [vmem:[%s7652_s0 + $0x168] sm:$0xff] }
 0x1ef   :  { %v1095_v10 = vsel %vm135_vm5, %v1093_v50, %v1073_v22  ;;  %v1976_v50 = vld [vmem:[%s7652_s0 + $0x172] sm:$0xff]  ;;  %v1974_v33 = vld [vmem:[%s7652_s0 + $0x169] sm:$0xff] }
 0x1f2   :  { %1863 = vrot.lane.b32.xlu2 %v1736_v47, %s4057_s25  ;;  %v1855_v47 = vld [vmem:[%s7652_s0 + $0x155] sm:$0xff] }
 0x1f3   :  { %1657 = vrot.lane.b32.xlu1 %v5295_v8, %s4058_s19  ;;  %1508 = vrot.lane.b32.xlu0 %v1491_v6, %s4057_s25 }
 0x1f4   :  { %v648_v57 = vpop.f32.mrf.mxu0  ;;  %v5463_v62 = vpop.permute.xlu2 %1278 }
 0x1f5   :  { %v1081_v48 = vpop.permute.xlu1 %1080  ;;  %v1428_v7 = vpop.permute.xlu0 %1427 }
 0x1f6   :  { %v1451_v60 = vsel %vm135_vm5, %v1449_v54, %v1428_v7  ;;  %v1097_v11 = vsel %vm138_vm6, %v1095_v10, %v1081_v48  ;;  %v1614_v48 = vld [vmem:[%s7652_s0 + $0x12b] sm:$0x1]  ;;  %v1612_v7 = vld [vmem:[%s7652_s0 + $0x12a] sm:$0x1]  ;;  %v1610_v10 = vld [vmem:[%s7652_s0 + $0x121] sm:$0x1] }
 0x1f7   :  { %v1453_v8 = vsel %vm138_vm6, %v1451_v60, %v1436_v41  ;;  %3722 = vmatmul.msk.f32.gmra.mxu0 %vm144_vm7, %v1097_v11  ;;  %v1132_v60 = vld [vmem:[%s7652_s0 + $0xd0] sm:$0x1] }
 0x1f8   :  { %3727 = vmatmul.msk.f32.vlgmr.msra.gmra.mxu3 %vm144_vm7, %v1453_v8 }
 0x1fa   :  { %1871 = vrot.lane.b32.xlu2 %v1738_v42, %s4056_s24  ;;  %v1251_v42 = vld [vmem:[%s7652_s0 + $0xe4] sm:$0x1] }
 0x1fb   :  { %1665 = vrot.lane.b32.xlu1 %v5324_v32, %s4060_s30  ;;  %1516 = vrot.lane.b32.xlu0 %v1493_v12, %s4056_s24 }
 0x1fc   :  { %v5479_v37 = vpop.permute.xlu2 %1151 }
 0x1fd   :  { %v1515_v31 = vpop.permute.xlu1 %1514  ;;  %v1507_v14 = vpop.permute.xlu0 %1506 }
 0x1fe   :  { %v1560_v15 = vsel %vm120_vm0, %v5049_v19, %v1507_v14 }
 0x1ff   :  { %v1562_v13 = vsel %vm123_vm1, %v1560_v15, %v1515_v31  ;;  %v1204_v31 = vsel %vm120_vm0, %v1132_v60, %v5479_v37  ;;  %v1620_v15 = vld [vmem:[%s7652_s0 + $0x13e] sm:$0x1] }
 0x200   :  { %v1564_v59 = vsel %vm126_vm2, %v1562_v13, %v1523_v46  ;;  %v1859_v46 = vld [vmem:[%s7652_s0 + $0x15f] sm:$0xff] }
 0x201   :  { %v886_v1 = vpop.f32.mrf.mxu2 }
 0x202   :  { %v1002_v35 = vpop.f32.mrf.mxu3  ;;  %1879 = vrot.lane.b32.xlu2 %v1740_v53, %s4055_s23  ;;  %v1618_v1 = vld [vmem:[%s7652_s0 + $0x135] sm:$0x1] }
 0x203   :  { %v1003_v32 = vadd.f32 %v4792_v58, %v1002_v35  ;;  %1673 = vrot.lane.b32.xlu1 %v5351_v34, %s4061_s16  ;;  %1524 = vrot.lane.b32.xlu0 %v1495_v9, %s4055_s23  ;;  %v5501_v58 = vld [vmem:[%s7652_s0 + $0x154] sm:$0xff]  ;;  %v1497_v34 = vld [vmem:[%s7652_s0 + $0x120] sm:$0x1] }
 0x204   :  { %v1311_v18 = vpop.permute.xlu2 %1310  ;;  %v1616_v35 = vld [vmem:[%s7652_s0 + $0x134] sm:$0x1] }
 0x205   :  { %v1008_v38 = vmax.f32 %v1003_v32, 0.0  ;;  %v1539_v19 = vpop.permute.xlu1 %1538  ;;  %v1531_v40 = vpop.permute.xlu0 %1530 }
 0x206   :  { %v1566_v44 = vsel %vm129_vm3, %v1564_v59, %v1531_v40 }
 0x207   :  { %1010 = vst.msk [vmem:[#allocation2 + $0x3f] sm:$0xff] %vm129_vm3, %v1008_v38  ;;  %v1568_v17 = vsel %vm132_vm4, %v1566_v44, %v1539_v19 }
 0x208   :  { %v1570_v56 = vsel %vm135_vm5, %v1568_v17, %v1547_v36 }
 0x20a   :  { %1540 = vrot.lane.b32.xlu2 %v1499_v23, %s4058_s19  ;;  %v1370_v23 = vld [vmem:[%s7652_s0 + $0xf8] sm:$0x1] }
 0x20b   :  { %1887 = vrot.lane.b32.xlu1 %v5501_v58, %s4059_s20  ;;  %1532 = vrot.lane.b32.xlu0 %v1497_v34, %s4059_s20  ;;  %v1622_v34 = vld [vmem:[%s7652_s0 + $0x13f] sm:$0x1] }
 0x20c   :  { %v5511_v5 = vpop.permute.xlu2 %1175 }
 0x20d   :  { %v1271_v29 = vpop.permute.xlu1 %1270  ;;  %v1555_v49 = vpop.permute.xlu0 %1554 }
 0x20e   :  { %v1572_v22 = vsel %vm138_vm6, %v1570_v56, %v1555_v49  ;;  %v767_v16 = vpop.f32.mrf.mxu1  ;;  %v1323_v61 = vsel %vm120_vm0, %v1251_v42, %v1271_v29 }
 0x20f   :  { %3729 = vmatmul.msk.f32.vlgmr.msrb.gmra.mxu0 %vm144_vm7, %v1572_v22  ;;  %v1325_v53 = vsel %vm123_vm1, %v1323_v61, %v5463_v62 }
 0x212   :  { %1903 = vrot.lane.b32.xlu2 %v1857_v28, %s4060_s30 }
 0x213   :  { %1548 = vrot.lane.b32.xlu1 %v1501_v45, %s4060_s30  ;;  %1895 = vrot.lane.b32.xlu0 %v1855_v47, %s4058_s19 }
 0x214   :  { %v1745_v41 = vpop.permute.xlu2 %1744 }
 0x215   :  { %v5530_v20 = vsel %vm120_vm0, %v5432_v43, %v1745_v41  ;;  %v1295_v25 = vpop.permute.xlu1 %1294  ;;  %v1287_v26 = vpop.permute.xlu0 %1286 }
 0x216   :  { %v1327_v39 = vsel %vm126_vm2, %v1325_v53, %v1287_v26  ;;  %v1729_v26 = vld [vmem:[%s7652_s0 + $0x135] sm:$0x1] }
 0x217   :  { %v1329_v2 = vsel %vm129_vm3, %v1327_v39, %v1295_v25  ;;  %v2095_v39 = vld [vmem:[%s7652_s0 + $0x186] sm:$0xff] }
 0x21a   :  { %1982 = vrot.lane.b32.xlu2 %v1855_v47, %s4057_s25 }
 0x21b   :  { %1911 = vrot.lane.b32.xlu1 %v1859_v46, %s4061_s16  ;;  %1556 = vrot.lane.b32.xlu0 %v1503_v4, %s4061_s16 }
 0x21c   :  { %v5545_v43 = vpop.permute.xlu2 %1752 }
 0x21d   :  { %v1160_v63 = vpop.permute.xlu1 %1159  ;;  %v1303_v36 = vpop.permute.xlu0 %1302 }
 0x21e   :  { %v1331_v3 = vsel %vm132_vm4, %v1329_v2, %v1303_v36  ;;  %v1206_v14 = vsel %vm123_vm1, %v1204_v31, %v1160_v63 }
 0x21f   :  { %v1333_v6 = vsel %vm135_vm5, %v1331_v3, %v1311_v18  ;;  %v5615_v18 = vld [vmem:[%s7654_s2] ss:$0 sm:$0xff]  ;;  %v1731_v3 = vld [vmem:[%s7652_s0 + $0x13e] sm:$0x1] }
 0x222   :  { %2006 = vrot.lane.b32.xlu2 %v5553_v51, %s4059_s20 }
 0x223   :  { %1998 = vrot.lane.b32.xlu1 %v1859_v46, %s4055_s23  ;;  %1990 = vrot.lane.b32.xlu0 %v1857_v28, %s4056_s24  ;;  %v2091_v46 = vld [vmem:[%s7652_s0 + $0x17c] sm:$0xff] }
 0x224   :  { %v5561_v24 = vpop.permute.xlu2 %1760 }
 0x225   :  { %v1319_v21 = vpop.permute.xlu1 %1318  ;;  %v1168_v0 = vpop.permute.xlu0 %1167 }
 0x226   :  { %v1335_v52 = vsel %vm138_vm6, %v1333_v6, %v1319_v21  ;;  %v1208_v9 = vsel %vm126_vm2, %v1206_v14, %v1168_v0  ;;  %v2093_v21 = vld [vmem:[%s7652_s0 + $0x17d] sm:$0xff] }
 0x227   :  { %3726 = vmatmul.msk.f32.gmra.mxu2 %vm144_vm7, %v1335_v52  ;;  %v1210_v37 = vsel %vm129_vm3, %v1208_v9, %v5511_v5  ;;  %v1854_v9 = vld [vmem:[%s7652_s0 + $0x15c] sm:$0x1] }
 0x22a   :  { %2030 = vrot.lane.b32.xlu2 %v1978_v55, %s4061_s16 }
 0x22b   :  { %2022 = vrot.lane.b32.xlu1 %v1976_v50, %s4060_s30  ;;  %2014 = vrot.lane.b32.xlu0 %v1974_v33, %s4058_s19 }
 0x22c   :  { %v1422_v57 = vpop.permute.xlu2 %1421 }
 0x22d   :  { %v1390_v62 = vpop.permute.xlu1 %1389  ;;  %v1184_v54 = vpop.permute.xlu0 %1183 }
 0x22e   :  { %v1212_v32 = vsel %vm132_vm4, %v1210_v37, %v1184_v54  ;;  %v1442_v17 = vsel %vm120_vm0, %v1370_v23, %v1390_v62  ;;  %v1733_v62 = vld [vmem:[%s7652_s0 + $0x13f] sm:$0x1]  ;;  %v1741_v23 = vld [vmem:[%s7652_s0 + $0x153] sm:$0x1] }
 0x232   :  { %1643 = vrot.lane.b32.xlu2 %v1614_v48, %s4055_s23 }
 0x233   :  { %1635 = vrot.lane.b32.xlu1 %v1612_v7, %s4056_s24  ;;  %1627 = vrot.lane.b32.xlu0 %v1610_v10, %s4057_s25 }
 0x234   :  { %v1430_v11 = vpop.permute.xlu2 %1429 }
 0x235   :  { %v1398_v8 = vpop.permute.xlu1 %1397  ;;  %v1192_v12 = vpop.permute.xlu0 %1191 }
 0x236   :  { %v1214_v19 = vsel %vm135_vm5, %v1212_v32, %v1192_v12  ;;  %v1444_v29 = vsel %vm123_vm1, %v1442_v17, %v1398_v8  ;;  %v1850_v8 = vld [vmem:[%s7652_s0 + $0x152] sm:$0x1]  ;;  %v1735_v12 = vld [vmem:[%s7652_s0 + $0x148] sm:$0x1] }
 0x23a   :  { %1667 = vrot.lane.b32.xlu2 %v1620_v15, %s4060_s30 }
 0x23b   :  { %1659 = vrot.lane.b32.xlu1 %v1618_v1, %s4058_s19  ;;  %1651 = vrot.lane.b32.xlu0 %v1616_v35, %s4059_s20  ;;  %v1005_v13 = vpop.f32.mrf.mxu3  ;;  %v1739_v1 = vld [vmem:[%s7652_s0 + $0x152] sm:$0x1]  ;;  %v1852_v35 = vld [vmem:[%s7652_s0 + $0x153] sm:$0x1] }
 0x23c   :  { %v1438_v38 = vpop.permute.xlu2 %1437 }
 0x23d   :  { %v1406_v40 = vpop.permute.xlu1 %1405  ;;  %v1200_v59 = vpop.permute.xlu0 %1199 }
 0x23e   :  { %v1216_v44 = vsel %vm138_vm6, %v1214_v19, %v1200_v59  ;;  %v1446_v16 = vsel %vm126_vm2, %v1444_v29, %v1406_v40  ;;  %v1858_v40 = vld [vmem:[%s7652_s0 + $0x166] sm:$0x1] }
 0x23f   :  { %3724 = vmatmul.msk.f32.gmra.mxu1 %vm144_vm7, %v1216_v44  ;;  %v1856_v44 = vld [vmem:[%s7652_s0 + $0x15d] sm:$0x1] }
 0x242   :  { %2109 = vrot.lane.b32.xlu2 %v1976_v50, %s4056_s24  ;;  %v1800_v50 = vsel %vm123_vm1, %v5530_v20, %v5545_v43 }
 0x243   :  { %2101 = vrot.lane.b32.xlu1 %v1974_v33, %s4057_s25  ;;  %1675 = vrot.lane.b32.xlu0 %v1622_v34, %s4061_s16  ;;  %v1359_v5 = vpop.f32.mrf.mxu2  ;;  %v2097_v33 = vld [vmem:[%s7652_s0 + $0x187] sm:$0xff]  ;;  %v1802_v54 = vsel %vm126_vm2, %v1800_v50, %v5561_v24 }
 0x244   :  { %v1360_v56 = vadd.f32 %v5615_v18, %v1359_v5  ;;  %v1121_v49 = vpop.f32.mrf.mxu0  ;;  %v5632_v22 = vpop.permute.xlu2 %1649  ;;  %v1737_v24 = vld [vmem:[%s7652_s0 + $0x149] sm:$0x1]  ;;  %v2279_v50 = vld [vmem:[#allocation2 + $0xb] ss:$2 sm:$0x7] }
 0x245   :  { %v1769_v28 = vpop.permute.xlu1 %1768  ;;  %v1414_v45 = vpop.permute.xlu0 %1413 }
 0x246   :  { %v1365_v47 = vmax.f32 %v1360_v56, 0.0  ;;  %v1448_v41 = vsel %vm129_vm3, %v1446_v16, %v1414_v45  ;;  %v1804_v48 = vsel %vm129_vm3, %v1802_v54, %v1769_v28  ;;  %v1967_v28 = vld [vmem:[%s7652_s0 + $0x15d] sm:$0x1]  ;;  %v1860_v45 = vld [vmem:[%s7652_s0 + $0x167] sm:$0x1] }
 0x247   :  { %v1450_v25 = vsel %vm132_vm4, %v1448_v41, %v1422_v57  ;;  %v1848_v57 = vld [vmem:[%s7652_s0 + $0x149] sm:$0x1]  ;;  %v2088_v54 = vld [vmem:[%s7652_s0 + $0x17a] sm:$0x1] }
 0x248   :  { %1367 = vst.msk [vmem:[#allocation2 + $0x5a] sm:$0xff] %vm129_vm3, %v1365_v47  ;;  %v1452_v42 = vsel %vm135_vm5, %v1450_v25, %v1430_v11 }
 0x249   :  { %v1454_v4 = vsel %vm138_vm6, %v1452_v42, %v1438_v38 }
 0x24a   :  { %3728 = vmatmul.msk.f32.gmra.mxu3 %vm144_vm7, %v1454_v4  ;;  %1746 = vrot.lane.b32.xlu2 %v1729_v26, %s4057_s25 }
 0x24b   :  { %2125 = vrot.lane.b32.xlu1 %v2091_v46, %s4059_s20  ;;  %2117 = vrot.lane.b32.xlu0 %v1978_v55, %s4055_s23  ;;  %v2277_v46 = vld [vmem:[#allocation2 + $0xa] ss:$2 sm:$0x7] }
 0x24c   :  { %v5650_v61 = vpop.permute.xlu2 %1863 }
 0x24d   :  { %v1777_v53 = vpop.permute.xlu1 %1776  ;;  %v1626_v63 = vpop.permute.xlu0 %1625 }
 0x24e   :  { %v1806_v20 = vsel %vm132_vm4, %v1804_v48, %v1777_v53  ;;  %v1679_v38 = vsel %vm120_vm0, %v5206_v27, %v1626_v63  ;;  %v2269_v53 = vld [vmem:[#allocation2 + $0x1] ss:$2 sm:$0x7]  ;;  %v2086_v63 = vld [vmem:[%s7652_s0 + $0x171] sm:$0x1] }
 0x24f   :  { %v1240_v36 = vpop.f32.mrf.mxu1 }
 0x250   :  { %v1241_v2 = vadd.f32 %v5615_v18, %v1240_v36  ;;  %v1971_v36 = vld [vmem:[%s7652_s0 + $0x167] sm:$0x1] }
 0x252   :  { %v1246_v0 = vmax.f32 %v1241_v2, 0.0  ;;  %2141 = vrot.lane.b32.xlu2 %v2095_v39, %s4060_s30  ;;  %v3755_v39 = vpack.i.bf16 %v2277_v46, %v2269_v53  ;;  %v1917_v2 = vsel %vm120_vm0, %v5386_v30, %v5650_v61  ;;  %v2289_v46 = vld [vmem:[#allocation2 + $0x15] ss:$2 sm:$0x7]  ;;  %v1608_v53 = vld [vmem:[%s7652_s0 + $0x120] sm:$0x1] }
 0x253   :  { %1754 = vrot.lane.b32.xlu1 %v1731_v3, %s4056_s24  ;;  %2133 = vrot.lane.b32.xlu0 %v2093_v21, %s4058_s19  ;;  %v1489_v3 = vld [vmem:[%s7652_s0 + $0x10c] sm:$0x1] }
 0x254   :  { %1248 = vst.msk [vmem:[#allocation2 + $0x51] sm:$0xff] %vm129_vm3, %v1246_v0  ;;  %v5666_v6 = vpop.permute.xlu2 %1871 }
 0x255   :  { %v1785_v52 = vpop.permute.xlu1 %1784  ;;  %v1634_v55 = vpop.permute.xlu0 %1633  ;;  %v1919_v0 = vsel %vm123_vm1, %v1917_v2, %v5666_v6  ;;  %v1973_v6 = vld [vmem:[%s7652_s0 + $0x170] sm:$0x1]  ;;  %v2446_v2 = vld [vmem:[#allocation2 + $0x13] ss:$2 sm:$0x7] }
 0x256   :  { %v1808_v7 = vsel %vm135_vm5, %v1806_v20, %v1785_v52  ;;  %v1681_v19 = vsel %vm123_vm1, %v1679_v38, %v1634_v55 }
 0x25a   :  { %2149 = vrot.lane.b32.xlu2 %v2097_v33, %s4061_s16  ;;  %v2271_v33 = vld [vmem:[#allocation2 + $0x2] ss:$2 sm:$0x7] }
 0x25b   :  { %1865 = vrot.lane.b32.xlu1 %v1848_v57, %s4057_s25  ;;  %1762 = vrot.lane.b32.xlu0 %v1733_v62, %s4055_s23  ;;  %v3760_v48 = vpack.i.bf16 %v2279_v50, %v2271_v33 }
 0x25c   :  { %v5687_v43 = vpop.permute.xlu2 %1879 }
 0x25d   :  { %v1793_v10 = vpop.permute.xlu1 %1792  ;;  %v1642_v60 = vpop.permute.xlu0 %1641  ;;  %v1921_v57 = vsel %vm126_vm2, %v1919_v0, %v5687_v43 }
 0x25e   :  { %v1810_v11 = vsel %vm138_vm6, %v1808_v7, %v1793_v10  ;;  %v1683_v59 = vsel %vm126_vm2, %v1681_v19, %v1642_v60 }
 0x25f   :  { %3733 = vmatmul.msk.f32.vlgmr.msrb.gmra.mxu2 %vm144_vm7, %v1810_v11  ;;  %v1685_v27 = vsel %vm129_vm3, %v1683_v59, %v5632_v22  ;;  %v1969_v22 = vld [vmem:[%s7652_s0 + $0x166] sm:$0x1] }
 0x262   :  { %1778 = vrot.lane.b32.xlu2 %v1737_v24, %s4058_s19 }
 0x263   :  { %1873 = vrot.lane.b32.xlu1 %v1850_v8, %s4056_s24  ;;  %1770 = vrot.lane.b32.xlu0 %v1735_v12, %s4059_s20 }
 0x264   :  { %v5704_v31 = vpop.permute.xlu2 %1540 }
 0x265   :  { %v1658_v14 = vpop.permute.xlu1 %1657  ;;  %v1509_v15 = vpop.permute.xlu0 %1508 }
 0x266   :  { %v1687_v34 = vsel %vm132_vm4, %v1685_v27, %v1658_v14  ;;  %v1561_v30 = vsel %vm120_vm0, %v1489_v3, %v1509_v15  ;;  %v1979_v27 = vld [vmem:[%s7652_s0 + $0x17b] sm:$0x1] }
 0x267   :  { %v5866_v3 = vld [vmem:[%s7655_s3 + $0x78] sm:$0xff] }
 0x268   :  { %2362 = vmatpush.msra.mxu2 %v5866_v3 }
 0x26a   :  { %1889 = vrot.lane.b32.xlu2 %v1854_v9, %s4059_s20  ;;  %v2281_v9 = vld [vmem:[#allocation2 + $0xc] ss:$2 sm:$0x7] }
 0x26b   :  { %1786 = vrot.lane.b32.xlu1 %v1739_v1, %s4060_s30  ;;  %1881 = vrot.lane.b32.xlu0 %v1852_v35, %s4055_s23 }
 0x26c   :  { %v5718_v37 = vpop.permute.xlu2 %1903 }
 0x26d   :  { %v1666_v13 = vpop.permute.xlu1 %1665  ;;  %v1517_v32 = vpop.permute.xlu0 %1516 }
 0x26e   :  { %v1689_v29 = vsel %vm135_vm5, %v1687_v34, %v1666_v13  ;;  %v1563_v61 = vsel %vm123_vm1, %v1561_v30, %v1517_v32  ;;  %v2090_v32 = vld [vmem:[%s7652_s0 + $0x17b] sm:$0x1]  ;;  %v2092_v34 = vld [vmem:[%s7652_s0 + $0x184] sm:$0x1]  ;;  %v5878_v30 = vld [vmem:[%s7655_s3 + $0x68] sm:$0xff] }
 0x272   :  { %1905 = vrot.lane.b32.xlu2 %v1858_v40, %s4060_s30 }
 0x273   :  { %1897 = vrot.lane.b32.xlu1 %v1856_v44, %s4058_s19  ;;  %1794 = vrot.lane.b32.xlu0 %v1741_v23, %s4061_s16 }
 0x274   :  { %v1124_v17 = vpop.f32.mrf.mxu0  ;;  %v5739_v5 = vpop.permute.xlu2 %1982 }
 0x275   :  { %v1674_v56 = vpop.permute.xlu1 %1673  ;;  %v1525_v49 = vpop.permute.xlu0 %1524  ;;  %v2036_v44 = vsel %vm120_vm0, %v5501_v58, %v5739_v5  ;;  %v1977_v17 = vld [vmem:[%s7652_s0 + $0x17a] sm:$0x1] }
 0x276   :  { %v1691_v16 = vsel %vm138_vm6, %v1689_v29, %v1674_v56  ;;  %v1565_v62 = vsel %vm126_vm2, %v1563_v61, %v1525_v49 }
 0x277   :  { %3731 = vmatmul.msk.f32.vlgmr.msrb.gmra.mxu1 %vm144_vm7, %v1691_v16 }
 0x27a   :  { %1992 = vrot.lane.b32.xlu2 %v1969_v22, %s4056_s24 }
 0x27b   :  { %1984 = vrot.lane.b32.xlu1 %v1967_v28, %s4057_s25  ;;  %1913 = vrot.lane.b32.xlu0 %v1860_v45, %s4061_s16  ;;  %v1478_v47 = vpop.f32.mrf.mxu3  ;;  %v2098_v28 = vld [vmem:[%s7652_s0 + $0x18f] sm:$0x1] }
 0x27c   :  { %v1479_v41 = vadd.f32 %v5615_v18, %v1478_v47  ;;  %v5757_v25 = vpop.permute.xlu2 %2006  ;;  %v2096_v47 = vld [vmem:[%s7652_s0 + $0x18e] sm:$0x1] }
 0x27d   :  { %v1888_v26 = vpop.permute.xlu1 %1887  ;;  %v1533_v42 = vpop.permute.xlu0 %1532 }
 0x27e   :  { %v1484_v4 = vmax.f32 %v1479_v41, 0.0  ;;  %v1923_v20 = vsel %vm129_vm3, %v1921_v57, %v1888_v26  ;;  %v1567_v7 = vsel %vm129_vm3, %v1565_v62, %v1533_v42  ;;  %v2094_v41 = vld [vmem:[%s7652_s0 + $0x185] sm:$0x1]  ;;  %v2287_v26 = vld [vmem:[#allocation2 + $0x14] ss:$2 sm:$0x7] }
 0x27f   :  { %v1569_v43 = vsel %vm132_vm4, %v1567_v7, %v5704_v31  ;;  %v2273_v31 = vld [vmem:[#allocation2 + $0x3] ss:$2 sm:$0x7]  ;;  %v2447_v42 = vld [vmem:[#allocation2 + $0x14] ss:$2 sm:$0x7] }
 0x280   :  { %1486 = vst.msk [vmem:[#allocation2 + $0x63] sm:$0xff] %vm129_vm3, %v1484_v4  ;;  %v3765_v38 = vpack.i.bf16 %v2281_v9, %v2273_v31  ;;  %v5888_v57 = vld [vmem:[%s7655_s3 + $0x60] sm:$0xff] }
 0x282   :  { %3756 = vrot.lane.b32.xlu2 %v3755_v39, %s4059_s20  ;;  %v2285_v39 = vld [vmem:[#allocation2 + $0x13] ss:$2 sm:$0x7] }
 0x283   :  { %2103 = vrot.lane.b32.xlu1 %v2086_v63, %s4057_s25  ;;  %2000 = vrot.lane.b32.xlu0 %v1971_v36, %s4055_s23  ;;  %v2448_v36 = vld [vmem:[#allocation2 + $0x15] ss:$2 sm:$0x7]  ;;  %v3770_v50 = vpack.i.bf16 %v2285_v39, %v2446_v2  ;;  %v2617_v39 = vld [vmem:[#allocation2 + $0x2f] ss:$2 sm:$0x7] }
 0x284   :  { %v5775_v21 = vpop.permute.xlu2 %2030  ;;  %v2616_v2 = vld [vmem:[#allocation2 + $0x2e] ss:$2 sm:$0x7] }
 0x285   :  { %v1549_v52 = vpop.permute.xlu1 %1548  ;;  %v1896_v55 = vpop.permute.xlu0 %1895 }
 0x286   :  { %v1925_v10 = vsel %vm132_vm4, %v1923_v20, %v1896_v55  ;;  %v1571_v24 = vsel %vm135_vm5, %v1569_v43, %v1549_v52  ;;  %v3780_v52 = vpack.i.bf16 %v2289_v46, %v2448_v36  ;;  %v3775_v55 = vpack.i.bf16 %v2287_v26, %v2447_v42 }
 0x287   :  { %v1927_v14 = vsel %vm135_vm5, %v1925_v10, %v5718_v37  ;;  %v1975_v37 = vld [vmem:[%s7652_s0 + $0x171] sm:$0x1]  ;;  %v2452_v10 = vld [vmem:[#allocation2 + $0x1e] ss:$2 sm:$0x7] }
 0x28a   :  { %3761 = vrot.lane.b32.xlu2 %v3760_v48, %s4062_s12  ;;  %v2297_v48 = vld [vmem:[#allocation2 + $0x1e] ss:$2 sm:$0x7] }
 0x28b   :  { %2111 = vrot.lane.b32.xlu1 %v2088_v54, %s4056_s24  ;;  %2008 = vrot.lane.b32.xlu0 %v1973_v6, %s4059_s20  ;;  %v2295_v54 = vld [vmem:[#allocation2 + $0x1d] ss:$2 sm:$0x7] }
 0x28c   :  { %v1597_v60 = vpop.f32.mrf.mxu0  ;;  %v5798_v11 = vpop.permute.xlu2 %1643  ;;  %v2451_v6 = vld [vmem:[#allocation2 + $0x1d] ss:$2 sm:$0x7] }
 0x28d   :  { %v1598_v8 = vadd.f32 %v5615_v18, %v1597_v60  ;;  %v1912_v12 = vpop.permute.xlu1 %1911  ;;  %v1557_v15 = vpop.permute.xlu0 %1556  ;;  %v2293_v60 = vld [vmem:[#allocation2 + $0x1c] ss:$2 sm:$0x7] }
 0x28e   :  { %v1929_v1 = vsel %vm138_vm6, %v1927_v14, %v1912_v12  ;;  %v1573_v35 = vsel %vm138_vm6, %v1571_v24, %v1557_v15  ;;  %v2450_v24 = vld [vmem:[#allocation2 + $0x1c] ss:$2 sm:$0x7]  ;;  %v3795_v12 = vpack.i.bf16 %v2297_v48, %v2452_v10  ;;  %v3790_v14 = vpack.i.bf16 %v2295_v54, %v2451_v6 }
 0x28f   :  { %v1603_v13 = vmax.f32 %v1598_v8, 0.0  ;;  %3730 = vmatmul.msk.f32.gmra.mxu0 %vm144_vm7, %v1573_v35  ;;  %3735 = vmatmul.msk.f32.vlgmr.msrb.gmra.mxu3 %vm144_vm7, %v1929_v1  ;;  %v3785_v15 = vpack.i.bf16 %v2293_v60, %v2450_v24  ;;  %v5902_v1 = vld [vmem:[%s7655_s3 + $0x58] sm:$0xff]  ;;  %v5914_v35 = vld [vmem:[%s7655_s3 + $0x50] sm:$0xff]  ;;  %v6002_v6 = vld [vmem:[%s7655_s3 + $0x20] sm:$0xff] }
 0x290   :  { %7698 = vst [vmem:[#allocation8_spill] sm:$0xff] %v5902_v1  ;;  %v6007_v48 = vld [vmem:[%s7655_s3 + $0xc0] sm:$0xff] }
 0x291   :  { %1605 = vst.msk [vmem:[#allocation2 + $0x6c] sm:$0xff] %vm129_vm3, %v1603_v13  ;;  %v5919_v13 = vld [vmem:[%s7655_s3 + $0xf0] sm:$0xff] }
 0x292   :  { %3766 = vrot.lane.b32.xlu2 %v3765_v38, %s4063_s15 }
 0x293   :  { %2119 = vrot.lane.b32.xlu1 %v2090_v32, %s4055_s23  ;;  %2016 = vrot.lane.b32.xlu0 %v1975_v37, %s4058_s19 }
 0x294   :  { %v5818_v19 = vpop.permute.xlu2 %1667 }
 0x295   :  { %v1999_v40 = vpop.permute.xlu1 %1998  ;;  %v1991_v59 = vpop.permute.xlu0 %1990 }
 0x296   :  { %v2038_v23 = vsel %vm123_vm1, %v2036_v44, %v1991_v59  ;;  %v5930_v59 = vld [vmem:[%s7655_s3 + $0x48] sm:$0xff] }
 0x297   :  { %v2040_v29 = vsel %vm126_vm2, %v2038_v23, %v1999_v40  ;;  %v2468_v40 = vld [vmem:[#allocation2 + $0x30] ss:$2 sm:$0x7]  ;;  %7700 = vst [vmem:[#allocation10_spill] sm:$0xff] %v5930_v59  ;;  %v5935_v44 = vld [vmem:[%s7655_s3 + $0xe8] sm:$0xff] }
 0x298   :  { %v2042_v56 = vsel %vm129_vm3, %v2040_v29, %v5757_v25  ;;  %7701 = vst [vmem:[#allocation11_spill] sm:$0xff] %v5935_v44  ;;  %v2458_v29 = vld [vmem:[#allocation2 + $0x26] ss:$2 sm:$0x7] }
 0x29a   :  { %2032 = vrot.lane.b32.xlu2 %v1979_v27, %s4061_s16  ;;  %v2466_v27 = vld [vmem:[#allocation2 + $0x2f] ss:$2 sm:$0x7] }
 0x29b   :  { %2127 = vrot.lane.b32.xlu1 %v2092_v34, %s4059_s20  ;;  %2024 = vrot.lane.b32.xlu0 %v1977_v17, %s4060_s30  ;;  %v2464_v34 = vld [vmem:[#allocation2 + $0x2e] ss:$2 sm:$0x7]  ;;  %v5944_v17 = vld [vmem:[%s7655_s3 + $0x40] sm:$0xff] }
 0x29c   :  { %v5837_v58 = vpop.permute.xlu2 %2109  ;;  %7702 = vst [vmem:[#allocation12_spill] sm:$0xff] %v5944_v17 }
 0x29d   :  { %v2023_v5 = vpop.permute.xlu1 %2022  ;;  %v2015_v49 = vpop.permute.xlu0 %2014 }
 0x29e   :  { %v2044_v16 = vsel %vm132_vm4, %v2042_v56, %v2015_v49  ;;  %v3805_v49 = vpack.i.bf16 %v2466_v27, %v2458_v29 }
 0x29f   :  { %v2046_v22 = vsel %vm135_vm5, %v2044_v16, %v2023_v5  ;;  %v2456_v5 = vld [vmem:[#allocation2 + $0x25] ss:$2 sm:$0x7] }
 0x2a0   :  { %v2048_v45 = vsel %vm138_vm6, %v2046_v22, %v5775_v21  ;;  %v5871_v21 = vld [vmem:[%s7655_s3 + $0x70] sm:$0xff]  ;;  %v3800_v16 = vpack.i.bf16 %v2464_v34, %v2456_v5  ;;  %v5951_v22 = vld [vmem:[%s7655_s3 + $0xe0] sm:$0xff]  ;;  %v2624_v34 = vld [vmem:[#allocation2 + $0x38] ss:$2 sm:$0x7] }
 0x2a1   :  { %3737 = vmatmul.msk.f32.vlgmr.msra.gmra.mxu0 %vm144_vm7, %v2048_v45  ;;  %2363 = vmatpush.msra.mxu2 %v5871_v21  ;;  %7703 = vst [vmem:[#allocation13_spill] sm:$0xff] %v5951_v22  ;;  %v5965_v45 = vld [vmem:[%s7655_s3 + $0xd8] sm:$0xff] }
 0x2a2   :  { %2151 = vrot.lane.b32.xlu2 %v2098_v28, %s4061_s16  ;;  %v5956_v28 = vld [vmem:[%s7655_s3 + $0x38] sm:$0xff] }
 0x2a3   :  { %2143 = vrot.lane.b32.xlu1 %v2096_v47, %s4060_s30  ;;  %2135 = vrot.lane.b32.xlu0 %v2094_v41, %s4058_s19  ;;  %v5970_v47 = vld [vmem:[%s7655_s3 + $0x30] sm:$0xff]  ;;  %s3696_s30 = sshll.u32 %s7663_s11, 4  ;;  %s3697_s30 = int_to_ptr.hbm [resolvable:$true] %s3696_s30 }
 0x2a4   :  { %v5858_v25 = vpop.permute.xlu2 %1746  ;;  %2364 = vmatpush.msra.mxu2 %v5878_v30 }
 0x2a5   :  { %v1636_v4 = vpop.permute.xlu1 %1635  ;;  %v1628_v63 = vpop.permute.xlu0 %1627 }
 0x2a6   :  { %v1680_v0 = vsel %vm120_vm0, %v1608_v53, %v1628_v63  ;;  %2365 = vmatpush.msra.mxu2 %v5888_v57  ;;  %v5979_v53 = vld [vmem:[%s7655_s3 + $0xd0] sm:$0xff]  ;;  %v5984_v63 = vld [vmem:[%s7655_s3 + $0x28] sm:$0xff] }
 0x2a7   :  { %v1682_v33 = vsel %vm123_vm1, %v1680_v0, %v1636_v4  ;;  %v2618_v4 = vld [vmem:[#allocation2 + $0x30] ss:$2 sm:$0x7]  ;;  %v2614_v0 = vld [vmem:[#allocation2 + $0x27] ss:$2 sm:$0x7] }
 0x2a8   :  { %v1684_v43 = vsel %vm126_vm2, %v1682_v33, %v5798_v11  ;;  %v5907_v11 = vld [vmem:[%s7655_s3 + $0xf8] sm:$0xff]  ;;  %2366 = vmatpush.msra.mxu2 %v5902_v1 }
 0x2a9   :  { %7699 = vst [vmem:[#allocation9_spill] sm:$0xff] %v5907_v11  ;;  %2382 = vmatpush.msra.mxu3 %v5907_v11 }
 0x2aa   :  { %v1362_v61 = vpop.f32.mrf.mxu2  ;;  %3781 = vrot.lane.b32.xlu2 %v3780_v52, %s4063_s15  ;;  %2367 = vmatpush.msra.mxu2 %v5914_v35  ;;  %v5993_v52 = vld [vmem:[%s7655_s3 + $0xc8] sm:$0xff] }
 0x2ab   :  { %3776 = vrot.lane.b32.xlu1 %v3775_v55, %s4062_s12  ;;  %3771 = vrot.lane.b32.xlu0 %v3770_v50, %s4059_s20  ;;  %v2613_v55 = vld [vmem:[#allocation2 + $0x26] ss:$2 sm:$0x7]  ;;  %v2612_v50 = vld [vmem:[#allocation2 + $0x25] ss:$2 sm:$0x7]  ;;  %v3825_v61 = vpack.i.bf16 %v2618_v4, %v2614_v0 }
 0x2ac   :  { %v5890_v62 = vpop.permute.xlu2 %2141  ;;  %2383 = vmatpush.msra.mxu3 %v5919_v13  ;;  %2368 = vmatpush.msra.mxu2 %v5930_v59  ;;  %v3820_v33 = vpack.i.bf16 %v2617_v39, %v2613_v55  ;;  %v3815_v54 = vpack.i.bf16 %v2616_v2, %v2612_v50  ;;  %v2792_v39 = vld [vmem:[#allocation2 + $0x5d] ss:$2 sm:$0x7] }
 0x2ad   :  { %v1660_v20 = vpop.permute.xlu1 %1659  ;;  %v1652_v7 = vpop.permute.xlu0 %1651  ;;  %v6103_v2 = vld [vmem:[%s7655_s3 + $0x98] sm:$0xff]  ;;  %v6110_v50 = vld [vmem:[%s7655_s3 + $0x160] sm:$0xff] }
 0x2ae   :  { %v1686_v8 = vsel %vm129_vm3, %v1684_v43, %v1652_v7  ;;  %2384 = vmatpush.msra.mxu3 %v5935_v44  ;;  %2369 = vmatpush.msra.mxu2 %v5944_v17  ;;  %v6022_v7 = vld [vmem:[%s7655_s3 + $0xb8] sm:$0xff] }
 0x2af   :  { %v1688_v9 = vsel %vm132_vm4, %v1686_v8, %v1660_v20  ;;  %v2784_v8 = vld [vmem:[#allocation2 + $0x54] ss:$2 sm:$0x7]  ;;  %v2788_v55 = vld [vmem:[#allocation2 + $0x5b] ss:$2 sm:$0x7] }
 0x2b0   :  { %v1690_v38 = vsel %vm135_vm5, %v1688_v9, %v5818_v19  ;;  %v2460_v19 = vld [vmem:[#allocation2 + $0x27] ss:$2 sm:$0x7]  ;;  %2385 = vmatpush.msra.mxu3 %v5951_v22  ;;  %2370 = vmatpush.msra.mxu2 %v5956_v28  ;;  %v2782_v9 = vld [vmem:[#allocation2 + $0x53] ss:$2 sm:$0x7] }
 0x2b1   :  { %v3810_v56 = vpack.i.bf16 %v2468_v40, %v2460_v19  ;;  %v6049_v40 = vld [vmem:[%s7655_s3 + $0x8] sm:$0xff]  ;;  %v2622_v19 = vld [vmem:[#allocation2 + $0x37] ss:$2 sm:$0x7] }
 0x2b2   :  { %3796 = vrot.lane.b32.xlu2 %v3795_v12, %s4063_s15  ;;  %2386 = vmatpush.msra.mxu3 %v5965_v45  ;;  %v6034_v12 = vld [vmem:[%s7655_s3 + $0x10] sm:$0xff] }
 0x2b3   :  { %3791 = vrot.lane.b32.xlu1 %v3790_v14, %s4062_s12  ;;  %3786 = vrot.lane.b32.xlu0 %v3785_v15, %s4059_s20  ;;  %7704 = vst [vmem:[#allocation14_spill] sm:$0xff] %v6034_v12  ;;  %v6039_v14 = vld [vmem:[%s7655_s3 + $0xb0] sm:$0xff] }
 0x2b4   :  { %v5921_v31 = vpop.permute.xlu2 %2149  ;;  %2371 = vmatpush.msra.mxu2 %v5970_v47  ;;  %2387 = vmatpush.msra.mxu3 %v5979_v53  ;;  %7705 = vst [vmem:[#allocation15_spill] sm:$0xff] %v6039_v14 }
 0x2b5   :  { %v2102_v32 = vpop.permute.xlu1 %2101  ;;  %v1676_v37 = vpop.permute.xlu0 %1675 }
 0x2b6   :  { %v1692_v23 = vsel %vm138_vm6, %v1690_v38, %v1676_v37  ;;  %v2155_v36 = vsel %vm120_vm0, %v5553_v51, %v2102_v32  ;;  %2372 = vmatpush.msra.mxu2 %v5984_v63  ;;  %2388 = vmatpush.msra.mxu3 %v5993_v52  ;;  %v2780_v32 = vld [vmem:[#allocation2 + $0x52] ss:$2 sm:$0x7]  ;;  %v2626_v38 = vld [vmem:[#allocation2 + $0x39] ss:$2 sm:$0x7] }
 0x2b7   :  { %3732 = vmatmul.msk.f32.gmra.mxu1 %vm144_vm7, %v1692_v23  ;;  %v2157_v51 = vsel %vm123_vm1, %v2155_v36, %v5837_v58  ;;  %v6017_v58 = vld [vmem:[%s7655_s3 + $0x18] sm:$0xff]  ;;  %v3840_v29 = vpack.i.bf16 %v2626_v38, %v2784_v8  ;;  %v3830_v5 = vpack.i.bf16 %v2622_v19, %v2780_v32  ;;  %v6143_v32 = vld [vmem:[%s7655_s3 + $0x1f0] sm:$0xff] }
 0x2b8   :  { %2373 = vmatpush.msra.mxu2 %v6002_v6  ;;  %2389 = vmatpush.msra.mxu3 %v6007_v48  ;;  %v6054_v23 = vld [vmem:[%s7655_s3 + $0x178] sm:$0xff]  ;;  %7708 = vst [vmem:[#allocation18_spill] sm:$0xff] %v6143_v32 }
 0x2b9   :  { %2402 = vmatpush.msrb.mxu0 %v6054_v23 }
 0x2ba   :  { %3811 = vrot.lane.b32.xlu2 %v3810_v56, %s4063_s15  ;;  %2374 = vmatpush.msra.mxu2 %v6017_v58  ;;  %v6064_v56 = vld [vmem:[%s7655_s3 + $0xa8] sm:$0xff] }
 0x2bb   :  { %3806 = vrot.lane.b32.xlu1 %v3805_v49, %s4062_s12  ;;  %3801 = vrot.lane.b32.xlu0 %v3800_v16, %s4059_s20  ;;  %v6077_v49 = vld [vmem:[%s7655_s3 + $0x170] sm:$0xff]  ;;  %v6084_v16 = vld [vmem:[%s7655_s3 + $0xa0] sm:$0xff] }
 0x2bc   :  { %v1243_v41 = vpop.f32.mrf.mxu1  ;;  %v5972_v26 = vpop.permute.xlu2 %1778  ;;  %2390 = vmatpush.msra.mxu3 %v6022_v7  ;;  %2375 = vmatpush.msra.mxu2 %v6034_v12 }
 0x2bd   :  { %v2126_v42 = vpop.permute.xlu1 %2125  ;;  %v2118_v46 = vpop.permute.xlu0 %2117  ;;  %2403 = vmatpush.msrb.mxu0 %v6077_v49 }
 0x2be   :  { %v2159_v20 = vsel %vm126_vm2, %v2157_v51, %v2118_v46  ;;  %2391 = vmatpush.msra.mxu3 %v6039_v14  ;;  %2376 = vmatpush.msra.mxu2 %v6049_v40  ;;  %v6093_v46 = vld [vmem:[%s7655_s3 + $0x168] sm:$0xff]  ;;  %v2634_v51 = vld [vmem:[#allocation2 + $0x42] ss:$2 sm:$0x7] }
 0x2bf   :  { %v2161_v60 = vsel %vm129_vm3, %v2159_v20, %v2126_v42  ;;  %v2790_v42 = vld [vmem:[#allocation2 + $0x5c] ss:$2 sm:$0x7]  ;;  %2404 = vmatpush.msrb.mxu0 %v6093_v46 }
 0x2c0   :  { %2392 = vmatpush.msra.mxu3 %v6064_v56  ;;  %v2630_v20 = vld [vmem:[#allocation2 + $0x40] ss:$2 sm:$0x7] }
 0x2c1   :  { %v3845_v8 = vpack.i.bf16 %v2630_v20, %v2788_v55  ;;  %2405 = vmatpush.msrb.mxu0 %v6110_v50  ;;  %v2798_v55 = vld [vmem:[#allocation2 + $0x65] ss:$2 sm:$0x7] }
 0x2c2   :  { %3826 = vrot.lane.b32.xlu2 %v3825_v61, %s4063_s15  ;;  %2393 = vmatpush.msra.mxu3 %v6084_v16  ;;  %v6115_v61 = vld [vmem:[%s7655_s3 + $0x1f8] sm:$0xff] }
 0x2c3   :  { %3821 = vrot.lane.b32.xlu1 %v3820_v33, %s4062_s12  ;;  %3816 = vrot.lane.b32.xlu0 %v3815_v54, %s4059_s20  ;;  %7706 = vst [vmem:[#allocation16_spill] sm:$0xff] %v6115_v61  ;;  %v6121_v33 = vld [vmem:[%s7655_s3 + $0x90] sm:$0xff]  ;;  %v2632_v54 = vld [vmem:[#allocation2 + $0x41] ss:$2 sm:$0x7] }
 0x2c4   :  { %v6024_v10 = vpop.permute.xlu2 %1889  ;;  %2394 = vmatpush.msra.mxu3 %v6103_v2  ;;  %2422 = vmatpush.msrb.mxu1 %v6115_v61 }
 0x2c5   :  { %v6028_v43 = vpop.permute.xlu1 %1754  ;;  %v2134_v24 = vpop.permute.xlu0 %2133 }
 0x2c6   :  { %v2163_v15 = vsel %vm132_vm4, %v2161_v60, %v2134_v24  ;;  %v3855_v60 = vpack.i.bf16 %v2634_v51, %v2792_v39  ;;  %v3850_v24 = vpack.i.bf16 %v2632_v54, %v2790_v42  ;;  %2395 = vmatpush.msra.mxu3 %v6121_v33  ;;  %2423 = vmatpush.msrb.mxu1 %v6143_v32  ;;  %v2804_v42 = vld [vmem:[#allocation2 + $0x6d] ss:$2 sm:$0x7]  ;;  %v2796_v51 = vld [vmem:[#allocation2 + $0x64] ss:$2 sm:$0x7] }
 0x2c7   :  { %v2165_v37 = vsel %vm135_vm5, %v2163_v15, %v5890_v62  ;;  %v3835_v62 = vpack.i.bf16 %v2624_v34, %v2782_v9  ;;  %v6130_v15 = vld [vmem:[%s7655_s3 + $0x88] sm:$0xff]  ;;  %v6138_v9 = vld [vmem:[%s7655_s3 + $0x158] sm:$0xff]  ;;  %v6159_v34 = vld [vmem:[%s7655_s3 + $0x150] sm:$0xff] }
 0x2c8   :  { %v2167_v27 = vsel %vm138_vm6, %v2165_v37, %v5921_v31  ;;  %v6069_v31 = vld [vmem:[%s7655_s3] sm:$0xff]  ;;  %7707 = vst [vmem:[#allocation17_spill] sm:$0xff] %v6138_v9  ;;  %2396 = vmatpush.msra.mxu3 %v6130_v15  ;;  %2406 = vmatpush.msrb.mxu0 %v6138_v9  ;;  %v6175_v39 = vld [vmem:[%s7655_s3 + $0x148] sm:$0xff] }
 0x2c9   :  { %3739 = vmatmul.msk.f32.vlgmr.msra.gmra.mxu1 %vm144_vm7, %v2167_v27  ;;  %2377 = vmatpush.msra.mxu2 %v6069_v31  ;;  %v6150_v37 = vld [vmem:[%s7655_s3 + $0x80] sm:$0xff]  ;;  %v2806_v27 = vld [vmem:[#allocation2 + $0x6e] ss:$2 sm:$0x7]  ;;  %7710 = vst [vmem:[#allocation20_spill] sm:$0xff] %v6159_v34 }
 0x2ca   :  { %3841 = vrot.lane.b32.xlu2 %v3840_v29, %s4063_s15  ;;  %2397 = vmatpush.msra.mxu3 %v6150_v37  ;;  %7712 = vst [vmem:[#allocation22_spill] sm:$0xff] %v6175_v39  ;;  %v3865_v20 = vpack.i.bf16 %v2806_v27, %v2798_v55  ;;  %v1727_v27 = vld [vmem:[%s7652_s0 + $0x134] sm:$0x1]  ;;  %v6212_v55 = vld [vmem:[%s7655_s3 + $0x1d8] sm:$0xff] }
 0x2cb   :  { %3836 = vrot.lane.b32.xlu1 %v3835_v62, %s4062_s12  ;;  %3831 = vrot.lane.b32.xlu0 %v3830_v5, %s4059_s20  ;;  %v2808_v62 = vld [vmem:[#allocation2 + $0x6f] ss:$2 sm:$0x7]  ;;  %7716 = vst [vmem:[#allocation26_spill] sm:$0xff] %v6212_v55 }
 0x2cc   :  { %v6086_v41 = vpop.permute.xlu2 %1905  ;;  %2529 = vmatpush.msrb.mxu2 %v5866_v3  ;;  %v6168_v5 = vld [vmem:[%s7655_s3 + $0x1e8] sm:$0xff]  ;;  %2549 = vmatpush.msrb.mxu3 %v5907_v11 }
 0x2cd   :  { %v6095_v4 = vpop.permute.xlu1 %1865  ;;  %v6097_v36 = vpop.permute.xlu0 %1762  ;;  %7711 = vst [vmem:[#allocation21_spill] sm:$0xff] %v6168_v5  ;;  %2407 = vmatpush.msrb.mxu0 %v6159_v34  ;;  %2424 = vmatpush.msrb.mxu1 %v6168_v5 }
 0x2ce   :  { %v1481_v0 = vpop.f32.mrf.mxu3  ;;  %2530 = vmatpush.msrb.mxu2 %v5871_v21  ;;  %2550 = vmatpush.msrb.mxu3 %v5919_v13 }
 0x2cf   :  { %v2800_v0 = vld [vmem:[#allocation2 + $0x66] ss:$2 sm:$0x7]  ;;  %2408 = vmatpush.msrb.mxu0 %v6175_v39 }
 0x2d0   :  { %2531 = vmatpush.msrb.mxu2 %v5878_v30  ;;  %v3870_v54 = vpack.i.bf16 %v2808_v62, %v2800_v0  ;;  %v6203_v62 = vld [vmem:[%s7655_s3 + $0x138] sm:$0xff]  ;;  %v2957_v0 = vld [vmem:[#allocation2 + $0x6e] ss:$2 sm:$0x7]  ;;  %2551 = vmatpush.msrb.mxu3 %v5935_v44 }
 0x2d1   :  { %7715 = vst [vmem:[#allocation25_spill] sm:$0xff] %v6203_v62  ;;  %v6228_v44 = vld [vmem:[%s7655_s3 + $0x1d0] sm:$0xff] }
 0x2d2   :  { %3856 = vrot.lane.b32.xlu2 %v3855_v60, %s4063_s15  ;;  %2532 = vmatpush.msrb.mxu2 %v5888_v57  ;;  %v3860_v60 = vpack.i.bf16 %v2804_v42, %v2796_v51 }
 0x2d3   :  { %3851 = vrot.lane.b32.xlu1 %v3850_v24, %s4062_s12  ;;  %3846 = vrot.lane.b32.xlu0 %v3845_v8, %s4059_s20  ;;  %v6186_v24 = vld [vmem:[%s7655_s3 + $0x140] sm:$0xff] }
 0x2d4   :  { %v6152_v38 = vpop.permute.xlu2 %1992  ;;  %2533 = vmatpush.msrb.mxu2 %v5902_v1  ;;  %7713 = vst [vmem:[#allocation23_spill] sm:$0xff] %v6186_v24  ;;  %v6193_v8 = vld [vmem:[%s7655_s3 + $0x1e0] sm:$0xff]  ;;  %2409 = vmatpush.msrb.mxu0 %v6186_v24  ;;  %v2956_v24 = vld [vmem:[#allocation2 + $0x6d] ss:$2 sm:$0x7] }
 0x2d5   :  { %7709 = vst [vmem:[#allocation19_spill] sm:$0xff] %v6152_v38  ;;  %v6161_v19 = vpop.permute.xlu1 %1873  ;;  %v1771_v29 = vpop.permute.xlu0 %1770  ;;  %2425 = vmatpush.msrb.mxu1 %v6193_v8  ;;  %v1799_v38 = vsel %vm120_vm0, %v1727_v27, %v5858_v25  ;;  %2552 = vmatpush.msrb.mxu3 %v5951_v22  ;;  %v2953_v27 = vld [vmem:[#allocation2 + $0x65] ss:$2 sm:$0x7] }
 0x2d6   :  { %2534 = vmatpush.msrb.mxu2 %v5914_v35  ;;  %7714 = vst [vmem:[#allocation24_spill] sm:$0xff] %v6193_v8  ;;  %2410 = vmatpush.msrb.mxu0 %v6203_v62  ;;  %v2954_v8 = vld [vmem:[#allocation2 + $0x66] ss:$2 sm:$0x7] }
 0x2d7   :  { %2426 = vmatpush.msrb.mxu1 %v6212_v55  ;;  %v2952_v22 = vld [vmem:[#allocation2 + $0x64] ss:$2 sm:$0x7]  ;;  %2553 = vmatpush.msrb.mxu3 %v5965_v45 }
 0x2d8   :  { %2535 = vmatpush.msrb.mxu2 %v5930_v59  ;;  %v1846_v62 = vld [vmem:[%s7652_s0 + $0x148] sm:$0x1]  ;;  %v3875_v55 = vpack.i.bf16 %v2956_v24, %v2952_v22  ;;  %v6267_v24 = vld [vmem:[%s7655_s3 + $0x1c0] sm:$0xff] }
 0x2d9   :  { %2427 = vmatpush.msrb.mxu1 %v6228_v44  ;;  %2554 = vmatpush.msrb.mxu3 %v5979_v53 }
 0x2da   :  { %3871 = vrot.lane.b32.xlu2 %v3870_v54, %s4063_s15  ;;  %2536 = vmatpush.msrb.mxu2 %v5944_v17  ;;  %v1801_v17 = vsel %vm123_vm1, %v1799_v38, %v6028_v43  ;;  %v3880_v38 = vpack.i.bf16 %v2957_v0, %v2953_v27 }
 0x2db   :  { %3866 = vrot.lane.b32.xlu1 %v3865_v20, %s4062_s12  ;;  %3861 = vrot.lane.b32.xlu0 %v3860_v60, %s4059_s20  ;;  %v2958_v20 = vld [vmem:[#allocation2 + $0x6f] ss:$2 sm:$0x7]  ;;  %v1803_v25 = vsel %vm126_vm2, %v1801_v17, %v6097_v36 }
 0x2dc   :  { %v6205_v42 = vpop.permute.xlu2 %3756  ;;  %v6219_v60 = vld [vmem:[%s7655_s3 + $0x130] sm:$0xff]  ;;  %2537 = vmatpush.msrb.mxu2 %v5956_v28  ;;  %v3885_v59 = vpack.i.bf16 %v2958_v20, %v2954_v8  ;;  %v1805_v43 = vsel %vm129_vm3, %v1803_v25, %v1771_v29  ;;  %v6247_v17 = vld [vmem:[%s7655_s3 + $0x128] sm:$0xff]  ;;  %v6262_v29 = vld [vmem:[%s7655_s3 + $0x120] sm:$0xff]  ;;  %2555 = vmatpush.msrb.mxu3 %v5993_v52 }
 0x2dd   :  { %v1787_v51 = vpop.permute.xlu1 %1786  ;;  %v1882_v54 = vpop.permute.xlu0 %1881  ;;  %2411 = vmatpush.msrb.mxu0 %v6219_v60  ;;  %v6252_v36 = vld [vmem:[%s7655_s3 + $0x1c8] sm:$0xff] }
 0x2de   :  { %2538 = vmatpush.msrb.mxu2 %v5970_v47  ;;  %7717 = vst [vmem:[#allocation27_spill] sm:$0xff] %v6252_v36  ;;  %2428 = vmatpush.msrb.mxu1 %v6252_v36 }
 0x2df   :  { %2412 = vmatpush.msrb.mxu0 %v6247_v17  ;;  %2556 = vmatpush.msrb.mxu3 %v6007_v48 }
 0x2e0   :  { %2539 = vmatpush.msrb.mxu2 %v5984_v63  ;;  %2429 = vmatpush.msrb.mxu1 %v6267_v24 }
 0x2e1   :  { %2413 = vmatpush.msrb.mxu0 %v6262_v29  ;;  %2557 = vmatpush.msrb.mxu3 %v6022_v7 }
 0x2e2   :  { %v1835_v8 = vpop.f32.mrf.mxu2  ;;  %3886 = vrot.lane.b32.xlu2 %v3885_v59, %s4063_s15  ;;  %v1918_v59 = vsel %vm120_vm0, %v1846_v62, %v6095_v4  ;;  %2540 = vmatpush.msrb.mxu2 %v6002_v6 }
 0x2e3   :  { %v1836_v22 = vadd.f32 %v5615_v18, %v1835_v8  ;;  %3881 = vrot.lane.b32.xlu1 %v3880_v38, %s4062_s12  ;;  %3876 = vrot.lane.b32.xlu0 %v3875_v55, %s4059_s20  ;;  %v1807_v18 = vsel %vm132_vm4, %v1805_v43, %v5972_v26  ;;  %v1920_v55 = vsel %vm123_vm1, %v1918_v59, %v6161_v19  ;;  %v6285_v26 = vld [vmem:[%s7655_s3 + $0x118] sm:$0xff]  ;;  %v3758_v43 = vunpack.i.l.bf16 %v6205_v42 }
 0x2e4   :  { %v6273_v0 = vpop.permute.xlu2 %3761  ;;  %v1809_v20 = vsel %vm135_vm5, %v1807_v18, %v1787_v51  ;;  %v1922_v4 = vsel %vm126_vm2, %v1920_v55, %v1882_v54  ;;  %v6294_v19 = vld [vmem:[%s7655_s3 + $0x1b8] sm:$0xff]  ;;  %v6302_v51 = vld [vmem:[%s7655_s3 + $0x110] sm:$0xff]  ;;  %2414 = vmatpush.msrb.mxu0 %v6285_v26  ;;  %2541 = vmatpush.msrb.mxu2 %v6017_v58  ;;  %v6335_v55 = vld [vmem:[%s7655_s3 + $0x100] sm:$0xff] }
 0x2e5   :  { %v1841_v25 = vmax.f32 %v1836_v22, 0.0  ;;  %v1898_v27 = vpop.permute.xlu1 %1897  ;;  %v1795_v38 = vpop.permute.xlu0 %1794  ;;  %v6309_v54 = vld [vmem:[%s7655_s3 + $0x1b0] sm:$0xff]  ;;  %v1924_v8 = vsel %vm129_vm3, %v1922_v4, %v6024_v10  ;;  %2430 = vmatpush.msrb.mxu1 %v6294_v19  ;;  %v6319_v22 = vld [vmem:[%s7655_s3 + $0x108] sm:$0xff]  ;;  %v3763_v18 = vunpack.i.l.bf16 %v6273_v0  ;;  %2558 = vmatpush.msrb.mxu3 %v6039_v14 }
 0x2e6   :  { %v1811_v62 = vsel %vm138_vm6, %v1809_v20, %v1795_v38  ;;  %7718 = vst [vmem:[#allocation28_spill] sm:$0xff] %v6319_v22  ;;  %v1926_v59 = vsel %vm132_vm4, %v1924_v8, %v1898_v27  ;;  %2415 = vmatpush.msrb.mxu0 %v6302_v51  ;;  %v6328_v10 = vld [vmem:[%s7655_s3 + $0x1a8] sm:$0xff]  ;;  %v2267_v20 = vld [vmem:[#allocation2] ss:$2 sm:$0x7]  ;;  %2542 = vmatpush.msrb.mxu2 %v6034_v12 }
 0x2e7   :  { %1843 = vst.msk [vmem:[#allocation2 + $0x7e] sm:$0xff] %vm129_vm3, %v1841_v25  ;;  %3734 = vmatmul.msk.f32.gmra.mxu2 %vm144_vm7, %v1811_v62  ;;  %2431 = vmatpush.msrb.mxu1 %v6309_v54  ;;  %v6342_v27 = vld [vmem:[%s7655_s3 + $0x1a0] sm:$0xff]  ;;  %v2346_v38 = vsel %vm129_vm3, %v2267_v20, %v3758_v43  ;;  %v1928_v14 = vsel %vm135_vm5, %v1926_v59, %v6086_v41  ;;  %v6361_v41 = vld [vmem:[%s7655_s3 + $0x198] sm:$0xff]  ;;  %v3759_v59 = vunpack.i.h.bf16 %v6205_v42  ;;  %v2275_v42 = vld [vmem:[#allocation2 + $0x9] ss:$2 sm:$0x7] }
 0x2e8   :  { %2416 = vmatpush.msrb.mxu0 %v6319_v22  ;;  %2559 = vmatpush.msrb.mxu3 %v6064_v56  ;;  %v2347_v12 = vsel %vm144_vm7, %v2346_v38, %v3763_v18 }
 0x2e9   :  { %2432 = vmatpush.msrb.mxu1 %v6328_v10  ;;  %2543 = vmatpush.msrb.mxu2 %v6049_v40  ;;  %v2350_v18 = vsel %vm129_vm3, %v2275_v42, %v3759_v59  ;;  %v6404_v42 = vld [vmem:[%s7655_s3 + $0x180] sm:$0xff] }
 0x2ea   :  { %2417 = vmatpush.msrb.mxu0 %v6335_v55  ;;  %2560 = vmatpush.msrb.mxu3 %v6084_v16 }
 0x2eb   :  { %2433 = vmatpush.msrb.mxu1 %v6342_v27  ;;  %2544 = vmatpush.msrb.mxu2 %v6069_v31 }
 0x2ec   :  { %v3767_v25 = vpop.permute.xlu2 %3766  ;;  %2569 = vmatpush.msra.mxu0 %v6054_v23  ;;  %2561 = vmatpush.msrb.mxu3 %v6103_v2 }
 0x2ed   :  { %v6345_v4 = vpop.permute.xlu1 %1984  ;;  %v1914_v62 = vpop.permute.xlu0 %1913  ;;  %v3768_v8 = vunpack.i.l.bf16 %v3767_v25  ;;  %2434 = vmatpush.msrb.mxu1 %v6361_v41 }
 0x2ee   :  { %v1930_v22 = vsel %vm138_vm6, %v1928_v14, %v1914_v62  ;;  %v3764_v14 = vunpack.i.h.bf16 %v6273_v0  ;;  %2570 = vmatpush.msra.mxu0 %v6077_v49  ;;  %v6380_v0 = vld [vmem:[%s7655_s3 + $0x188] sm:$0xff]  ;;  %2562 = vmatpush.msrb.mxu3 %v6121_v33 }
 0x2ef   :  { %3736 = vmatmul.msk.f32.gmra.mxu3 %vm144_vm7, %v1930_v22  ;;  %v2349_v43 = vsel %vm2348_vm9, %v2347_v12, %v3768_v8  ;;  %v6371_v12 = vld [vmem:[%s7655_s3 + $0x190] sm:$0xff]  ;;  %v3769_v22 = vunpack.i.h.bf16 %v3767_v25  ;;  %v6388_v25 = vld [vmem:[%s7654_s2] ss:$0 sm:$0xff] }
 0x2f0   :  { %2378 = vmatmul.f32.vlgmr.msra.gmra.mxu2 %v2349_v43  ;;  %2435 = vmatpush.msrb.mxu1 %v6371_v12  ;;  %v2351_v43 = vsel %vm144_vm7, %v2350_v18, %v3764_v14  ;;  %v7719_v18 = vld [vmem:[#allocation10_spill] sm:$0xff] }
 0x2f1   :  { %2695 = vmatpush.msra.mxu2 %v5866_v3  ;;  %2571 = vmatpush.msra.mxu0 %v6093_v46  ;;  %v2352_v59 = vsel %vm2348_vm9, %v2351_v43, %v3769_v22 }
 0x2f2   :  { %2436 = vmatpush.msrb.mxu1 %v6380_v0  ;;  %2563 = vmatpush.msrb.mxu3 %v6130_v15 }
 0x2f3   :  { %2696 = vmatpush.msra.mxu2 %v5871_v21  ;;  %2572 = vmatpush.msra.mxu0 %v6110_v50 }
 0x2f4   :  { %v1716_v20 = vpop.f32.mrf.mxu1  ;;  %2437 = vmatpush.msrb.mxu1 %v6404_v42  ;;  %2564 = vmatpush.msrb.mxu3 %v6150_v37 }
 0x2f5   :  { %v1717_v38 = vadd.f32 %v6388_v25, %v1716_v20  ;;  %v6391_v62 = vpop.permute.xlu1 %2103  ;;  %v6393_v8 = vpop.permute.xlu0 %2000  ;;  %2697 = vmatpush.msra.mxu2 %v5878_v30  ;;  %2573 = vmatpush.msra.mxu0 %v6138_v9  ;;  %v7725_v9 = vld [vmem:[#allocation25_spill] sm:$0xff] }
 0x2f6   :  { %2589 = vmatpush.msra.mxu1 %v6115_v61 }
 0x2f7   :  { %v1722_v20 = vmax.f32 %v1717_v38, 0.0  ;;  %2398 = vmatmul.f32.vlgmr.msra.gmra.mxu3 %v2352_v59  ;;  %2698 = vmatpush.msra.mxu2 %v5888_v57  ;;  %v7720_v38 = vld [vmem:[#allocation11_spill] sm:$0xff] }
 0x2f8   :  { %2715 = vmatpush.msra.mxu3 %v5907_v11  ;;  %2574 = vmatpush.msra.mxu0 %v6159_v34 }
 0x2f9   :  { %1724 = vst.msk [vmem:[#allocation2 + $0x75] sm:$0xff] %vm129_vm3, %v1722_v20  ;;  %2699 = vmatpush.msra.mxu2 %v5902_v1  ;;  %2590 = vmatpush.msra.mxu1 %v6143_v32  ;;  %v7721_v20 = vld [vmem:[#allocation23_spill] sm:$0xff]  ;;  %v7722_v32 = vld [vmem:[#allocation24_spill] sm:$0xff] }
 0x2fa   :  { %2716 = vmatpush.msra.mxu3 %v5919_v13  ;;  %2575 = vmatpush.msra.mxu0 %v6175_v39  ;;  %v7724_v13 = vld [vmem:[#allocation13_spill] sm:$0xff] }
 0x2fb   :  { %2700 = vmatpush.msra.mxu2 %v5914_v35  ;;  %2591 = vmatpush.msra.mxu1 %v6168_v5  ;;  %v7723_v35 = vld [vmem:[#allocation12_spill] sm:$0xff] }
 0x2fc   :  { %2717 = vmatpush.msra.mxu3 %v7720_v38  ;;  %2576 = vmatpush.msra.mxu0 %v7721_v20 }
 0x2fd   :  { %v6418_v14 = vpop.permute.xlu1 %2111  ;;  %v2009_v22 = vpop.permute.xlu0 %2008  ;;  %2701 = vmatpush.msra.mxu2 %v7719_v18  ;;  %2592 = vmatpush.msra.mxu1 %v7722_v32  ;;  %v7726_v18 = vld [vmem:[#allocation26_spill] sm:$0xff] }
 0x2fe   :  { %2718 = vmatpush.msra.mxu3 %v7724_v13  ;;  %2577 = vmatpush.msra.mxu0 %v7725_v9 }
 0x2ff   :  { %2702 = vmatpush.msra.mxu2 %v7723_v35  ;;  %2593 = vmatpush.msra.mxu1 %v7726_v18  ;;  %v2972_v18 = vld [vmem:[#allocation2 + $0x80] ss:$2 sm:$0x7] }
 0x300   :  { %v2964_v43 = vld [vmem:[#allocation2 + $0x77] ss:$2 sm:$0x7]  ;;  %v2962_v11 = vld [vmem:[#allocation2 + $0x76] ss:$2 sm:$0x7]  ;;  %2719 = vmatpush.msra.mxu3 %v5965_v45  ;;  %2578 = vmatpush.msra.mxu0 %v6219_v60 }
 0x301   :  { %v3119_v59 = vld [vmem:[#allocation2 + $0x77] ss:$2 sm:$0x7]  ;;  %v3118_v1 = vld [vmem:[#allocation2 + $0x76] ss:$2 sm:$0x7]  ;;  %2703 = vmatpush.msra.mxu2 %v5956_v28  ;;  %2594 = vmatpush.msra.mxu1 %v6228_v44 }
 0x302   :  { %v3895_v34 = vpack.i.bf16 %v2964_v43, %v3119_v59  ;;  %v3890_v39 = vpack.i.bf16 %v2962_v11, %v3118_v1  ;;  %v2966_v61 = vld [vmem:[#allocation2 + $0x78] ss:$2 sm:$0x7]  ;;  %v2033_v59 = vpop.permute.xlu2 %2032  ;;  %2720 = vmatpush.msra.mxu3 %v5979_v53  ;;  %2579 = vmatpush.msra.mxu0 %v6247_v17  ;;  %v2974_v45 = vld [vmem:[#allocation2 + $0x81] ss:$2 sm:$0x7] }
 0x303   :  { %v3120_v5 = vld [vmem:[#allocation2 + $0x78] ss:$2 sm:$0x7]  ;;  %2704 = vmatpush.msra.mxu2 %v5970_v47  ;;  %2595 = vmatpush.msra.mxu1 %v6252_v36 }
 0x304   :  { %3896 = vrot.lane.b32.xlu1 %v3895_v34, %s4062_s12  ;;  %v3900_v38 = vpack.i.bf16 %v2966_v61, %v3120_v5  ;;  %v1965_v43 = vld [vmem:[%s7652_s0 + $0x15c] sm:$0x1]  ;;  %3891 = vrot.lane.b32.xlu0 %v3890_v39, %s4059_s20  ;;  %v3123_v34 = vld [vmem:[#allocation2 + $0x80] ss:$2 sm:$0x7] }
 0x305   :  { %v2120_v1 = vpop.permute.xlu1 %2119  ;;  %v2017_v11 = vpop.permute.xlu0 %2016  ;;  %v2037_v28 = vsel %vm120_vm0, %v1965_v43, %v6345_v4  ;;  %v2970_v61 = vld [vmem:[#allocation2 + $0x7f] ss:$2 sm:$0x7]  ;;  %2705 = vmatpush.msra.mxu2 %v5984_v63  ;;  %2721 = vmatpush.msra.mxu3 %v5993_v52 }
 0x306   :  { %3901 = vrot.lane.b32.xlu2 %v3900_v38, %s4063_s15  ;;  %v3122_v5 = vld [vmem:[#allocation2 + $0x7f] ss:$2 sm:$0x7]  ;;  %v3910_v38 = vpack.i.bf16 %v2972_v18, %v3123_v34  ;;  %2580 = vmatpush.msra.mxu0 %v6262_v29 }
 0x307   :  { %v3124_v39 = vld [vmem:[#allocation2 + $0x81] ss:$2 sm:$0x7]  ;;  %v3905_v43 = vpack.i.bf16 %v2970_v61, %v3122_v5  ;;  %2596 = vmatpush.msra.mxu1 %v6267_v24  ;;  %2706 = vmatpush.msra.mxu2 %v6002_v6 }
 0x308   :  { %v7727_v47 = vld [vmem:[#allocation19_spill] sm:$0xff]  ;;  %v3915_v36 = vpack.i.bf16 %v2974_v45, %v3124_v39  ;;  %2722 = vmatpush.msra.mxu3 %v6007_v48  ;;  %2581 = vmatpush.msra.mxu0 %v6285_v26  ;;  %v7730_v39 = vld [vmem:[#allocation28_spill] sm:$0xff] }
 0x309   :  { %v2039_v4 = vsel %vm123_vm1, %v2037_v28, %v7727_v47  ;;  %2597 = vmatpush.msra.mxu1 %v6294_v19  ;;  %2707 = vmatpush.msra.mxu2 %v6017_v58 }
 0x30a   :  { %v2041_v53 = vsel %vm126_vm2, %v2039_v4, %v6393_v8  ;;  %v2152_v8 = vpop.permute.xlu2 %2151  ;;  %2723 = vmatpush.msra.mxu3 %v6022_v7  ;;  %2582 = vmatpush.msra.mxu0 %v6302_v51 }
 0x30b   :  { %v2043_v63 = vsel %vm129_vm3, %v2041_v53, %v2009_v22  ;;  %v2084_v22 = vld [vmem:[%s7652_s0 + $0x170] sm:$0x1]  ;;  %2598 = vmatpush.msra.mxu1 %v6309_v54 }
 0x30c   :  { %3911 = vrot.lane.b32.xlu1 %v3910_v38, %s4062_s12  ;;  %3906 = vrot.lane.b32.xlu0 %v3905_v43, %s4059_s20  ;;  %v1600_v18 = vpop.f32.mrf.mxu0  ;;  %v2045_v34 = vsel %vm132_vm4, %v2043_v63, %v2017_v11  ;;  %v7729_v11 = vld [vmem:[#allocation15_spill] sm:$0xff]  ;;  %v2156_v58 = vsel %vm120_vm0, %v2084_v22, %v6391_v62 }
 0x30d   :  { %v2128_v28 = vpop.permute.xlu1 %2127  ;;  %v2025_v61 = vpop.permute.xlu0 %2024  ;;  %2724 = vmatpush.msra.mxu3 %v7729_v11  ;;  %2583 = vmatpush.msra.mxu0 %v7730_v39  ;;  %v2445_v11 = vld [vmem:[#allocation2 + $0x12] ss:$2 sm:$0x7] }
 0x30e   :  { %3916 = vrot.lane.b32.xlu2 %v3915_v36, %s4063_s15  ;;  %v2047_v5 = vsel %vm135_vm5, %v2045_v34, %v2025_v61  ;;  %v7728_v36 = vld [vmem:[#allocation14_spill] sm:$0xff]  ;;  %2599 = vmatpush.msra.mxu1 %v6328_v10 }
 0x30f   :  { %v2049_v45 = vsel %vm138_vm6, %v2047_v5, %v2033_v59  ;;  %2708 = vmatpush.msra.mxu2 %v7728_v36  ;;  %v2158_v59 = vsel %vm123_vm1, %v2156_v58, %v6418_v14  ;;  %2725 = vmatpush.msra.mxu3 %v6064_v56  ;;  %v2283_v58 = vld [vmem:[#allocation2 + $0x12] ss:$2 sm:$0x7] }
 0x310   :  { %3738 = vmatmul.msk.f32.gmra.mxu0 %vm144_vm7, %v2049_v45  ;;  %v2160_v47 = vsel %vm126_vm2, %v2158_v59, %v2120_v1  ;;  %2600 = vmatpush.msra.mxu1 %v6342_v27 }
 0x311   :  { %2709 = vmatpush.msra.mxu2 %v6049_v40  ;;  %2584 = vmatpush.msra.mxu0 %v6335_v55  ;;  %v2162_v62 = vsel %vm129_vm3, %v2160_v47, %v2128_v28 }
 0x312   :  { %v1954_v7 = vpop.f32.mrf.mxu3  ;;  %2726 = vmatpush.msra.mxu3 %v6084_v16  ;;  %2601 = vmatpush.msra.mxu1 %v6361_v41  ;;  %v3782_v1 = vpop.permute.xlu2 %3781 }
 0x313   :  { %v1955_v38 = vadd.f32 %v6388_v25, %v1954_v7  ;;  %2710 = vmatpush.msra.mxu2 %v6069_v31  ;;  %v3784_v59 = vunpack.i.h.bf16 %v3782_v1 }
 0x314   :  { %2727 = vmatpush.msra.mxu3 %v6103_v2  ;;  %2602 = vmatpush.msra.mxu1 %v6371_v12 }
 0x315   :  { %v1960_v4 = vmax.f32 %v1955_v38, 0.0  ;;  %v2144_v43 = vpop.permute.xlu1 %2143  ;;  %v2136_v53 = vpop.permute.xlu0 %2135  ;;  %v3783_v38 = vunpack.i.l.bf16 %v3782_v1 }
 0x316   :  { %v2164_v14 = vsel %vm132_vm4, %v2162_v62, %v2136_v53  ;;  %2728 = vmatpush.msra.mxu3 %v6121_v33  ;;  %2603 = vmatpush.msra.mxu1 %v6380_v0 }
 0x317   :  { %1962 = vst.msk [vmem:[#allocation2 + $0x87] sm:$0xff] %vm129_vm3, %v1960_v4  ;;  %v2166_v63 = vsel %vm135_vm5, %v2164_v14, %v2144_v43 }
 0x318   :  { %v2168_v18 = vsel %vm138_vm6, %v2166_v63, %v2152_v8  ;;  %2729 = vmatpush.msra.mxu3 %v6130_v15  ;;  %2604 = vmatpush.msra.mxu1 %v6404_v42 }
 0x319   :  { %3740 = vmatmul.msk.f32.gmra.mxu1 %vm144_vm7, %v2168_v18 }
 0x31a   :  { %2730 = vmatpush.msra.mxu3 %v6150_v37  ;;  %v3797_v14 = vpop.permute.xlu2 %3796 }
 0x31d   :  { %v3777_v34 = vpop.permute.xlu1 %3776  ;;  %v3772_v28 = vpop.permute.xlu0 %3771 }
 0x31e   :  { %v3779_v61 = vunpack.i.h.bf16 %v3777_v34  ;;  %v3778_v5 = vunpack.i.l.bf16 %v3777_v34  ;;  %v3774_v22 = vunpack.i.h.bf16 %v3772_v28  ;;  %v3773_v8 = vunpack.i.l.bf16 %v3772_v28  ;;  %v2073_v45 = vpop.f32.mrf.mxu0 }
 0x31f   :  { %v2074_v7 = vadd.f32 %v6388_v25, %v2073_v45  ;;  %v3799_v45 = vunpack.i.h.bf16 %v3797_v14 }
 0x320   :  { %v2353_v47 = vsel %vm129_vm3, %v2283_v58, %v3774_v22  ;;  %v2517_v62 = vsel %vm129_vm3, %v2445_v11, %v3773_v8  ;;  %v2449_v8 = vld [vmem:[#allocation2 + $0x1b] ss:$2 sm:$0x7]  ;;  %v3798_v11 = vunpack.i.l.bf16 %v3797_v14  ;;  %v7731_v14 = vld [vmem:[#allocation17_spill] sm:$0xff] }
 0x321   :  { %v2079_v4 = vmax.f32 %v2074_v7, 0.0  ;;  %v2354_v43 = vsel %vm144_vm7, %v2353_v47, %v3779_v61  ;;  %v2518_v53 = vsel %vm144_vm7, %v2517_v62, %v3778_v5  ;;  %v2291_v5 = vld [vmem:[#allocation2 + $0x1b] ss:$2 sm:$0x7] }
 0x322   :  { %v2355_v63 = vsel %vm2348_vm9, %v2354_v43, %v3784_v59  ;;  %v2519_v18 = vsel %vm2348_vm9, %v2518_v53, %v3783_v38  ;;  %v3130_v59 = vld [vmem:[#allocation2 + $0x89] ss:$2 sm:$0x7]  ;;  %v3812_v53 = vpop.permute.xlu2 %3811 }
 0x323   :  { %2081 = vst.msk [vmem:[#allocation2 + $0x90] sm:$0xff] %vm129_vm3, %v2079_v4  ;;  %2418 = vmatmul.f32.vlgmr.msrb.gmra.mxu0 %v2355_v63  ;;  %2545 = vmatmul.f32.vlgmr.msrb.gmra.mxu2 %v2519_v18  ;;  %v3132_v4 = vld [vmem:[#allocation2 + $0x8a] ss:$2 sm:$0x7] }
 0x324   :  { %2735 = vmatpush.msrb.mxu0 %v6054_v23  ;;  %2869 = vmatpush.msrb.mxu2 %v5866_v3  ;;  %v7732_v63 = vld [vmem:[#allocation16_spill] sm:$0xff] }
 0x325   :  { %v3792_v25 = vpop.permute.xlu1 %3791  ;;  %v3787_v1 = vpop.permute.xlu0 %3786  ;;  %v7733_v18 = vld [vmem:[#allocation8_spill] sm:$0xff] }
 0x326   :  { %v3794_v34 = vunpack.i.h.bf16 %v3792_v25  ;;  %v3793_v28 = vunpack.i.l.bf16 %v3792_v25  ;;  %v3789_v61 = vunpack.i.h.bf16 %v3787_v1  ;;  %v3788_v22 = vunpack.i.l.bf16 %v3787_v1  ;;  %2736 = vmatpush.msrb.mxu0 %v6077_v49  ;;  %2870 = vmatpush.msrb.mxu2 %v5871_v21  ;;  %v3128_v49 = vld [vmem:[#allocation2 + $0x88] ss:$2 sm:$0x7] }
 0x328   :  { %v2356_v58 = vsel %vm129_vm3, %v2291_v5, %v3789_v61  ;;  %v2520_v23 = vsel %vm129_vm3, %v2449_v8, %v3788_v22  ;;  %2737 = vmatpush.msrb.mxu0 %v6093_v46  ;;  %2871 = vmatpush.msrb.mxu2 %v5878_v30  ;;  %v2462_v5 = vld [vmem:[#allocation2 + $0x2d] ss:$2 sm:$0x7]  ;;  %v2454_v8 = vld [vmem:[#allocation2 + $0x24] ss:$2 sm:$0x7] }
 0x329   :  { %v2357_v3 = vsel %vm144_vm7, %v2356_v58, %v3794_v34  ;;  %v2521_v7 = vsel %vm144_vm7, %v2520_v23, %v3793_v28 }
 0x32a   :  { %2738 = vmatpush.msrb.mxu0 %v6110_v50  ;;  %2872 = vmatpush.msrb.mxu2 %v5888_v57  ;;  %v2358_v21 = vsel %vm2348_vm9, %v2357_v3, %v3799_v45  ;;  %v2522_v38 = vsel %vm2348_vm9, %v2521_v7, %v3798_v11  ;;  %v3138_v47 = vld [vmem:[#allocation2 + $0x92] ss:$2 sm:$0x7]  ;;  %v3136_v62 = vld [vmem:[#allocation2 + $0x91] ss:$2 sm:$0x7]  ;;  %v3813_v11 = vunpack.i.l.bf16 %v3812_v53 }
 0x32b   :  { %2438 = vmatmul.f32.vlgmr.msrb.gmra.mxu1 %v2358_v21  ;;  %2565 = vmatmul.f32.vlgmr.msrb.gmra.mxu3 %v2522_v38  ;;  %v3925_v46 = vpack.i.bf16 %v3138_v47, %v3130_v59  ;;  %v3920_v30 = vpack.i.bf16 %v3136_v62, %v3128_v49  ;;  %v3140_v43 = vld [vmem:[#allocation2 + $0x93] ss:$2 sm:$0x7]  ;;  %v7735_v45 = vld [vmem:[#allocation20_spill] sm:$0xff]  ;;  %v3814_v59 = vunpack.i.h.bf16 %v3812_v53 }
 0x32c   :  { %2739 = vmatpush.msrb.mxu0 %v7731_v14  ;;  %2755 = vmatpush.msrb.mxu1 %v7732_v63  ;;  %v3930_v50 = vpack.i.bf16 %v3140_v43, %v3132_v4  ;;  %v7734_v57 = vld [vmem:[#allocation9_spill] sm:$0xff]  ;;  %v7736_v3 = vld [vmem:[#allocation18_spill] sm:$0xff] }
 0x32d   :  { %2873 = vmatpush.msrb.mxu2 %v7733_v18  ;;  %2889 = vmatpush.msrb.mxu3 %v7734_v57  ;;  %v3807_v25 = vpop.permute.xlu1 %3806  ;;  %v3802_v1 = vpop.permute.xlu0 %3801  ;;  %v6541_v7 = vld [vmem:[%s7655_s3 + $0x50] sm:$0xff]  ;;  %v6564_v4 = vld [vmem:[%s7655_s3 + $0xe8] sm:$0xff] }
 0x32e   :  { %3926 = vrot.lane.b32.xlu1 %v3925_v46, %s4062_s12  ;;  %v3809_v34 = vunpack.i.h.bf16 %v3807_v25  ;;  %v3808_v28 = vunpack.i.l.bf16 %v3807_v25  ;;  %3921 = vrot.lane.b32.xlu0 %v3920_v30, %s4059_s20  ;;  %v3804_v61 = vunpack.i.h.bf16 %v3802_v1  ;;  %v3803_v22 = vunpack.i.l.bf16 %v3802_v1  ;;  %v6547_v49 = vld [vmem:[%s7655_s3 + $0xf0] sm:$0xff]  ;;  %v6557_v46 = vld [vmem:[%s7655_s3 + $0x48] sm:$0xff]  ;;  %v3827_v18 = vpop.permute.xlu2 %3826 }
 0x32f   :  { %3931 = vrot.lane.b32.xlu2 %v3930_v50, %s4063_s15  ;;  %2740 = vmatpush.msrb.mxu0 %v7735_v45  ;;  %v7737_v21 = vld [vmem:[#allocation22_spill] sm:$0xff]  ;;  %v7738_v62 = vld [vmem:[#allocation21_spill] sm:$0xff]  ;;  %v2611_v1 = vld [vmem:[#allocation2 + $0x24] ss:$2 sm:$0x7] }
 0x330   :  { %v2526_v58 = vsel %vm129_vm3, %v2462_v5, %v3804_v61  ;;  %v2523_v23 = vsel %vm129_vm3, %v2454_v8, %v3803_v22  ;;  %2756 = vmatpush.msrb.mxu1 %v7736_v3  ;;  %2874 = vmatpush.msrb.mxu2 %v6541_v7  ;;  %v7739_v61 = vld [vmem:[#allocation26_spill] sm:$0xff] }
 0x331   :  { %2890 = vmatpush.msrb.mxu3 %v6547_v49  ;;  %2741 = vmatpush.msrb.mxu0 %v7737_v21  ;;  %v2524_v38 = vsel %vm144_vm7, %v2523_v23, %v3808_v28  ;;  %v2527_v47 = vsel %vm144_vm7, %v2526_v58, %v3809_v34  ;;  %v6583_v22 = vld [vmem:[%s7655_s3 + $0xd8] sm:$0xff]  ;;  %v6593_v58 = vld [vmem:[%s7655_s3 + $0x30] sm:$0xff] }
 0x332   :  { %2757 = vmatpush.msrb.mxu1 %v7738_v62  ;;  %2875 = vmatpush.msrb.mxu2 %v6557_v46  ;;  %v2525_v30 = vsel %vm2348_vm9, %v2524_v38, %v3813_v11  ;;  %v2528_v43 = vsel %vm2348_vm9, %v2527_v47, %v3814_v59  ;;  %v3828_v11 = vunpack.i.l.bf16 %v3827_v18  ;;  %v3829_v38 = vunpack.i.h.bf16 %v3827_v18  ;;  %v6601_v47 = vld [vmem:[%s7655_s3 + $0xd0] sm:$0xff] }
 0x333   :  { %2891 = vmatpush.msrb.mxu3 %v6564_v4  ;;  %2742 = vmatpush.msrb.mxu0 %v7721_v20 }
 0x334   :  { %2758 = vmatpush.msrb.mxu1 %v7722_v32  ;;  %2876 = vmatpush.msrb.mxu2 %v7723_v35  ;;  %v1719_v53 = vpop.f32.mrf.mxu1  ;;  %v6577_v35 = vld [vmem:[%s7655_s3 + $0x38] sm:$0xff] }
 0x335   :  { %2892 = vmatpush.msrb.mxu3 %v7724_v13  ;;  %2585 = vmatmul.f32.vlgmr.msra.gmra.mxu0 %v2525_v30  ;;  %v3822_v63 = vpop.permute.xlu1 %3821  ;;  %v3817_v50 = vpop.permute.xlu0 %3816  ;;  %v2615_v13 = vld [vmem:[#allocation2 + $0x2d] ss:$2 sm:$0x7]  ;;  %v7740_v30 = vld [vmem:[#allocation27_spill] sm:$0xff] }
 0x336   :  { %2605 = vmatmul.f32.vlgmr.msra.gmra.mxu1 %v2528_v43  ;;  %2743 = vmatpush.msrb.mxu0 %v7725_v9  ;;  %v3824_v57 = vunpack.i.h.bf16 %v3822_v63  ;;  %v3823_v25 = vunpack.i.l.bf16 %v3822_v63  ;;  %v3819_v34 = vunpack.i.h.bf16 %v3817_v50  ;;  %v3818_v28 = vunpack.i.l.bf16 %v3817_v50  ;;  %v6609_v43 = vld [vmem:[%s7655_s3 + $0x28] sm:$0xff] }
 0x337   :  { %2759 = vmatpush.msrb.mxu1 %v7739_v61  ;;  %2877 = vmatpush.msrb.mxu2 %v6577_v35 }
 0x338   :  { %2893 = vmatpush.msrb.mxu3 %v6583_v22  ;;  %v2686_v5 = vsel %vm129_vm3, %v2615_v13, %v3819_v34  ;;  %v2683_v8 = vsel %vm129_vm3, %v2611_v1, %v3818_v28  ;;  %2744 = vmatpush.msrb.mxu0 %v6219_v60  ;;  %v2620_v34 = vld [vmem:[#allocation2 + $0x36] ss:$2 sm:$0x7]  ;;  %v2778_v28 = vld [vmem:[#allocation2 + $0x51] ss:$2 sm:$0x7]  ;;  %v3842_v13 = vpop.permute.xlu2 %3841 }
 0x339   :  { %2760 = vmatpush.msrb.mxu1 %v6228_v44  ;;  %2878 = vmatpush.msrb.mxu2 %v6593_v58  ;;  %v2684_v23 = vsel %vm144_vm7, %v2683_v8, %v3823_v25  ;;  %v2687_v59 = vsel %vm144_vm7, %v2686_v5, %v3824_v57  ;;  %v6632_v8 = vld [vmem:[%s7655_s3 + $0xb8] sm:$0xff] }
 0x33a   :  { %2894 = vmatpush.msrb.mxu3 %v6601_v47  ;;  %2745 = vmatpush.msrb.mxu0 %v6247_v17  ;;  %v2685_v53 = vsel %vm2348_vm9, %v2684_v23, %v3828_v11  ;;  %v2688_v63 = vsel %vm2348_vm9, %v2687_v59, %v3829_v38  ;;  %v3844_v23 = vunpack.i.h.bf16 %v3842_v13  ;;  %v6642_v59 = vld [vmem:[%s7655_s3 + $0xb0] sm:$0xff] }
 0x33b   :  { %2761 = vmatpush.msrb.mxu1 %v7740_v30  ;;  %2879 = vmatpush.msrb.mxu2 %v6609_v43 }
 0x33c   :  { %2895 = vmatpush.msrb.mxu3 %v5993_v52  ;;  %2746 = vmatpush.msrb.mxu0 %v6262_v29 }
 0x33d   :  { %2762 = vmatpush.msrb.mxu1 %v6267_v24  ;;  %2880 = vmatpush.msrb.mxu2 %v6002_v6  ;;  %v3837_v50 = vpop.permute.xlu1 %3836  ;;  %v3832_v18 = vpop.permute.xlu0 %3831  ;;  %v6624_v6 = vld [vmem:[%s7655_s3 + $0x18] sm:$0xff] }
 0x33e   :  { %2896 = vmatpush.msrb.mxu3 %v6007_v48  ;;  %2711 = vmatmul.f32.vlgmr.msra.gmra.mxu2 %v2685_v53  ;;  %v3839_v57 = vunpack.i.h.bf16 %v3837_v50  ;;  %v3834_v25 = vunpack.i.h.bf16 %v3832_v18  ;;  %v3833_v1 = vunpack.i.l.bf16 %v3832_v18  ;;  %v3838_v52 = vunpack.i.l.bf16 %v3837_v50 }
 0x33f   :  { %2731 = vmatmul.f32.vlgmr.msra.gmra.mxu3 %v2688_v63  ;;  %2747 = vmatpush.msrb.mxu0 %v6285_v26  ;;  %v3843_v53 = vunpack.i.l.bf16 %v3842_v13 }
 0x340   :  { %2763 = vmatpush.msrb.mxu1 %v6294_v19  ;;  %2881 = vmatpush.msrb.mxu2 %v6624_v6  ;;  %v2689_v48 = vsel %vm129_vm3, %v2620_v34, %v3834_v25  ;;  %v2857_v5 = vsel %vm129_vm3, %v2778_v28, %v3833_v1  ;;  %v2786_v34 = vld [vmem:[#allocation2 + $0x5a] ss:$2 sm:$0x7]  ;;  %v3857_v13 = vpop.permute.xlu2 %3856 }
 0x341   :  { %2897 = vmatpush.msrb.mxu3 %v6632_v8  ;;  %2748 = vmatpush.msrb.mxu0 %v6302_v51  ;;  %v2690_v11 = vsel %vm144_vm7, %v2689_v48, %v3839_v57  ;;  %v2858_v38 = vsel %vm144_vm7, %v2857_v5, %v3838_v52  ;;  %v2628_v52 = vld [vmem:[#allocation2 + $0x3f] ss:$2 sm:$0x7]  ;;  %v6674_v48 = vld [vmem:[%s7655_s3 + $0x170] sm:$0xff] }
 0x342   :  { %2764 = vmatpush.msrb.mxu1 %v6309_v54  ;;  %2882 = vmatpush.msrb.mxu2 %v7728_v36  ;;  %v2691_v36 = vsel %vm2348_vm9, %v2690_v11, %v3844_v23  ;;  %v2859_v18 = vsel %vm2348_vm9, %v2858_v38, %v3843_v53  ;;  %v6681_v11 = vld [vmem:[%s7655_s3 + $0x70] sm:$0xff]  ;;  %v3859_v38 = vunpack.i.h.bf16 %v3857_v13  ;;  %v6696_v53 = vld [vmem:[%s7655_s3 + $0x68] sm:$0xff] }
 0x343   :  { %2898 = vmatpush.msrb.mxu3 %v6642_v59  ;;  %2749 = vmatpush.msrb.mxu0 %v7730_v39 }
 0x344   :  { %2765 = vmatpush.msrb.mxu1 %v6328_v10  ;;  %2883 = vmatpush.msrb.mxu2 %v6049_v40  ;;  %v6659_v40 = vld [vmem:[%s7655_s3 + $0x178] sm:$0xff] }
 0x345   :  { %2899 = vmatpush.msrb.mxu3 %v6064_v56  ;;  %2750 = vmatpush.msrb.mxu0 %v6335_v55  ;;  %v3852_v63 = vpop.permute.xlu1 %3851  ;;  %v3847_v50 = vpop.permute.xlu0 %3846  ;;  %v6665_v56 = vld [vmem:[%s7655_s3 + $0x78] sm:$0xff] }
 0x346   :  { %2766 = vmatpush.msrb.mxu1 %v6342_v27  ;;  %2884 = vmatpush.msrb.mxu2 %v6069_v31  ;;  %v3849_v57 = vunpack.i.h.bf16 %v3847_v50  ;;  %v3848_v25 = vunpack.i.l.bf16 %v3847_v50  ;;  %v2192_v1 = vpop.f32.mrf.mxu1  ;;  %v3854_v31 = vunpack.i.h.bf16 %v3852_v63  ;;  %v6711_v50 = vld [vmem:[%s7655_s3 + $0x60] sm:$0xff] }
 0x347   :  { %2900 = vmatpush.msrb.mxu3 %v6084_v16  ;;  %2909 = vmatpush.msra.mxu0 %v6659_v40  ;;  %v3853_v16 = vunpack.i.l.bf16 %v3852_v63  ;;  %v6705_v63 = vld [vmem:[%s7655_s3 + $0x160] sm:$0xff] }
 0x348   :  { %3035 = vmatpush.msra.mxu2 %v6665_v56  ;;  %2751 = vmatmul.f32.vlgmr.msrb.gmra.mxu0 %v2691_v36  ;;  %v2692_v28 = vsel %vm129_vm3, %v2628_v52, %v3849_v57  ;;  %v2860_v5 = vsel %vm129_vm3, %v2786_v34, %v3848_v25  ;;  %v3858_v36 = vunpack.i.l.bf16 %v3857_v13  ;;  %v6722_v57 = vld [vmem:[%s7655_s3 + $0x1f8] sm:$0xff] }
 0x349   :  { %2767 = vmatpush.msrb.mxu1 %v6361_v41  ;;  %2885 = vmatmul.f32.vlgmr.msrb.gmra.mxu2 %v2859_v18  ;;  %v2693_v23 = vsel %vm144_vm7, %v2692_v28, %v3854_v31  ;;  %v6728_v25 = vld [vmem:[%s7655_s3 + $0x58] sm:$0xff]  ;;  %v2951_v31 = vld [vmem:[#allocation2 + $0x63] ss:$2 sm:$0x7] }
 0x34a   :  { %2901 = vmatpush.msrb.mxu3 %v6103_v2  ;;  %2910 = vmatpush.msra.mxu0 %v6674_v48  ;;  %v6689_v2 = vld [vmem:[%s7655_s3 + $0x168] sm:$0xff]  ;;  %v2694_v18 = vsel %vm2348_vm9, %v2693_v23, %v3859_v38  ;;  %v6850_v38 = vld [vmem:[%s7655_s3 + $0xa0] sm:$0xff] }
 0x34b   :  { %3036 = vmatpush.msra.mxu2 %v6681_v11  ;;  %2768 = vmatpush.msrb.mxu1 %v6371_v12 }
 0x34c   :  { %2902 = vmatpush.msrb.mxu3 %v6121_v33  ;;  %2911 = vmatpush.msra.mxu0 %v6689_v2  ;;  %v2861_v33 = vsel %vm144_vm7, %v2860_v5, %v3853_v16  ;;  %v6843_v5 = vld [vmem:[%s7655_s3] sm:$0xff] }
 0x34d   :  { %3037 = vmatpush.msra.mxu2 %v6696_v53  ;;  %2769 = vmatpush.msrb.mxu1 %v6380_v0  ;;  %v6743_v1 = vpop.permute.xlu1 %3866 }
 0x34e   :  { %2903 = vmatpush.msrb.mxu3 %v6130_v15  ;;  %2912 = vmatpush.msra.mxu0 %v6705_v63  ;;  %v2862_v15 = vsel %vm2348_vm9, %v2861_v33, %v3858_v36  ;;  %v2802_v33 = vld [vmem:[#allocation2 + $0x6c] ss:$2 sm:$0x7] }
 0x34f   :  { %3038 = vmatpush.msra.mxu2 %v6711_v50  ;;  %2770 = vmatpush.msrb.mxu1 %v6404_v42 }
 0x350   :  { %2904 = vmatpush.msrb.mxu3 %v6150_v37  ;;  %2913 = vmatpush.msra.mxu0 %v7731_v14  ;;  %v6734_v37 = vld [vmem:[%s7655_s3 + $0xf8] sm:$0xff]  ;;  %v6737_v14 = vpop.permute.xlu0 %3861 }
 0x351   :  { %2929 = vmatpush.msra.mxu1 %v6722_v57  ;;  %3039 = vmatpush.msra.mxu2 %v6728_v25  ;;  %v3864_v13 = vunpack.i.h.bf16 %v6737_v14 }
 0x352   :  { %3055 = vmatpush.msra.mxu3 %v6734_v37  ;;  %2771 = vmatmul.f32.vlgmr.msrb.gmra.mxu1 %v2694_v18 }
 0x353   :  { %2905 = vmatmul.f32.vlgmr.msrb.gmra.mxu3 %v2862_v15  ;;  %2914 = vmatpush.msra.mxu0 %v7735_v45  ;;  %v6754_v45 = vld [vmem:[%s7655_s3 + $0x40] sm:$0xff]  ;;  %v2866_v18 = vsel %vm129_vm3, %v2802_v33, %v3864_v13  ;;  %v7046_v33 = vld [vmem:[%s7655_s3 + $0x1a8] sm:$0xff] }
 0x354   :  { %2930 = vmatpush.msra.mxu1 %v7736_v3  ;;  %3040 = vmatpush.msra.mxu2 %v6541_v7  ;;  %v6760_v3 = vld [vmem:[%s7655_s3 + $0xe0] sm:$0xff] }
 0x355   :  { %3056 = vmatpush.msra.mxu3 %v6547_v49  ;;  %2915 = vmatpush.msra.mxu0 %v7737_v21  ;;  %v6764_v21 = vpop.permute.xlu2 %3871 }
 0x356   :  { %2931 = vmatpush.msra.mxu1 %v7738_v62  ;;  %3041 = vmatpush.msra.mxu2 %v6557_v46  ;;  %v3868_v62 = vunpack.i.l.bf16 %v6743_v1  ;;  %v3873_v34 = vunpack.i.l.bf16 %v6764_v21 }
 0x357   :  { %3057 = vmatpush.msra.mxu3 %v6564_v4  ;;  %2916 = vmatpush.msra.mxu0 %v7721_v20  ;;  %v6779_v20 = vpop.permute.xlu1 %3881 }
 0x358   :  { %2932 = vmatpush.msra.mxu1 %v7722_v32  ;;  %3042 = vmatpush.msra.mxu2 %v6754_v45  ;;  %v6772_v32 = vpop.permute.xlu0 %3876  ;;  %v3884_v15 = vunpack.i.h.bf16 %v6779_v20 }
 0x359   :  { %3058 = vmatpush.msra.mxu3 %v6760_v3  ;;  %2917 = vmatpush.msra.mxu0 %v7725_v9  ;;  %v3863_v9 = vunpack.i.l.bf16 %v6737_v14  ;;  %v2955_v14 = vld [vmem:[#allocation2 + $0x6c] ss:$2 sm:$0x7] }
 0x35a   :  { %2933 = vmatpush.msra.mxu1 %v7739_v61  ;;  %3043 = vmatpush.msra.mxu2 %v6577_v35  ;;  %v2794_v61 = vld [vmem:[#allocation2 + $0x63] ss:$2 sm:$0x7] }
 0x35b   :  { %3059 = vmatpush.msra.mxu3 %v6583_v22  ;;  %2918 = vmatpush.msra.mxu0 %v6219_v60  ;;  %v3878_v60 = vunpack.i.l.bf16 %v6772_v32 }
 0x35c   :  { %2934 = vmatpush.msra.mxu1 %v6228_v44  ;;  %3044 = vmatpush.msra.mxu2 %v6593_v58  ;;  %v6785_v44 = vld [vmem:[%s7655_s3 + $0xc8] sm:$0xff] }
 0x35d   :  { %3060 = vmatpush.msra.mxu3 %v6601_v47  ;;  %2919 = vmatpush.msra.mxu0 %v6247_v17  ;;  %v6793_v17 = vld [vmem:[%s7655_s3 + $0x20] sm:$0xff]  ;;  %v3023_v52 = vsel %vm129_vm3, %v2951_v31, %v3878_v60  ;;  %v3887_v16 = vpop.permute.xlu2 %3886 }
 0x35e   :  { %2935 = vmatpush.msra.mxu1 %v7740_v30  ;;  %3045 = vmatpush.msra.mxu2 %v6609_v43  ;;  %v6800_v30 = vld [vmem:[%s7655_s3 + $0xc0] sm:$0xff]  ;;  %v3888_v28 = vunpack.i.l.bf16 %v3887_v16 }
 0x35f   :  { %3061 = vmatpush.msra.mxu3 %v6785_v44  ;;  %2920 = vmatpush.msra.mxu0 %v6262_v29  ;;  %v2863_v29 = vsel %vm129_vm3, %v2794_v61, %v3863_v9  ;;  %v3874_v9 = vunpack.i.h.bf16 %v6764_v21  ;;  %v6959_v61 = vld [vmem:[%s7655_s3 + $0x1d8] sm:$0xff]  ;;  %v7001_v31 = vld [vmem:[%s7655_s3 + $0x1c0] sm:$0xff] }
 0x360   :  { %2936 = vmatpush.msra.mxu1 %v6267_v24  ;;  %3046 = vmatpush.msra.mxu2 %v6793_v17  ;;  %v3883_v24 = vunpack.i.l.bf16 %v6779_v20  ;;  %v6885_v20 = vld [vmem:[%s7655_s3 + $0x88] sm:$0xff] }
 0x361   :  { %3062 = vmatpush.msra.mxu3 %v6800_v30  ;;  %2921 = vmatpush.msra.mxu0 %v6285_v26  ;;  %v6815_v26 = vld [vmem:[%s7655_s3 + $0x10] sm:$0xff] }
 0x362   :  { %2937 = vmatpush.msra.mxu1 %v6294_v19  ;;  %3047 = vmatpush.msra.mxu2 %v6624_v6  ;;  %v2864_v19 = vsel %vm144_vm7, %v2863_v29, %v3868_v62  ;;  %v6917_v62 = vld [vmem:[%s7655_s3 + $0x1f0] sm:$0xff] }
 0x363   :  { %3063 = vmatpush.msra.mxu3 %v6632_v8  ;;  %2922 = vmatpush.msra.mxu0 %v6302_v51  ;;  %v6826_v51 = vld [vmem:[%s7655_s3 + $0x8] sm:$0xff]  ;;  %v2865_v23 = vsel %vm2348_vm9, %v2864_v19, %v3873_v34  ;;  %v3117_v34 = vld [vmem:[#allocation2 + $0x75] ss:$2 sm:$0x7] }
 0x364   :  { %2938 = vmatpush.msra.mxu1 %v6309_v54  ;;  %3048 = vmatpush.msra.mxu2 %v6815_v26  ;;  %v3024_v54 = vsel %vm144_vm7, %v3023_v52, %v3883_v24  ;;  %v6987_v24 = vld [vmem:[%s7655_s3 + $0x1c8] sm:$0xff] }
 0x365   :  { %3064 = vmatpush.msra.mxu3 %v6642_v59  ;;  %2923 = vmatpush.msra.mxu0 %v7730_v39  ;;  %v6834_v39 = vld [vmem:[%s7655_s3 + $0xa8] sm:$0xff] }
 0x366   :  { %2939 = vmatpush.msra.mxu1 %v6328_v10  ;;  %3049 = vmatpush.msra.mxu2 %v6826_v51  ;;  %v3879_v10 = vunpack.i.h.bf16 %v6772_v32 }
 0x367   :  { %3065 = vmatpush.msra.mxu3 %v6834_v39  ;;  %2924 = vmatpush.msra.mxu0 %v6335_v55  ;;  %v3025_v55 = vsel %vm2348_vm9, %v3024_v54, %v3888_v28  ;;  %v7025_v28 = vld [vmem:[%s7655_s3 + $0x110] sm:$0xff] }
 0x368   :  { %2940 = vmatpush.msra.mxu1 %v6342_v27  ;;  %3050 = vmatpush.msra.mxu2 %v6843_v5  ;;  %v3869_v27 = vunpack.i.h.bf16 %v6743_v1  ;;  %v3026_v32 = vsel %vm129_vm3, %v2955_v14, %v3879_v10  ;;  %v6864_v1 = vld [vmem:[%s7655_s3 + $0x98] sm:$0xff]  ;;  %v7031_v10 = vld [vmem:[%s7655_s3 + $0x1b0] sm:$0xff] }
 0x369   :  { %3066 = vmatpush.msra.mxu3 %v6850_v38  ;;  %2925 = vmatmul.f32.vlgmr.msra.gmra.mxu0 %v2865_v23 }
 0x36a   :  { %3051 = vmatmul.f32.vlgmr.msra.gmra.mxu2 %v3025_v55  ;;  %3075 = vmatpush.msrb.mxu0 %v6659_v40  ;;  %v1838_v36 = vpop.f32.mrf.mxu2 }
 0x36b   :  { %3201 = vmatpush.msrb.mxu2 %v6665_v56  ;;  %2941 = vmatpush.msra.mxu1 %v6361_v41  ;;  %v6873_v56 = vld [vmem:[%s7655_s3 + $0x90] sm:$0xff]  ;;  %v2867_v41 = vsel %vm144_vm7, %v2866_v18, %v3869_v27  ;;  %v7055_v18 = vld [vmem:[%s7655_s3 + $0x100] sm:$0xff] }
 0x36c   :  { %3067 = vmatpush.msra.mxu3 %v6864_v1  ;;  %3076 = vmatpush.msrb.mxu0 %v6674_v48 }
 0x36d   :  { %3202 = vmatpush.msrb.mxu2 %v6681_v11  ;;  %2942 = vmatpush.msra.mxu1 %v6371_v12  ;;  %v3027_v11 = vsel %vm144_vm7, %v3026_v32, %v3884_v15  ;;  %v3889_v12 = vunpack.i.h.bf16 %v3887_v16  ;;  %v2960_v16 = vld [vmem:[#allocation2 + $0x75] ss:$2 sm:$0x7]  ;;  %v7061_v15 = vld [vmem:[%s7655_s3 + $0x1a0] sm:$0xff] }
 0x36e   :  { %3068 = vmatpush.msra.mxu3 %v6873_v56  ;;  %3077 = vmatpush.msrb.mxu0 %v6689_v2 }
 0x36f   :  { %3203 = vmatpush.msrb.mxu2 %v6696_v53  ;;  %2943 = vmatpush.msra.mxu1 %v6380_v0  ;;  %v2868_v53 = vsel %vm2348_vm9, %v2867_v41, %v3874_v9  ;;  %v6895_v0 = vld [vmem:[%s7655_s3 + $0x80] sm:$0xff]  ;;  %v3028_v21 = vsel %vm2348_vm9, %v3027_v11, %v3889_v12  ;;  %v7072_v12 = vld [vmem:[%s7655_s3 + $0x198] sm:$0xff] }
 0x370   :  { %3069 = vmatpush.msra.mxu3 %v6885_v20  ;;  %3078 = vmatpush.msrb.mxu0 %v6705_v63  ;;  %v3121_v9 = vld [vmem:[#allocation2 + $0x7e] ss:$2 sm:$0x7] }
 0x371   :  { %3204 = vmatpush.msrb.mxu2 %v6711_v50  ;;  %2944 = vmatpush.msra.mxu1 %v6404_v42  ;;  %v6902_v50 = vld [vmem:[%s7655_s3 + $0x158] sm:$0xff]  ;;  %v6911_v42 = vld [vmem:[%s7655_s3 + $0x150] sm:$0xff] }
 0x372   :  { %3070 = vmatpush.msra.mxu3 %v6895_v0  ;;  %2945 = vmatmul.f32.vlgmr.msra.gmra.mxu1 %v2868_v53  ;;  %v1957_v60 = vpop.f32.mrf.mxu3 }
 0x373   :  { %3071 = vmatmul.f32.vlgmr.msra.gmra.mxu3 %v3028_v21  ;;  %3079 = vmatpush.msrb.mxu0 %v6902_v50  ;;  %v7081_v21 = vld [vmem:[%s7655_s3 + $0x190] sm:$0xff] }
 0x374   :  { %3095 = vmatpush.msrb.mxu1 %v6722_v57  ;;  %3205 = vmatpush.msrb.mxu2 %v6728_v25  ;;  %v6925_v25 = vld [vmem:[%s7655_s3 + $0x148] sm:$0xff] }
 0x375   :  { %3221 = vmatpush.msrb.mxu3 %v6734_v37  ;;  %3080 = vmatpush.msrb.mxu0 %v6911_v42  ;;  %v6931_v37 = vld [vmem:[%s7655_s3 + $0x1e8] sm:$0xff] }
 0x376   :  { %3096 = vmatpush.msrb.mxu1 %v6917_v62  ;;  %3206 = vmatpush.msrb.mxu2 %v6541_v7  ;;  %v6939_v7 = vld [vmem:[%s7655_s3 + $0x140] sm:$0xff]  ;;  %v3897_v29 = vpop.permute.xlu1 %3896 }
 0x377   :  { %3222 = vmatpush.msrb.mxu3 %v6547_v49  ;;  %3081 = vmatpush.msrb.mxu0 %v6925_v25  ;;  %v6945_v49 = vld [vmem:[%s7655_s3 + $0x1e0] sm:$0xff]  ;;  %v3899_v52 = vunpack.i.h.bf16 %v3897_v29  ;;  %v3898_v19 = vunpack.i.l.bf16 %v3897_v29 }
 0x378   :  { %3097 = vmatpush.msrb.mxu1 %v6931_v37  ;;  %3207 = vmatpush.msrb.mxu2 %v6557_v46  ;;  %v6953_v46 = vld [vmem:[%s7655_s3 + $0x138] sm:$0xff] }
 0x379   :  { %3223 = vmatpush.msrb.mxu3 %v6564_v4  ;;  %3082 = vmatpush.msrb.mxu0 %v6939_v7  ;;  %v3892_v4 = vpop.permute.xlu0 %3891 }
 0x37a   :  { %3098 = vmatpush.msrb.mxu1 %v6945_v49  ;;  %3208 = vmatpush.msrb.mxu2 %v6754_v45  ;;  %v6967_v45 = vld [vmem:[%s7655_s3 + $0x130] sm:$0xff] }
 0x37b   :  { %3224 = vmatpush.msrb.mxu3 %v6760_v3  ;;  %3083 = vmatpush.msrb.mxu0 %v6953_v46  ;;  %v6973_v3 = vld [vmem:[%s7655_s3 + $0x1d0] sm:$0xff] }
 0x37c   :  { %3099 = vmatpush.msrb.mxu1 %v6959_v61  ;;  %3209 = vmatpush.msrb.mxu2 %v6577_v35  ;;  %v6981_v35 = vld [vmem:[%s7655_s3 + $0x128] sm:$0xff] }
 0x37d   :  { %3225 = vmatpush.msrb.mxu3 %v6583_v22  ;;  %3084 = vmatpush.msrb.mxu0 %v6967_v45  ;;  %v3894_v22 = vunpack.i.h.bf16 %v3892_v4 }
 0x37e   :  { %3100 = vmatpush.msrb.mxu1 %v6973_v3  ;;  %3210 = vmatpush.msrb.mxu2 %v6593_v58  ;;  %v3893_v58 = vunpack.i.l.bf16 %v3892_v4  ;;  %v3912_v55 = vpop.permute.xlu1 %3911 }
 0x37f   :  { %3226 = vmatpush.msrb.mxu3 %v6601_v47  ;;  %3085 = vmatpush.msrb.mxu0 %v6981_v35  ;;  %v6995_v47 = vld [vmem:[%s7655_s3 + $0x120] sm:$0xff]  ;;  %v3029_v54 = vsel %vm129_vm3, %v2960_v16, %v3894_v22  ;;  %v3914_v14 = vunpack.i.h.bf16 %v3912_v55  ;;  %v3913_v41 = vunpack.i.l.bf16 %v3912_v55 }
 0x380   :  { %3101 = vmatpush.msrb.mxu1 %v6987_v24  ;;  %3211 = vmatpush.msrb.mxu2 %v6609_v43  ;;  %v3902_v43 = vpop.permute.xlu2 %3901 }
 0x381   :  { %3227 = vmatpush.msrb.mxu3 %v6785_v44  ;;  %3086 = vmatpush.msrb.mxu0 %v6995_v47  ;;  %v7009_v44 = vld [vmem:[%s7655_s3 + $0x118] sm:$0xff]  ;;  %v3907_v13 = vpop.permute.xlu0 %3906  ;;  %v3904_v23 = vunpack.i.h.bf16 %v3902_v43 }
 0x382   :  { %3102 = vmatpush.msrb.mxu1 %v7001_v31  ;;  %3212 = vmatpush.msrb.mxu2 %v6793_v17  ;;  %v7016_v17 = vld [vmem:[%s7655_s3 + $0x1b8] sm:$0xff]  ;;  %v3909_v27 = vunpack.i.h.bf16 %v3907_v13  ;;  %v3908_v36 = vunpack.i.l.bf16 %v3907_v13 }
 0x383   :  { %3228 = vmatpush.msrb.mxu3 %v6800_v30  ;;  %3087 = vmatpush.msrb.mxu0 %v7009_v44  ;;  %v3189_v30 = vsel %vm129_vm3, %v3117_v34, %v3893_v58 }
 0x384   :  { %3103 = vmatpush.msrb.mxu1 %v7016_v17  ;;  %3213 = vmatpush.msrb.mxu2 %v6624_v6  ;;  %v7039_v6 = vld [vmem:[%s7655_s3 + $0x108] sm:$0xff]  ;;  %v3192_v53 = vsel %vm129_vm3, %v3121_v9, %v3908_v36 }
 0x385   :  { %3229 = vmatpush.msrb.mxu3 %v6632_v8  ;;  %3088 = vmatpush.msrb.mxu0 %v7025_v28  ;;  %v3030_v8 = vsel %vm144_vm7, %v3029_v54, %v3899_v52  ;;  %v3134_v52 = vld [vmem:[#allocation2 + $0x90] ss:$2 sm:$0x7] }
 0x386   :  { %3104 = vmatpush.msrb.mxu1 %v7031_v10  ;;  %3214 = vmatpush.msrb.mxu2 %v6815_v26  ;;  %v3903_v26 = vunpack.i.l.bf16 %v3902_v43 }
 0x387   :  { %3230 = vmatpush.msrb.mxu3 %v6642_v59  ;;  %3089 = vmatpush.msrb.mxu0 %v7039_v6  ;;  %v3190_v59 = vsel %vm144_vm7, %v3189_v30, %v3898_v19 }
 0x388   :  { %3105 = vmatpush.msrb.mxu1 %v7046_v33  ;;  %3215 = vmatpush.msrb.mxu2 %v6826_v51  ;;  %v3031_v51 = vsel %vm2348_vm9, %v3030_v8, %v3904_v23  ;;  %v3191_v32 = vsel %vm2348_vm9, %v3190_v59, %v3903_v26 }
 0x389   :  { %3231 = vmatpush.msrb.mxu3 %v6834_v39  ;;  %3090 = vmatpush.msrb.mxu0 %v7055_v18  ;;  %v2968_v39 = vld [vmem:[#allocation2 + $0x7e] ss:$2 sm:$0x7] }
 0x38a   :  { %3106 = vmatpush.msrb.mxu1 %v7061_v15  ;;  %3216 = vmatpush.msrb.mxu2 %v6843_v5  ;;  %v3032_v11 = vsel %vm129_vm3, %v2968_v39, %v3909_v27  ;;  %v3917_v5 = vpop.permute.xlu2 %3916 }
 0x38b   :  { %3232 = vmatpush.msrb.mxu3 %v6850_v38  ;;  %3091 = vmatmul.f32.vlgmr.msrb.gmra.mxu0 %v3031_v51  ;;  %v3033_v60 = vsel %vm144_vm7, %v3032_v11, %v3914_v14  ;;  %v3919_v4 = vunpack.i.h.bf16 %v3917_v5  ;;  %v3918_v29 = vunpack.i.l.bf16 %v3917_v5 }
 0x38c   :  { %3217 = vmatmul.f32.vlgmr.msrb.gmra.mxu2 %v3191_v32  ;;  %3107 = vmatpush.msrb.mxu1 %v7072_v12 }
 0x38d   :  { %3233 = vmatpush.msrb.mxu3 %v6864_v1  ;;  %3241 = vmatpush.msra.mxu0 %v6659_v40  ;;  %v2076_v38 = vpop.f32.mrf.mxu0  ;;  %v7090_v1 = vld [vmem:[%s7655_s3 + $0x188] sm:$0xff]  ;;  %v3193_v40 = vsel %vm144_vm7, %v3192_v53, %v3913_v41 }
 0x38e   :  { %3108 = vmatpush.msrb.mxu1 %v7081_v21  ;;  %v3194_v22 = vsel %vm2348_vm9, %v3193_v40, %v3918_v29  ;;  %v7157_v38 = vld [vmem:[%s7657_s5 + $0x78] sm:$0xff]  ;;  %v7169_v40 = vld [vmem:[%s7657_s5 + $0x68] sm:$0xff]  ;;  %v7176_v29 = vld [vmem:[%s7657_s5 + $0x60] sm:$0xff] }
 0x38f   :  { %3234 = vmatpush.msrb.mxu3 %v6873_v56  ;;  %3242 = vmatpush.msra.mxu0 %v6674_v48  ;;  %v7099_v56 = vld [vmem:[%s7655_s3 + $0x180] sm:$0xff]  ;;  %v3034_v48 = vsel %vm2348_vm9, %v3033_v60, %v3919_v4  ;;  %v7163_v4 = vld [vmem:[%s7657_s5 + $0x70] sm:$0xff] }
 0x390   :  { %3109 = vmatpush.msrb.mxu1 %v7090_v1  ;;  %3388 = vmatpush.msra.mxu2 %v7157_v38 }
 0x391   :  { %3235 = vmatpush.msrb.mxu3 %v6885_v20  ;;  %3243 = vmatpush.msra.mxu0 %v6689_v2 }
 0x392   :  { %3110 = vmatpush.msrb.mxu1 %v7099_v56  ;;  %3389 = vmatpush.msra.mxu2 %v7163_v4 }
 0x393   :  { %3236 = vmatpush.msrb.mxu3 %v6895_v0  ;;  %3111 = vmatmul.f32.vlgmr.msrb.gmra.mxu1 %v3034_v48  ;;  %v7188_v48 = vld [vmem:[%s7657_s5 + $0x50] sm:$0xff] }
 0x394   :  { %3237 = vmatmul.f32.vlgmr.msrb.gmra.mxu3 %v3194_v22  ;;  %3261 = vmatpush.msra.mxu1 %v6722_v57  ;;  %v2379_v57 = vpop.f32.mrf.mxu2  ;;  %v7193_v22 = vld [vmem:[%s7657_s5 + $0xf8] sm:$0xff] }
 0x395   :  { %3244 = vmatpush.msra.mxu0 %v6705_v63  ;;  %v7119_v63 = vld [vmem:[%s7656_s4] ss:$0 sm:$0xff]  ;;  %3390 = vmatpush.msra.mxu2 %v7169_v40  ;;  %s4064_s4 = smov [#allocation5]  }
 0x396   :  { %3262 = vmatpush.msra.mxu1 %v6917_v62  ;;  %v2195_v2 = vpop.f32.mrf.mxu1  ;;  %v2380_v62 = vadd.f32 %v7119_v63, %v2379_v57  ;;  %3408 = vmatpush.msra.mxu3 %v7193_v22  ;;  %v7205_v57 = vld [vmem:[%s7657_s5 + $0xf0] sm:$0xff] }
 0x397   :  { %3245 = vmatpush.msra.mxu0 %v6902_v50  ;;  %3391 = vmatpush.msra.mxu2 %v7176_v29  ;;  %v7198_v2 = vld [vmem:[%s7657_s5 + $0x48] sm:$0xff] }
 0x398   :  { %3263 = vmatpush.msra.mxu1 %v6931_v37  ;;  %v3126_v37 = vld [vmem:[#allocation2 + $0x87] ss:$2 sm:$0x7]  ;;  %3409 = vmatpush.msra.mxu3 %v7205_v57 }
 0x399   :  { %3246 = vmatpush.msra.mxu0 %v6911_v42  ;;  %v2399_v42 = vpop.f32.mrf.mxu3 }
 0x39a   :  { %3264 = vmatpush.msra.mxu1 %v6945_v49  ;;  %v2400_v49 = vadd.f32 %v2399_v42, %v2380_v62 }
 0x39b   :  { %3247 = vmatpush.msra.mxu0 %v6925_v25 }
 0x39c   :  { %3265 = vmatpush.msra.mxu1 %v6959_v61  ;;  %v3932_v61 = vpop.permute.xlu2 %3931 }
 0x39d   :  { %3248 = vmatpush.msra.mxu0 %v6939_v7  ;;  %v3933_v58 = vunpack.i.l.bf16 %v3932_v61 }
 0x39e   :  { %3266 = vmatpush.msra.mxu1 %v6973_v3 }
 0x39f   :  { %3249 = vmatpush.msra.mxu0 %v6953_v46 }
 0x3a0   :  { %3267 = vmatpush.msra.mxu1 %v6987_v24  ;;  %v3922_v20 = vpop.permute.xlu0 %3921  ;;  %v3927_v0 = vpop.permute.xlu1 %3926 }
 0x3a1   :  { %3250 = vmatpush.msra.mxu0 %v6967_v45  ;;  %v3923_v50 = vunpack.i.l.bf16 %v3922_v20  ;;  %v3928_v25 = vunpack.i.l.bf16 %v3927_v0  ;;  %v2419_v7 = vpop.f32.mrf.mxu0  ;;  %v3924_v3 = vunpack.i.h.bf16 %v3922_v20  ;;  %v3929_v43 = vunpack.i.h.bf16 %v3927_v0  ;;  %v7210_v20 = vld [vmem:[%s7657_s5 + $0x40] sm:$0xff]  ;;  %v7215_v0 = vld [vmem:[%s7657_s5 + $0xe8] sm:$0xff] }
 0x3a2   :  { %3268 = vmatpush.msra.mxu1 %v7001_v31  ;;  %v2420_v45 = vadd.f32 %v2419_v7, %v2400_v49  ;;  %3410 = vmatpush.msra.mxu3 %v7215_v0  ;;  %v7237_v7 = vld [vmem:[%s7657_s5 + $0x30] sm:$0xff]  ;;  %v7242_v49 = vld [vmem:[%s7657_s5 + $0xd8] sm:$0xff] }
 0x3a3   :  { %3251 = vmatpush.msra.mxu0 %v6981_v35  ;;  %v3195_v46 = vsel %vm129_vm3, %v3126_v37, %v3923_v50  ;;  %v3198_v19 = vsel %vm129_vm3, %v3134_v52, %v3924_v3  ;;  %v7227_v37 = vld [vmem:[%s7657_s5 + $0xe0] sm:$0xff]  ;;  %v7264_v3 = vld [vmem:[%s7657_s5 + $0xc8] sm:$0xff]  ;;  %v7300_v52 = vld [vmem:[%s7657_s5 + $0xb0] sm:$0xff] }
 0x3a4   :  { %3269 = vmatpush.msra.mxu1 %v7016_v17  ;;  %v3196_v35 = vsel %vm144_vm7, %v3195_v46, %v3928_v25  ;;  %v3199_v17 = vsel %vm144_vm7, %v3198_v19, %v3929_v43  ;;  %v7222_v25 = vld [vmem:[%s7657_s5 + $0x38] sm:$0xff]  ;;  %3411 = vmatpush.msra.mxu3 %v7227_v37  ;;  %v7247_v46 = vld [vmem:[%s7657_s5 + $0x28] sm:$0xff] }
 0x3a5   :  { %3252 = vmatpush.msra.mxu0 %v6995_v47  ;;  %v3197_v16 = vsel %vm2348_vm9, %v3196_v35, %v3933_v58  ;;  %v7271_v35 = vld [vmem:[%s7657_s5 + $0x18] sm:$0xff]  ;;  %v7283_v58 = vld [vmem:[%s7657_s5 + $0x10] sm:$0xff]  ;;  %v7295_v43 = vld [vmem:[%s7657_s5 + $0x8] sm:$0xff] }
 0x3a6   :  { %3270 = vmatpush.msra.mxu1 %v7031_v10  ;;  %v2546_v47 = vpop.f32.mrf.mxu2  ;;  %3412 = vmatpush.msra.mxu3 %v7242_v49 }
 0x3a7   :  { %3253 = vmatpush.msra.mxu0 %v7009_v44  ;;  %v2547_v34 = vadd.f32 %v7119_v63, %v2546_v47 }
 0x3a8   :  { %3271 = vmatpush.msra.mxu1 %v7046_v33  ;;  %v2439_v24 = vpop.f32.mrf.mxu1 }
 0x3a9   :  { %3254 = vmatpush.msra.mxu0 %v7025_v28  ;;  %v2440_v31 = vadd.f32 %v2439_v24, %v2420_v45  ;;  %v3934_v28 = vunpack.i.h.bf16 %v3932_v61  ;;  %v7252_v61 = vld [vmem:[%s7657_s5 + $0xd0] sm:$0xff]  ;;  %v7259_v45 = vld [vmem:[%s7657_s5 + $0x20] sm:$0xff] }
 0x3aa   :  { %3272 = vmatpush.msra.mxu1 %v7061_v15  ;;  %3413 = vmatpush.msra.mxu3 %v7252_v61  ;;  %v7276_v24 = vld [vmem:[%s7657_s5 + $0xc0] sm:$0xff] }
 0x3ab   :  { %3255 = vmatpush.msra.mxu0 %v7039_v6  ;;  %v2442_v44 = vmax.f32 %v2440_v31, 0.0  ;;  %v3200_v13 = vsel %vm2348_vm9, %v3199_v17, %v3934_v28  ;;  %v7288_v31 = vld [vmem:[%s7657_s5 + $0xb8] sm:$0xff] }
 0x3ac   :  { %3273 = vmatpush.msra.mxu1 %v7072_v12  ;;  %3414 = vmatpush.msra.mxu3 %v7264_v3  ;;  %v7320_v17 = vld [vmem:[%s7657_s5 + $0x238] sm:$0xff] }
 0x3ad   :  { %3256 = vmatpush.msra.mxu0 %v7055_v18  ;;  %2444 = vst.msk [vmem:[#allocation3] sm:$0x7] %vm2443_vm10, %v2442_v44  ;;  %v7307_v44 = vld [vmem:[%s7657_s5] sm:$0xff] }
 0x3ae   :  { %3274 = vmatpush.msra.mxu1 %v7081_v21  ;;  %3257 = vmatmul.f32.vlgmr.msra.gmra.mxu0 %v3197_v16  ;;  %v2566_v54 = vpop.f32.mrf.mxu3 }
 0x3af   :  { %v2567_v30 = vadd.f32 %v2566_v54, %v2547_v34  ;;  %3415 = vmatpush.msra.mxu3 %v7276_v24  ;;  %v7315_v54 = vld [vmem:[%s7657_s5 + $0xa8] sm:$0xff] }
 0x3b0   :  { %3275 = vmatpush.msra.mxu1 %v7090_v1 }
 0x3b1   :  { %3416 = vmatpush.msra.mxu3 %v7288_v31 }
 0x3b2   :  { %3276 = vmatpush.msra.mxu1 %v7099_v56  ;;  %v2586_v10 = vpop.f32.mrf.mxu0  ;;  %v7182_v56 = vld [vmem:[%s7657_s5 + $0x58] sm:$0xff] }
 0x3b3   :  { %3277 = vmatmul.f32.vlgmr.msra.gmra.mxu1 %v3200_v13  ;;  %v2587_v6 = vadd.f32 %v2586_v10, %v2567_v30  ;;  %v2606_v8 = vpop.f32.mrf.mxu1  ;;  %3392 = vmatpush.msra.mxu2 %v7182_v56  ;;  %v7328_v13 = vld [vmem:[%s7657_s5 + $0xa0] sm:$0xff]  ;;  %v7333_v10 = vld [vmem:[%s7657_s5 + $0x230] sm:$0xff] }
 0x3b4   :  { %v3357_v23 = vld [vmem:[#allocation3 + $0x1] sm:$0x1]  ;;  %3417 = vmatpush.msra.mxu3 %v7300_v52 }
 0x3b5   :  { %v2607_v55 = vadd.f32 %v2606_v8, %v2587_v6  ;;  %3366 = vrot.lane.b32.xlu0 %v3357_v23, %s4062_s12  ;;  %3393 = vmatpush.msra.mxu2 %v7188_v48  ;;  %v7340_v23 = vld [vmem:[%s7657_s5 + $0x98] sm:$0xff] }
 0x3b6   :  { %3418 = vmatpush.msra.mxu3 %v7315_v54 }
 0x3b7   :  { %v2609_v27 = vmax.f32 %v2607_v55, 0.0  ;;  %3394 = vmatpush.msra.mxu2 %v7198_v2  ;;  %v7345_v55 = vld [vmem:[%s7657_s5 + $0x228] sm:$0xff] }
 0x3b8   :  { %3419 = vmatpush.msra.mxu3 %v7328_v13 }
 0x3b9   :  { %2610 = vst.msk [vmem:[#allocation3 + $0x3] sm:$0x7] %vm2443_vm10, %v2609_v27  ;;  %3395 = vmatpush.msra.mxu2 %v7210_v20 }
 0x3ba   :  { %3420 = vmatpush.msra.mxu3 %v7340_v23 }
 0x3bb   :  { %3396 = vmatpush.msra.mxu2 %v7222_v25 }
 0x3bd   :  { %3397 = vmatpush.msra.mxu2 %v7237_v7 }
 0x3bf   :  { %3398 = vmatpush.msra.mxu2 %v7247_v46 }
 0x3c0   :  { %v3359_v33 = vld [vmem:[#allocation3 + $0x3] sm:$0x1]  ;;  %v3361_v50 = vld [vmem:[#allocation3 + $0x5] sm:$0x1] }
 0x3c1   :  { %3370 = vrot.lane.b32.xlu1 %v3359_v33, %s4062_s12  ;;  %v2712_v59 = vpop.f32.mrf.mxu2  ;;  %3399 = vmatpush.msra.mxu2 %v7259_v45  ;;  %v7352_v33 = vld [vmem:[%s7657_s5 + $0x90] sm:$0xff] }
 0x3c2   :  { %v2713_v26 = vadd.f32 %v7119_v63, %v2712_v59  ;;  %v2732_v36 = vpop.f32.mrf.mxu3  ;;  %v7357_v59 = vld [vmem:[%s7657_s5 + $0x220] sm:$0xff]  ;;  %3421 = vmatpush.msra.mxu3 %v7352_v33 }
 0x3c3   :  { %3400 = vmatpush.msra.mxu2 %v7271_v35 }
 0x3c4   :  { %v2733_v18 = vadd.f32 %v2732_v36, %v2713_v26  ;;  %v7365_v26 = vld [vmem:[%s7657_s5 + $0x88] sm:$0xff]  ;;  %v7370_v36 = vld [vmem:[%s7657_s5 + $0x218] sm:$0xff] }
 0x3c5   :  { %v2752_v15 = vpop.f32.mrf.mxu0  ;;  %3401 = vmatpush.msra.mxu2 %v7283_v58  ;;  %3422 = vmatpush.msra.mxu3 %v7365_v26 }
 0x3c6   :  { %v2753_v51 = vadd.f32 %v2752_v15, %v2733_v18  ;;  %v7375_v18 = vld [vmem:[%s7657_s5 + $0x80] sm:$0xff]  ;;  %v7382_v15 = vld [vmem:[%s7657_s5 + $0x210] sm:$0xff] }
 0x3c7   :  { %3402 = vmatpush.msra.mxu2 %v7295_v43  ;;  %3423 = vmatpush.msra.mxu3 %v7375_v18 }
 0x3c9   :  { %3403 = vmatpush.msra.mxu2 %v7307_v44  ;;  %3522 = vmatpush.msrb.mxu3 %v7157_v38 }
 0x3cb   :  { %3476 = vmatpush.msrb.mxu2 %v7320_v17  ;;  %3523 = vmatpush.msrb.mxu3 %v7163_v4  ;;  %v7439_v4 = vld [vmem:[%s7657_s5 + $0x150] sm:$0xff] }
 0x3cc   :  { %v2886_v41 = vpop.f32.mrf.mxu2 }
 0x3cd   :  { %v2887_v11 = vadd.f32 %v7119_v63, %v2886_v41  ;;  %3477 = vmatpush.msrb.mxu2 %v7333_v10  ;;  %3524 = vmatpush.msrb.mxu3 %v7169_v40 }
 0x3cf   :  { %v2772_v14 = vpop.f32.mrf.mxu1  ;;  %3478 = vmatpush.msrb.mxu2 %v7345_v55  ;;  %3525 = vmatpush.msrb.mxu3 %v7176_v29 }
 0x3d0   :  { %v2773_v39 = vadd.f32 %v2772_v14, %v2753_v51  ;;  %v7387_v51 = vld [vmem:[%s7657_s5 + $0x208] sm:$0xff]  ;;  %v7395_v14 = vld [vmem:[%s7657_s5 + $0x200] sm:$0xff] }
 0x3d1   :  { %3479 = vmatpush.msrb.mxu2 %v7357_v59  ;;  %3526 = vmatpush.msrb.mxu3 %v7182_v56  ;;  %v7448_v56 = vld [vmem:[%s7657_s5 + $0x148] sm:$0xff] }
 0x3d2   :  { %v2775_v32 = vmax.f32 %v2773_v39, 0.0 }
 0x3d3   :  { %3480 = vmatpush.msrb.mxu2 %v7370_v36  ;;  %3527 = vmatpush.msrb.mxu3 %v7188_v48 }
 0x3d4   :  { %2776 = vst.msk [vmem:[#allocation3 + $0x6] sm:$0x7] %vm2443_vm10, %v2775_v32 }
 0x3d5   :  { %3481 = vmatpush.msrb.mxu2 %v7382_v15  ;;  %3528 = vmatpush.msrb.mxu3 %v7198_v2 }
 0x3d6   :  { %v2906_v9 = vpop.f32.mrf.mxu3 }
 0x3d7   :  { %v2907_v5 = vadd.f32 %v2906_v9, %v2887_v11  ;;  %3482 = vmatpush.msrb.mxu2 %v7387_v51  ;;  %v7406_v9 = vld [vmem:[%s7657_s5 + $0x178] sm:$0xff]  ;;  %v7411_v11 = vld [vmem:[%s7657_s5 + $0x170] sm:$0xff]  ;;  %3529 = vmatpush.msrb.mxu3 %v7210_v20  ;;  %v7455_v20 = vld [vmem:[%s7657_s5 + $0x140] sm:$0xff] }
 0x3d8   :  { %3428 = vmatpush.msrb.mxu0 %v7406_v9 }
 0x3d9   :  { %3483 = vmatpush.msrb.mxu2 %v7395_v14  ;;  %3530 = vmatpush.msrb.mxu3 %v7222_v25 }
 0x3da   :  { %3429 = vmatpush.msrb.mxu0 %v7411_v11 }
 0x3db   :  { %3531 = vmatpush.msrb.mxu3 %v7237_v7  ;;  %v3364_v25 = vld [vmem:[#allocation3 + $0x8] sm:$0x1] }
 0x3dd   :  { %3532 = vmatpush.msrb.mxu3 %v7247_v46  ;;  %v7477_v46 = vld [vmem:[%s7657_s5 + $0x128] sm:$0xff] }
 0x3df   :  { %3533 = vmatpush.msrb.mxu3 %v7259_v45 }
 0x3e1   :  { %3534 = vmatpush.msrb.mxu3 %v7271_v35  ;;  %v7492_v35 = vld [vmem:[%s7657_s5 + $0x118] sm:$0xff] }
 0x3e3   :  { %3535 = vmatpush.msrb.mxu3 %v7283_v58  ;;  %v7499_v58 = vld [vmem:[%s7657_s5 + $0x110] sm:$0xff] }
 0x3e5   :  { %3536 = vmatpush.msrb.mxu3 %v7295_v43  ;;  %v7514_v43 = vld [vmem:[%s7657_s5 + $0x100] sm:$0xff] }
 0x3e6   :  { %v2926_v12 = vpop.f32.mrf.mxu0 }
 0x3e7   :  { %v2927_v53 = vadd.f32 %v2926_v12, %v2907_v5  ;;  %v7418_v12 = vld [vmem:[%s7657_s5 + $0x168] sm:$0xff]  ;;  %v7425_v5 = vld [vmem:[%s7657_s5 + $0x160] sm:$0xff]  ;;  %3537 = vmatpush.msrb.mxu3 %v7307_v44 }
 0x3e8   :  { %3430 = vmatpush.msrb.mxu0 %v7418_v12 }
 0x3ea   :  { %3431 = vmatpush.msrb.mxu0 %v7425_v5 }
 0x3ed   :  { %v3052_v47 = vpop.f32.mrf.mxu2 }
 0x3ee   :  { %v3053_v19 = vadd.f32 %v7119_v63, %v3052_v47 }
 0x3ef   :  { %v2946_v21 = vpop.f32.mrf.mxu1 }
 0x3f0   :  { %v2947_v60 = vadd.f32 %v2946_v21, %v2927_v53  ;;  %v7432_v53 = vld [vmem:[%s7657_s5 + $0x158] sm:$0xff] }
 0x3f1   :  { %3432 = vmatpush.msrb.mxu0 %v7432_v53 }
 0x3f2   :  { %v2949_v1 = vmax.f32 %v2947_v60, 0.0  ;;  %v3356_v60 = vld [vmem:[#allocation3] sm:$0x1] }
 0x3f3   :  { %3433 = vmatpush.msrb.mxu0 %v7439_v4 }
 0x3f4   :  { %2950 = vst.msk [vmem:[#allocation3 + $0x9] sm:$0x7] %vm2443_vm10, %v2949_v1 }
 0x3f5   :  { %3434 = vmatpush.msrb.mxu0 %v7448_v56 }
 0x3f6   :  { %v3072_v16 = vpop.f32.mrf.mxu3 }
 0x3f7   :  { %v3073_v30 = vadd.f32 %v3072_v16, %v3053_v19  ;;  %3435 = vmatpush.msrb.mxu0 %v7455_v20  ;;  %v3358_v16 = vld [vmem:[#allocation3 + $0x2] sm:$0x1]  ;;  %v7484_v19 = vld [vmem:[%s7657_s5 + $0x120] sm:$0xff] }
 0x3fb   :  { %v3491_v42 = vld [vmem:[#allocation3 + $0xa] sm:$0x1] }
 0x3fc   :  { %v3935_v62 = vpack.i.bf16 %v3491_v42, %v3361_v50  ;;  %v7462_v50 = vld [vmem:[%s7657_s5 + $0x138] sm:$0xff]  ;;  %v7469_v42 = vld [vmem:[%s7657_s5 + $0x130] sm:$0xff] }
 0x3fd   :  { %3436 = vmatpush.msrb.mxu0 %v7462_v50 }
 0x3fe   :  { %3936 = vrot.lane.b32.xlu2 %v3935_v62, %s4062_s12 }
 0x3ff   :  { %3437 = vmatpush.msrb.mxu0 %v7469_v42 }
 0x401   :  { %3438 = vmatpush.msrb.mxu0 %v7477_v46 }
 0x403   :  { %3439 = vmatpush.msrb.mxu0 %v7484_v19 }
 0x405   :  { %3440 = vmatpush.msrb.mxu0 %v7492_v35 }
 0x407   :  { %3441 = vmatpush.msrb.mxu0 %v7499_v58 }
 0x408   :  { %v3092_v34 = vpop.f32.mrf.mxu0 }
 0x409   :  { %v3093_v28 = vadd.f32 %v3092_v34, %v3073_v30  ;;  %v7507_v30 = vld [vmem:[%s7657_s5 + $0x108] sm:$0xff] }
 0x40a   :  { %3442 = vmatpush.msrb.mxu0 %v7507_v30 }
 0x40c   :  { %3443 = vmatpush.msrb.mxu0 %v7514_v43 }
 0x40e   :  { %3542 = vmatpush.msra.mxu0 %v7193_v22  ;;  %v3344_v22 = vld [vmem:[%s7657_s5 + $0x1e8] sm:$0xff] }
 0x40f   :  { %v3218_v38 = vpop.f32.mrf.mxu2 }
 0x410   :  { %v3112_v6 = vpop.f32.mrf.mxu1  ;;  %v3219_v29 = vadd.f32 %v7119_v63, %v3218_v38  ;;  %3543 = vmatpush.msra.mxu0 %v7205_v57  ;;  %v3343_v57 = vld [vmem:[%s7657_s5 + $0x1e0] sm:$0xff] }
 0x411   :  { %v3113_v8 = vadd.f32 %v3112_v6, %v3093_v28  ;;  %v3363_v28 = vld [vmem:[#allocation3 + $0x7] sm:$0x1] }
 0x412   :  { %3544 = vmatpush.msra.mxu0 %v7215_v0  ;;  %v3342_v0 = vld [vmem:[%s7657_s5 + $0x1d8] sm:$0xff] }
 0x413   :  { %v3115_v27 = vmax.f32 %v3113_v8, 0.0 }
 0x414   :  { %3545 = vmatpush.msra.mxu0 %v7227_v37  ;;  %v3341_v37 = vld [vmem:[%s7657_s5 + $0x1d0] sm:$0xff] }
 0x415   :  { %3116 = vst.msk [vmem:[#allocation3 + $0xc] sm:$0x7] %vm2443_vm10, %v3115_v27  ;;  %v3490_v27 = vld [vmem:[#allocation3 + $0x9] sm:$0x1] }
 0x416   :  { %3546 = vmatpush.msra.mxu0 %v7242_v49  ;;  %v3340_v49 = vld [vmem:[%s7657_s5 + $0x1c8] sm:$0xff] }
 0x417   :  { %v3238_v1 = vpop.f32.mrf.mxu3 }
 0x418   :  { %v3239_v48 = vadd.f32 %v3238_v1, %v3219_v29  ;;  %3547 = vmatpush.msra.mxu0 %v7252_v61  ;;  %v3339_v61 = vld [vmem:[%s7657_s5 + $0x1c0] sm:$0xff]  ;;  %v3628_v1 = vld [vmem:[%s7659_s7 + $0x18] sm:$0xff]  ;;  %v3626_v29 = vld [vmem:[%s7659_s7 + $0x8] sm:$0xff] }
 0x41a   :  { %3548 = vmatpush.msra.mxu0 %v7264_v3  ;;  %v3338_v3 = vld [vmem:[%s7657_s5 + $0x1b8] sm:$0xff] }
 0x41c   :  { %v3493_v39 = vld [vmem:[#allocation3 + $0xc] sm:$0x1]  ;;  %v3495_v32 = vld [vmem:[#allocation3 + $0xe] sm:$0x1]  ;;  %3549 = vmatpush.msra.mxu0 %v7276_v24 }
 0x41d   :  { %v3945_v41 = vpack.i.bf16 %v3495_v32, %v3493_v39  ;;  %v3337_v24 = vld [vmem:[%s7657_s5 + $0x1b0] sm:$0xff] }
 0x41e   :  { %3550 = vmatpush.msra.mxu0 %v7288_v31  ;;  %v3492_v39 = vld [vmem:[#allocation3 + $0xb] sm:$0x1] }
 0x41f   :  { %3946 = vrot.lane.b32.xlu1 %v3945_v41, %s4062_s12 }
 0x420   :  { %3551 = vmatpush.msra.mxu0 %v7300_v52 }
 0x422   :  { %3552 = vmatpush.msra.mxu0 %v7315_v54 }
 0x424   :  { %3553 = vmatpush.msra.mxu0 %v7328_v13 }
 0x426   :  { %3554 = vmatpush.msra.mxu0 %v7340_v23  ;;  %v3336_v23 = vld [vmem:[%s7657_s5 + $0x1a8] sm:$0xff] }
 0x427   :  { %v3367_v21 = vpop.permute.xlu0 %3366 }
 0x428   :  { %v3381_v40 = vsel %vm144_vm7, %v3356_v60, %v3367_v21  ;;  %3555 = vmatpush.msra.mxu0 %v7352_v33  ;;  %v3335_v33 = vld [vmem:[%s7657_s5 + $0x1a0] sm:$0xff]  ;;  %v3494_v60 = vld [vmem:[#allocation3 + $0xd] sm:$0x1] }
 0x429   :  { %3404 = vmatmul.f32.vlgmr.msra.gmra.mxu2 %v3381_v40  ;;  %v3627_v40 = vld [vmem:[%s7659_s7 + $0x10] sm:$0xff] }
 0x42a   :  { %3556 = vmatpush.msra.mxu0 %v7365_v26  ;;  %v3334_v26 = vld [vmem:[%s7657_s5 + $0x198] sm:$0xff] }
 0x42b   :  { %v3258_v2 = vpop.f32.mrf.mxu0 }
 0x42c   :  { %v3259_v63 = vadd.f32 %v3258_v2, %v3239_v48  ;;  %3557 = vmatpush.msra.mxu0 %v7375_v18  ;;  %v3332_v18 = vld [vmem:[%s7657_s5 + $0x188] sm:$0xff]  ;;  %v3355_v48 = vld [vmem:[%s7658_s6] sm:$0x1] }
 0x430   :  { %v3278_v62 = vpop.f32.mrf.mxu1 }
 0x431   :  { %v3279_v7 = vadd.f32 %v3278_v62, %v3259_v63  ;;  %3741 = vmatmul.msk.f32.vlgmr.msrb.gmra.mxu2 %vm144_vm7, %v3364_v25  ;;  %v3658_v63 = vld [vmem:[%s7661_s9 + $0x10] sm:$0xff]  ;;  %v3657_v62 = vld [vmem:[%s7661_s9 + $0x8] sm:$0xff] }
 0x433   :  { %v3281_v45 = vmax.f32 %v3279_v7, 0.0  ;;  %v3371_v47 = vpop.permute.xlu1 %3370 }
 0x434   :  { %v3382_v34 = vsel %vm144_vm7, %v3358_v16, %v3371_v47 }
 0x435   :  { %3282 = vst.msk [vmem:[#allocation3 + $0xf] sm:$0x7] %vm2443_vm10, %v3281_v45  ;;  %3424 = vmatmul.f32.vlgmr.msra.gmra.mxu3 %v3382_v34 }
 0x436   :  { %3610 = vmatpush.msra.mxu3 %v7320_v17  ;;  %v3346_v17 = vld [vmem:[%s7657_s5 + $0x1f8] sm:$0xff] }
 0x437   :  { %3448 = vmatpush.msrb.mxu1 %v3346_v17  ;;  %3582 = vmatpush.msra.mxu2 %v3346_v17 }
 0x438   :  { %3611 = vmatpush.msra.mxu3 %v7333_v10  ;;  %v3345_v10 = vld [vmem:[%s7657_s5 + $0x1f0] sm:$0xff] }
 0x439   :  { %3449 = vmatpush.msrb.mxu1 %v3345_v10  ;;  %3583 = vmatpush.msra.mxu2 %v3345_v10 }
 0x43a   :  { %3612 = vmatpush.msra.mxu3 %v7345_v55  ;;  %v3360_v55 = vld [vmem:[#allocation3 + $0x4] sm:$0x1] }
 0x43b   :  { %3450 = vmatpush.msrb.mxu1 %v3344_v22  ;;  %3584 = vmatpush.msra.mxu2 %v3344_v22 }
 0x43c   :  { %v3497_v44 = vld [vmem:[#allocation3 + $0x10] sm:$0x1]  ;;  %3613 = vmatpush.msra.mxu3 %v7357_v59  ;;  %v3498_v13 = vld [vmem:[#allocation3 + $0x11] sm:$0x1] }
 0x43d   :  { %v3940_v6 = vpack.i.bf16 %v3497_v44, %v3363_v28  ;;  %3451 = vmatpush.msrb.mxu1 %v3343_v57  ;;  %3585 = vmatpush.msra.mxu2 %v3343_v57 }
 0x43e   :  { %3614 = vmatpush.msra.mxu3 %v7370_v36  ;;  %v3333_v36 = vld [vmem:[%s7657_s5 + $0x190] sm:$0xff] }
 0x43f   :  { %3941 = vrot.lane.b32.xlu0 %v3940_v6, %s4062_s12  ;;  %3452 = vmatpush.msrb.mxu1 %v3342_v0  ;;  %s3694_s12 = sshll.u32 %s4064_s4, 4  ;;  %s3695_s12 = int_to_ptr.vmem [resolvable:$true] %s3694_s12 }
 0x440   :  { %3615 = vmatpush.msra.mxu3 %v7382_v15  ;;  %3586 = vmatpush.msra.mxu2 %v3342_v0  ;;  %v3331_v15 = vld [vmem:[%s7657_s5 + $0x180] sm:$0xff] }
 0x441   :  { %3453 = vmatpush.msrb.mxu1 %v3341_v37 }
 0x442   :  { %3616 = vmatpush.msra.mxu3 %v7387_v51  ;;  %3587 = vmatpush.msra.mxu2 %v3341_v37  ;;  %v3656_v37 = vld [vmem:[%s7661_s9] sm:$0xff] }
 0x443   :  { %3454 = vmatpush.msrb.mxu1 %v3340_v49 }
 0x444   :  { %3617 = vmatpush.msra.mxu3 %v7395_v14  ;;  %3588 = vmatpush.msra.mxu2 %v3340_v49  ;;  %v3952_v49 = vld [vmem:[%s7660_s8] ss:$0 sm:$0xff] }
 0x445   :  { %3455 = vmatpush.msrb.mxu1 %v3339_v61 }
 0x446   :  { %3589 = vmatpush.msra.mxu2 %v3339_v61 }
 0x447   :  { %3456 = vmatpush.msrb.mxu1 %v3338_v3 }
 0x448   :  { %3590 = vmatpush.msra.mxu2 %v3338_v3 }
 0x449   :  { %3457 = vmatpush.msrb.mxu1 %v3337_v24 }
 0x44a   :  { %3591 = vmatpush.msra.mxu2 %v3337_v24  ;;  %v3953_v24 = vld [vmem:[%s7662_s10] ss:$0 sm:$0xff] }
 0x44b   :  { %3458 = vmatpush.msrb.mxu1 %v3336_v23 }
 0x44c   :  { %3592 = vmatpush.msra.mxu2 %v3336_v23 }
 0x44d   :  { %3459 = vmatpush.msrb.mxu1 %v3335_v33 }
 0x44e   :  { %3593 = vmatpush.msra.mxu2 %v3335_v33 }
 0x44f   :  { %3460 = vmatpush.msrb.mxu1 %v3334_v26 }
 0x450   :  { %3594 = vmatpush.msra.mxu2 %v3334_v26 }
 0x451   :  { %3461 = vmatpush.msrb.mxu1 %v3333_v36 }
 0x452   :  { %3595 = vmatpush.msra.mxu2 %v3333_v36 }
 0x453   :  { %3462 = vmatpush.msrb.mxu1 %v3332_v18 }
 0x454   :  { %3596 = vmatpush.msra.mxu2 %v3332_v18 }
 0x455   :  { %3463 = vmatpush.msrb.mxu1 %v3331_v15 }
 0x456   :  { %3597 = vmatpush.msra.mxu2 %v3331_v15 }
 0x457   :  { %3562 = vmatpush.msra.mxu1 %v7406_v9 }
 0x458   :  { %v3937_v31 = vpop.permute.xlu2 %3936 }
 0x459   :  { %v3939_v52 = vunpack.i.h.bf16 %v3937_v31  ;;  %v3938_v8 = vunpack.i.l.bf16 %v3937_v31  ;;  %3563 = vmatpush.msra.mxu1 %v7411_v11 }
 0x45b   :  { %v3383_v54 = vsel %vm144_vm7, %v3360_v55, %v3938_v8  ;;  %v3515_v59 = vsel %vm144_vm7, %v3490_v27, %v3939_v52  ;;  %3564 = vmatpush.msra.mxu1 %v7418_v12  ;;  %v3362_v12 = vld [vmem:[#allocation3 + $0x6] sm:$0x1] }
 0x45c   :  { %3444 = vmatmul.f32.vlgmr.msrb.gmra.mxu0 %v3383_v54  ;;  %3538 = vmatmul.f32.vlgmr.msrb.gmra.mxu3 %v3515_v59 }
 0x45d   :  { %3565 = vmatpush.msra.mxu1 %v7425_v5  ;;  %v3496_v5 = vld [vmem:[#allocation3 + $0xf] sm:$0x1]  ;;  %3648 = vmatpush.msrb.mxu0 %v3628_v1 }
 0x45f   :  { %3566 = vmatpush.msra.mxu1 %v7432_v53  ;;  %3649 = vmatpush.msrb.mxu0 %v3627_v40 }
 0x461   :  { %3567 = vmatpush.msra.mxu1 %v7439_v4  ;;  %3650 = vmatpush.msrb.mxu0 %v3626_v29 }
 0x463   :  { %3568 = vmatpush.msra.mxu1 %v7448_v56  ;;  %v3625_v56 = vld [vmem:[%s7659_s7] sm:$0xff] }
 0x464   :  { %3742 = vmatmul.msk.f32.vlgmr.msra.gmra.mxu3 %vm144_vm7, %v3498_v13  ;;  %3651 = vmatpush.msrb.mxu0 %v3625_v56 }
 0x465   :  { %3569 = vmatpush.msra.mxu1 %v7455_v20  ;;  %v3659_v20 = vld [vmem:[%s7661_s9 + $0x18] sm:$0xff] }
 0x467   :  { %3570 = vmatpush.msra.mxu1 %v7462_v50 }
 0x469   :  { %3571 = vmatpush.msra.mxu1 %v7469_v42 }
 0x46b   :  { %3572 = vmatpush.msra.mxu1 %v7477_v46 }
 0x46d   :  { %3573 = vmatpush.msra.mxu1 %v7484_v19 }
 0x46f   :  { %3574 = vmatpush.msra.mxu1 %v7492_v35 }
 0x471   :  { %3575 = vmatpush.msra.mxu1 %v7499_v58 }
 0x473   :  { %3576 = vmatpush.msra.mxu1 %v7507_v30 }
 0x475   :  { %3577 = vmatpush.msra.mxu1 %v7514_v43 }
 0x491   :  { %v3947_v51 = vpop.permute.xlu1 %3946 }
 0x492   :  { %v3948_v14 = vunpack.i.l.bf16 %v3947_v51  ;;  %v3949_v21 = vunpack.i.h.bf16 %v3947_v51 }
 0x494   :  { %v3516_v32 = vsel %vm144_vm7, %v3492_v39, %v3948_v14  ;;  %v3517_v4 = vsel %vm144_vm7, %v3494_v60, %v3949_v21 }
 0x495   :  { %3558 = vmatmul.f32.vlgmr.msra.gmra.mxu0 %v3516_v32 }
 0x4ac   :  { %v3405_v2 = vpop.f32.mrf.mxu2 }
 0x4ad   :  { %v3406_v42 = vadd.f32 %v3405_v2, %v3355_v48 }
 0x4b1   :  { %v3942_v41 = vpop.permute.xlu0 %3941 }
 0x4b2   :  { %v3944_v9 = vunpack.i.h.bf16 %v3942_v41  ;;  %v3943_v11 = vunpack.i.l.bf16 %v3942_v41 }
 0x4b4   :  { %v3384_v53 = vsel %vm144_vm7, %v3362_v12, %v3943_v11  ;;  %v3518_v38 = vsel %vm144_vm7, %v3496_v5, %v3944_v9  ;;  %v3485_v16 = vpop.f32.mrf.mxu2 }
 0x4b5   :  { %3464 = vmatmul.f32.vlgmr.msrb.gmra.mxu1 %v3384_v53  ;;  %3598 = vmatmul.f32.vlgmr.msra.gmra.mxu2 %v3518_v38 }
 0x4b6   :  { %3679 = vmatpush.msrb.mxu1 %v3659_v20 }
 0x4b8   :  { %v3425_v50 = vpop.f32.mrf.mxu3  ;;  %3680 = vmatpush.msrb.mxu1 %v3658_v63 }
 0x4b9   :  { %v3426_v7 = vadd.f32 %v3425_v50, %v3406_v42 }
 0x4ba   :  { %3681 = vmatpush.msrb.mxu1 %v3657_v62 }
 0x4bc   :  { %3682 = vmatpush.msrb.mxu1 %v3656_v37 }
 0x4bd   :  { %3578 = vmatmul.f32.vlgmr.msra.gmra.mxu1 %v3517_v4 }
 0x4d9   :  { %v3445_v25 = vpop.f32.mrf.mxu0 }
 0x4da   :  { %v3446_v46 = vadd.f32 %v3445_v25, %v3426_v7 }
 0x4df   :  { %v3539_v19 = vpop.f32.mrf.mxu3 }
 0x4e0   :  { %v3540_v58 = vadd.f32 %v3539_v19, %v3355_v48 }
 0x4e7   :  { %v3619_v10 = vpop.f32.mrf.mxu3 }
 0x512   :  { %v3559_v35 = vpop.f32.mrf.mxu0 }
 0x513   :  { %v3560_v43 = vadd.f32 %v3559_v35, %v3540_v58 }
 0x532   :  { %v3465_v45 = vpop.f32.mrf.mxu1 }
 0x533   :  { %v3466_v47 = vadd.f32 %v3465_v45, %v3446_v46 }
 0x535   :  { %v3486_v34 = vadd.f32 %v3485_v16, %v3466_v47 }
 0x537   :  { %v3488_v30 = vmax.f32 %v3486_v34, 0.0 }
 0x538   :  { %v3599_v6 = vpop.f32.mrf.mxu2 }
 0x539   :  { %3489 = vst.msk [vmem:[#allocation4] sm:$0x1] %vm177_vm8, %v3488_v30 }
 0x53a   :  { %v3579_v28 = vpop.f32.mrf.mxu1 }
 0x53b   :  { %v3580_v44 = vadd.f32 %v3579_v28, %v3560_v43 }
 0x53d   :  { %v3600_v17 = vadd.f32 %v3599_v6, %v3580_v44 }
 0x53f   :  { %v3620_v22 = vadd.f32 %v3619_v10, %v3600_v17 }
 0x541   :  { %v3622_v57 = vmax.f32 %v3620_v22, 0.0 }
 0x543   :  { %3623 = vst.msk [vmem:[#allocation4 + $0x1] sm:$0x1] %vm177_vm8, %v3622_v57 }
 0x54a   :  { %v3624_v0 = vld [vmem:[#allocation4] sm:$0x3] }
 0x54b   :  { %3743 = vmatmul.msk.f32.vlgmr.msrb.gmra.mxu0 %vm129_vm3, %v3624_v0 }
 0x5c8   :  { %v3653_v61 = vpop.f32.mrf.mxu0 }
 0x5c9   :  { %v3654_v3 = vadd.f32 %v3952_v49, %v3653_v61 }
 0x5cb   :  { %3744 = vmatmul.msk.f32.vlgmr.msrb.gmra.mxu1 %vm129_vm3, %v3654_v3 }
 0x648   :  { %v3684_v31 = vpop.f32.mrf.mxu1 }
 0x649   :  { %v3685_v52 = vadd.f32 %v3953_v24, %v3684_v31 }
 0x64b   :  { %3688 = vst.msk [vmem:[#allocation5] sm:$0x3] %vm3687_vm11, %v3685_v52 }
 0x64c   :  { %3699 = dma.vmem_to_hbm [thread:$0]  %s3695_s12, 32, %s3697_s30, [#allocation6]  }
 0x64d   :  { %4053 = dma.done.wait [#allocation6], 32  }
 0x64e   :  { %4054 = vsyncadd [#allocation6], 4294967264 }
 0x64f   :  { %3704 = vsyncpa [#allocation6], 1 }

</bundles_post_ra>
